<compile_context>
chip_gen: v7x
topology: tpu7x:2x2x1
jax: 0.10.0
libtpu: 0.0.40
codegen_flags: <defaults>
</compile_context>

<pallas_src>
import functools

import jax
import jax.numpy as jnp
from jax import lax
from jax.experimental import pallas as pl
from jax.experimental.pallas import tpu as pltpu

H = 128                 # encoder output dim = hidden_size * 2 (hidden_size forced to 64)
HID = 64                # internal hidden_size of the fc head
NEXT = max(1, HID // 4) # 16
OUT = 1
LRELU_SLOPE = 0.01
BN_EPS = 1e-5
SUBLANE = 8             # f32 sublane count; batch padded to a multiple of this
MAX_CHUNK = 128         # GRU time-steps processed per grid iteration


# ----------------------------- shared GRU chunk body -----------------------------
def _gru_chunk(x_ref, w_ih_ref, w_hh_ref, b_ih_ref, b_hh_ref,
               h_scratch, gi_scratch, *, chunk, batch, t_total):
    """Run `chunk` GRU time steps for this grid iteration, carrying h in h_scratch.

    x_ref:      (chunk*batch, E)  bf16, time-major rows [t*batch : (t+1)*batch)
    w_ih_ref:   (E, 3H) bf16, gates ordered [r | z | n] (PyTorch convention)
    w_hh_ref:   (H, 3H) bf16
    b_ih_ref / b_hh_ref: (1, 3H) f32
    h_scratch:  (batch, H) f32  -- persists across grid steps
    gi_scratch: (chunk*batch, 3H) f32
    """
    ci = pl.program_id(0)

    @pl.when(ci == 0)
    def _():
        h_scratch[...] = jnp.zeros_like(h_scratch)

    # Hoisted input projection: one large MXU matmul for the whole chunk, bias folded in once.
    gi_scratch[...] = (
        jnp.dot(x_ref[...], w_ih_ref[...], preferred_element_type=jnp.float32)
        + b_ih_ref[...]
    )

    w_hh = w_hh_ref[...]                                        # loop-invariant (H, 3H) bf16
    b_hh = jnp.broadcast_to(b_hh_ref[...], (batch, 3 * H))      # broadcast hoisted out of loop

    needs_mask = (t_total % chunk) != 0                         # only zero-padded tail steps

    def step(i, h):
        row = pl.multiple_of(i * batch, batch)
        gi = gi_scratch[pl.ds(row, batch), :]                   # (B, 3H) f32
        gh = jnp.dot(h.astype(jnp.bfloat16), w_hh,
                     preferred_element_type=jnp.float32) + b_hh
        r = jax.nn.sigmoid(gi[:, 0:H] + gh[:, 0:H])
        z = jax.nn.sigmoid(gi[:, H:2 * H] + gh[:, H:2 * H])
        n = jnp.tanh(gi[:, 2 * H:3 * H] + r * gh[:, 2 * H:3 * H])
        h_new = (1.0 - z) * n + z * h
        if needs_mask:
            h_new = jnp.where(ci * chunk + i < t_total, h_new, h)
        return h_new

    unroll = True if chunk <= 32 else 8
    h_scratch[...] = lax.fori_loop(0, chunk, step, h_scratch[...], unroll=unroll)


# ----------------------------- protein encoder kernel -----------------------------
def gru_kernel(x_ref, w_ih_ref, w_hh_ref, b_ih_ref, b_hh_ref,
               out_ref, h_scratch, gi_scratch, *, chunk, batch, t_total):
    _gru_chunk(x_ref, w_ih_ref, w_hh_ref, b_ih_ref, b_hh_ref,
               h_scratch, gi_scratch, chunk=chunk, batch=batch, t_total=t_total)

    @pl.when(pl.program_id(0) == pl.num_programs(0) - 1)
    def _():
        out_ref[...] = h_scratch[...]


# --------------------- compound encoder kernel with fused fc head ---------------------
def gru_head_kernel(x_ref, w_ih_ref, w_hh_ref, b_ih_ref, b_hh_ref,
                    p_out_ref, w1_ref, b1_ref, w2_ref, b2_ref, w3_ref, b3_ref,
                    out_ref, h_scratch, gi_scratch, *, chunk, batch, t_total):
    _gru_chunk(x_ref, w_ih_ref, w_hh_ref, b_ih_ref, b_hh_ref,
               h_scratch, gi_scratch, chunk=chunk, batch=batch, t_total=t_total)

    @pl.when(pl.program_id(0) == pl.num_programs(0) - 1)
    def _():
        # concat(protein, compound) -> Linear(256->64) (BN folded) -> LeakyReLU
        # -> Linear(64->16) -> LeakyReLU -> Linear(16->1).  Dropout = identity (inference).
        feat = jnp.concatenate([p_out_ref[...], h_scratch[...]], axis=1)   # (B, 256) f32
        h1 = jnp.dot(feat.astype(jnp.bfloat16), w1_ref[...],
                     preferred_element_type=jnp.float32) + b1_ref[...]
        h1 = jnp.where(h1 >= 0, h1, LRELU_SLOPE * h1)
        h2 = jnp.dot(h1.astype(jnp.bfloat16), w2_ref[...],
                     preferred_element_type=jnp.float32) + b2_ref[...]
        h2 = jnp.where(h2 >= 0, h2, LRELU_SLOPE * h2)
        out_ref[...] = jnp.dot(h2.astype(jnp.bfloat16), w3_ref[...],
                               preferred_element_type=jnp.float32) + b3_ref[...]


# ----------------------------- host-side wrappers -----------------------------
def _chunking(t):
    chunk = t if t <= MAX_CHUNK else MAX_CHUNK
    n_chunks = pl.cdiv(t, chunk)
    return chunk, n_chunks


def _time_major_padded(emb, batch_pad):
    """(B, T, E) f32 -> zero-pad batch to batch_pad, transpose to (T, Bp, E), cast to bf16."""
    b = emb.shape[0]
    emb = jnp.pad(emb, ((0, batch_pad - b), (0, 0), (0, 0)))
    return jnp.transpose(emb, (1, 0, 2)).astype(jnp.bfloat16)


def _pad_and_flatten_time(x_tbe, chunk, n_chunks):
    t, batch, e = x_tbe.shape
    t_pad = chunk * n_chunks
    if t_pad != t:
        x_tbe = jnp.pad(x_tbe, ((0, t_pad - t), (0, 0), (0, 0)))
    return x_tbe.reshape(t_pad * batch, e)


_COMMON_COMPILER_PARAMS = pltpu.CompilerParams(
    dimension_semantics=("arbitrary",),              # sequential recurrence over T chunks
    vmem_limit_bytes=32 * 1024 * 1024,
)


def gru_encode(x_tbe, w_ih, w_hh, b_ih, b_hh):
    """x_tbe: (T, Bp, E) bf16 time-major.  Returns final hidden state (Bp, H) f32."""
    t, batch, e = x_tbe.shape
    chunk, n_chunks = _chunking(t)
    x2d = _pad_and_flatten_time(x_tbe, chunk, n_chunks)

    kernel = functools.partial(gru_kernel, chunk=chunk, batch=batch, t_total=t)
    return pl.pallas_call(
        kernel,
        out_shape=jax.ShapeDtypeStruct((batch, H), jnp.float32),
        grid_spec=pltpu.PrefetchScalarGridSpec(
            num_scalar_prefetch=0,
            grid=(n_chunks,),
            in_specs=[
                pl.BlockSpec((chunk * batch, e), lambda c: (c, 0)),   # pipelined sequence chunks
                pl.BlockSpec((e, 3 * H), lambda c: (0, 0)),           # weights stay VMEM-resident
                pl.BlockSpec((H, 3 * H), lambda c: (0, 0)),
                pl.BlockSpec((1, 3 * H), lambda c: (0, 0)),
                pl.BlockSpec((1, 3 * H), lambda c: (0, 0)),
            ],
            out_specs=pl.BlockSpec((batch, H), lambda c: (0, 0)),
            scratch_shapes=[
                pltpu.VMEM((batch, H), jnp.float32),                  # carried hidden state
                pltpu.VMEM((chunk * batch, 3 * H), jnp.float32),      # hoisted x @ W_ih + b_ih
            ],
        ),
        compiler_params=_COMMON_COMPILER_PARAMS,
        cost_estimate=pl.CostEstimate(
            flops=2 * t * batch * (e + H) * 3 * H,
            transcendentals=3 * t * batch * H,
            bytes_accessed=x2d.size * 2 + (w_ih.size + w_hh.size) * 2 + batch * H * 4,
        ),
    )(x2d, w_ih, w_hh, b_ih, b_hh)


def gru_encode_with_head(x_tbe, w_ih, w_hh, b_ih, b_hh, p_out, fc):
    """Compound GRU over (T, Bp, E) bf16 + fused fc head on concat(p_out, h).  Returns (Bp, 1)."""
    t, batch, e = x_tbe.shape
    chunk, n_chunks = _chunking(t)
    x2d = _pad_and_flatten_time(x_tbe, chunk, n_chunks)

    kernel = functools.partial(gru_head_kernel, chunk=chunk, batch=batch, t_total=t)
    head_flops = 2 * batch * (2 * H * HID + HID * NEXT + NEXT * OUT)
    return pl.pallas_call(
        kernel,
        out_shape=jax.ShapeDtypeStruct((batch, OUT), jnp.float32),
        grid_spec=pltpu.PrefetchScalarGridSpec(
            num_scalar_prefetch=0,
            grid=(n_chunks,),
            in_specs=[
                pl.BlockSpec((chunk * batch, e), lambda c: (c, 0)),
                pl.BlockSpec((e, 3 * H), lambda c: (0, 0)),
                pl.BlockSpec((H, 3 * H), lambda c: (0, 0)),
                pl.BlockSpec((1, 3 * H), lambda c: (0, 0)),
                pl.BlockSpec((1, 3 * H), lambda c: (0, 0)),
                pl.BlockSpec((batch, H), lambda c: (0, 0)),           # frozen protein features
                pl.BlockSpec((2 * H, HID), lambda c: (0, 0)),
                pl.BlockSpec((1, HID), lambda c: (0, 0)),
                pl.BlockSpec((HID, NEXT), lambda c: (0, 0)),
                pl.BlockSpec((1, NEXT), lambda c: (0, 0)),
                pl.BlockSpec((NEXT, OUT), lambda c: (0, 0)),
                pl.BlockSpec((1, OUT), lambda c: (0, 0)),
            ],
            out_specs=pl.BlockSpec((batch, OUT), lambda c: (0, 0)),
            scratch_shapes=[
                pltpu.VMEM((batch, H), jnp.float32),
                pltpu.VMEM((chunk * batch, 3 * H), jnp.float32),
            ],
        ),
        compiler_params=_COMMON_COMPILER_PARAMS,
        cost_estimate=pl.CostEstimate(
            flops=2 * t * batch * (e + H) * 3 * H + head_flops,
            transcendentals=3 * t * batch * H,
            bytes_accessed=x2d.size * 2 + (w_ih.size + w_hh.size) * 2 + batch * (H + OUT) * 4,
        ),
    )(x2d, w_ih, w_hh, b_ih, b_hh, p_out,
      fc["w1"], fc["b1"], fc["w2"], fc["b2"], fc["w3"], fc["b3"])


# ----------------------------- full forward (glue in plain JAX) -----------------------------
@jax.jit
def gru_freeze_forward(protein_seq, compound_seq, params):
    b = protein_seq.shape[0]
    b_pad = max(SUBLANE, pl.cdiv(b, SUBLANE) * SUBLANE)

    # Embedding lookups (gather glue).
    pe = params["prot_emb"][protein_seq]                 # (B, T_P, E) f32
    ce = params["comp_emb"][compound_seq]                # (B, T_C, E) f32
    pe = _time_major_padded(pe, b_pad)                   # (T_P, Bp, E) bf16
    ce = _time_major_padded(ce, b_pad)                   # (T_C, Bp, E) bf16

    def bf16_gru(w_ih, w_hh, b_ih, b_hh):
        return w_ih.astype(jnp.bfloat16), w_hh.astype(jnp.bfloat16), b_ih, b_hh

    # Protein encoder runs under torch.no_grad() in GRU_Freeze -> frozen.
    p_out = lax.stop_gradient(gru_encode(pe, *bf16_gru(*params["prot_gru"])))   # (Bp, 128)

    # Fold inference-mode BatchNorm1d into the first Linear of the head.
    fc = params["fc"]
    scale = fc["gamma"] * lax.rsqrt(fc["var"] + BN_EPS)                          # (1, HID)
    fc_folded = dict(
        w1=(fc["w1"] * scale).astype(jnp.bfloat16),
        b1=(fc["b1"] - fc["mean"]) * scale + fc["beta"],
        w2=fc["w2"].astype(jnp.bfloat16), b2=fc["b2"],
        w3=fc["w3"].astype(jnp.bfloat16), b3=fc["b3"],
    )

    out = gru_encode_with_head(ce, *bf16_gru(*params["comp_gru"]), p_out, fc_folded)  # (Bp, 1)
    return jnp.squeeze(out[:b])


# ----------------------------- deterministic parameter init -----------------------------
def init_params(key, vocab_p, vocab_c, emb_dim):
    ks = iter(jax.random.split(key, 16))
    nrm = lambda k, shp, s=0.05: (jax.random.normal(k, shp, jnp.float32) * s)

    def gru_params(k):
        k1, k2, k3, k4 = jax.random.split(k, 4)
        return (nrm(k1, (emb_dim, 3 * H)), nrm(k2, (H, 3 * H)),
                nrm(k3, (1, 3 * H)), nrm(k4, (1, 3 * H)))

    fc = dict(
        w1=nrm(next(ks), (4 * HID, HID)), b1=nrm(next(ks), (1, HID)),
        gamma=jnp.ones((1, HID), jnp.float32), beta=jnp.zeros((1, HID), jnp.float32),
        mean=jnp.zeros((1, HID), jnp.float32), var=jnp.ones((1, HID), jnp.float32),
        w2=nrm(next(ks), (HID, NEXT)), b2=nrm(next(ks), (1, NEXT)),
        w3=nrm(next(ks), (NEXT, OUT)), b3=nrm(next(ks), (1, OUT)),
    )
    return dict(
        prot_emb=nrm(next(ks), (vocab_p, emb_dim), 0.1),
        comp_emb=nrm(next(ks), (vocab_c, emb_dim), 0.1),
        prot_gru=gru_params(next(ks)),
        comp_gru=gru_params(next(ks)),
        fc=fc,
    )


if __name__ == "__main__":
    B, T_P, T_C = 2, 16, 8
    VOCAB_P, VOCAB_C, EMB = 26, 64, 64

    key = jax.random.PRNGKey(0)
    k_par, k_p, k_c = jax.random.split(key, 3)
    params = init_params(k_par, VOCAB_P, VOCAB_C, EMB)

    protein_seq = jax.random.randint(k_p, (B, T_P), 0, VOCAB_P, dtype=jnp.int32)
    compound_seq = jax.random.randint(k_c, (B, T_C), 0, VOCAB_C, dtype=jnp.int32)

    out = gru_freeze_forward(protein_seq, compound_seq, params)
    out = jax.block_until_ready(out)
    assert out.shape == (B,), out.shape
    assert jnp.all(jnp.isfinite(out))
    print("KERNEL_OK")
</pallas_src>

<mosaic_0001>
module attributes {stable_mosaic.version = 11 : i64} {
  func.func @gru_kernel(%arg0: i32, %arg1: memref<128x64xbf16, #tpu.memory_space<vmem>>, %arg2: memref<64x384xbf16, #tpu.memory_space<vmem>>, %arg3: memref<128x384xbf16, #tpu.memory_space<vmem>>, %arg4: memref<1x384xf32, #tpu.memory_space<vmem>>, %arg5: memref<1x384xf32, #tpu.memory_space<vmem>>, %arg6: memref<8x128xf32, #tpu.memory_space<vmem>>, %arg7: memref<8x128xf32, #tpu.memory_space<vmem>>, %arg8: memref<128x384xf32, #tpu.memory_space<vmem>>) attributes {dimension_semantics = [#tpu.dimension_semantics<arbitrary>], iteration_bounds = array<i64: 1>, scalar_prefetch = 0 : i64, scratch_operands = 2 : i64, tpu.core_type = #tpu.core_type<tc>, window_params = [{transform_indices = @transform_0, window_bounds = array<i64: 128, 64>}, {pipeline_mode = #tpu.pipeline_mode<synchronous>, transform_indices = @transform_1, window_bounds = array<i64: 64, 384>}, {pipeline_mode = #tpu.pipeline_mode<synchronous>, transform_indices = @transform_2, window_bounds = array<i64: 128, 384>}, {pipeline_mode = #tpu.pipeline_mode<synchronous>, transform_indices = @transform_3, window_bounds = array<i64: 1, 384>}, {pipeline_mode = #tpu.pipeline_mode<synchronous>, transform_indices = @transform_4, window_bounds = array<i64: 1, 384>}, {pipeline_mode = #tpu.pipeline_mode<synchronous>, transform_indices = @transform_5, window_bounds = array<i64: 8, 128>}]} {
    %c0_i32 = arith.constant 0 : i32
    %0 = arith.cmpi eq, %arg0, %c0_i32 : i32
    %1 = arith.extui %0 : i1 to i32
    %c0_i32_0 = arith.constant 0 : i32
    %2 = arith.cmpi ne, %1, %c0_i32_0 : i32
    scf.if %2 {
      %cst_115 = arith.constant 0.000000e+00 : f32
      %547 = vector.broadcast %cst_115 : f32 to vector<8x128xf32>
      %c0_116 = arith.constant 0 : index
      %c0_117 = arith.constant 0 : index
      %548 = vector.load %arg7[%c0_116, %c0_117] : memref<8x128xf32, #tpu.memory_space<vmem>>, vector<8x128xf32>
      tpu.vector_store %arg7[%c0_116, %c0_117], %547 {strides = array<i32>} : memref<8x128xf32, #tpu.memory_space<vmem>>, vector<8x128xf32>,
    } else {
    }
    %c0 = arith.constant 0 : index
    %c0_1 = arith.constant 0 : index
    %3 = vector.load %arg1[%c0, %c0_1] : memref<128x64xbf16, #tpu.memory_space<vmem>>, vector<128x64xbf16>
    %c0_2 = arith.constant 0 : index
    %c0_3 = arith.constant 0 : index
    %4 = vector.load %arg2[%c0_2, %c0_3] : memref<64x384xbf16, #tpu.memory_space<vmem>>, vector<64x384xbf16>
    %cst = arith.constant dense<0.000000e+00> : vector<128x384xf32>
    %5 = tpu.matmul %3, %4, %cst {dimension_numbers = #tpu.dot_dimension_numbers<[1], [0], [0], [1], [0, 0, 1, 1], [], []>} : vector<128x64xbf16>, vector<64x384xbf16>, vector<128x384xf32> -> vector<128x384xf32>
    %c0_4 = arith.constant 0 : index
    %c0_5 = arith.constant 0 : index
    %6 = vector.load %arg4[%c0_4, %c0_5] : memref<1x384xf32, #tpu.memory_space<vmem>>, vector<1x384xf32>
    %7 = vector.broadcast %6 : vector<1x384xf32> to vector<128x384xf32>
    %8 = arith.addf %5, %7 : vector<128x384xf32>
    %c0_6 = arith.constant 0 : index
    %c0_7 = arith.constant 0 : index
    %9 = vector.load %arg8[%c0_6, %c0_7] : memref<128x384xf32, #tpu.memory_space<vmem>>, vector<128x384xf32>
    tpu.vector_store %arg8[%c0_6, %c0_7], %8 {strides = array<i32>} : memref<128x384xf32, #tpu.memory_space<vmem>>, vector<128x384xf32>,
    %c0_8 = arith.constant 0 : index
    %c0_9 = arith.constant 0 : index
    %10 = vector.load %arg3[%c0_8, %c0_9] : memref<128x384xbf16, #tpu.memory_space<vmem>>, vector<128x384xbf16>
    %c0_10 = arith.constant 0 : index
    %c0_11 = arith.constant 0 : index
    %11 = vector.load %arg5[%c0_10, %c0_11] : memref<1x384xf32, #tpu.memory_space<vmem>>, vector<1x384xf32>
    %12 = vector.shape_cast %11 : vector<1x384xf32> to vector<1x384xf32>
    %13 = vector.broadcast %12 : vector<1x384xf32> to vector<8x384xf32>
    %c0_12 = arith.constant 0 : index
    %c0_13 = arith.constant 0 : index
    %14 = vector.load %arg7[%c0_12, %c0_13] : memref<8x128xf32, #tpu.memory_space<vmem>>, vector<8x128xf32>
    %c0_i32_14 = arith.constant 0 : i32
    %c8_i32 = arith.constant 8 : i32
    %15 = arith.muli %c0_i32_14, %c8_i32 : i32
    %16 = tpu.assume_multiple %15, 8 : i32
    %17 = arith.index_cast %16 : i32 to index
    %c0_15 = arith.constant 0 : index
    %18 = vector.load %arg8[%17, %c0_15] : memref<128x384xf32, #tpu.memory_space<vmem>>, vector<8x384xf32>
    %19 = arith.truncf %14 : vector<8x128xf32> to vector<8x128xbf16>
    %cst_16 = arith.constant dense<0.000000e+00> : vector<8x384xf32>
    %20 = tpu.matmul %19, %10, %cst_16 {dimension_numbers = #tpu.dot_dimension_numbers<[1], [0], [0], [1], [0, 0, 1, 1], [], []>} : vector<8x128xbf16>, vector<128x384xbf16>, vector<8x384xf32> -> vector<8x384xf32>
    %21 = arith.addf %20, %13 : vector<8x384xf32>
    %22 = vector.extract_strided_slice %18 {offsets = [0, 0], sizes = [8, 128], strides = [1, 1]} : vector<8x384xf32> to vector<8x128xf32>
    %23 = vector.extract_strided_slice %21 {offsets = [0, 0], sizes = [8, 128], strides = [1, 1]} : vector<8x384xf32> to vector<8x128xf32>
    %24 = arith.addf %22, %23 : vector<8x128xf32>
    %25 = arith.negf %24 : vector<8x128xf32>
    %26 = math.exp %25 : vector<8x128xf32>
    %cst_17 = arith.constant 1.000000e+00 : f32
    %27 = vector.broadcast %cst_17 : f32 to vector<8x128xf32>
    %28 = arith.addf %27, %26 : vector<8x128xf32>
    %29 = arith.divf %27, %28 : vector<8x128xf32>
    %30 = vector.extract_strided_slice %18 {offsets = [0, 128], sizes = [8, 128], strides = [1, 1]} : vector<8x384xf32> to vector<8x128xf32>
    %31 = vector.extract_strided_slice %21 {offsets = [0, 128], sizes = [8, 128], strides = [1, 1]} : vector<8x384xf32> to vector<8x128xf32>
    %32 = arith.addf %30, %31 : vector<8x128xf32>
    %33 = arith.negf %32 : vector<8x128xf32>
    %34 = math.exp %33 : vector<8x128xf32>
    %cst_18 = arith.constant 1.000000e+00 : f32
    %35 = vector.broadcast %cst_18 : f32 to vector<8x128xf32>
    %36 = arith.addf %35, %34 : vector<8x128xf32>
    %37 = arith.divf %35, %36 : vector<8x128xf32>
    %38 = vector.extract_strided_slice %18 {offsets = [0, 256], sizes = [8, 128], strides = [1, 1]} : vector<8x384xf32> to vector<8x128xf32>
    %39 = vector.extract_strided_slice %21 {offsets = [0, 256], sizes = [8, 128], strides = [1, 1]} : vector<8x384xf32> to vector<8x128xf32>
    %40 = arith.mulf %29, %39 : vector<8x128xf32>
    %41 = arith.addf %38, %40 : vector<8x128xf32>
    %42 = math.tanh %41 : vector<8x128xf32>
    %cst_19 = arith.constant 1.000000e+00 : f32
    %43 = vector.broadcast %cst_19 : f32 to vector<8x128xf32>
    %44 = arith.subf %43, %37 : vector<8x128xf32>
    %45 = arith.mulf %44, %42 : vector<8x128xf32>
    %46 = arith.mulf %37, %14 : vector<8x128xf32>
    %47 = arith.addf %45, %46 : vector<8x128xf32>
    %c1_i32 = arith.constant 1 : i32
    %c8_i32_20 = arith.constant 8 : i32
    %48 = arith.muli %c1_i32, %c8_i32_20 : i32
    %49 = tpu.assume_multiple %48, 8 : i32
    %50 = arith.index_cast %49 : i32 to index
    %c0_21 = arith.constant 0 : index
    %51 = vector.load %arg8[%50, %c0_21] : memref<128x384xf32, #tpu.memory_space<vmem>>, vector<8x384xf32>
    %52 = arith.truncf %47 : vector<8x128xf32> to vector<8x128xbf16>
    %cst_22 = arith.constant dense<0.000000e+00> : vector<8x384xf32>
    %53 = tpu.matmul %52, %10, %cst_22 {dimension_numbers = #tpu.dot_dimension_numbers<[1], [0], [0], [1], [0, 0, 1, 1], [], []>} : vector<8x128xbf16>, vector<128x384xbf16>, vector<8x384xf32> -> vector<8x384xf32>
    %54 = arith.addf %53, %13 : vector<8x384xf32>
    %55 = vector.extract_strided_slice %51 {offsets = [0, 0], sizes = [8, 128], strides = [1, 1]} : vector<8x384xf32> to vector<8x128xf32>
    %56 = vector.extract_strided_slice %54 {offsets = [0, 0], sizes = [8, 128], strides = [1, 1]} : vector<8x384xf32> to vector<8x128xf32>
    %57 = arith.addf %55, %56 : vector<8x128xf32>
    %58 = arith.negf %57 : vector<8x128xf32>
    %59 = math.exp %58 : vector<8x128xf32>
    %cst_23 = arith.constant 1.000000e+00 : f32
    %60 = vector.broadcast %cst_23 : f32 to vector<8x128xf32>
    %61 = arith.addf %60, %59 : vector<8x128xf32>
    %62 = arith.divf %60, %61 : vector<8x128xf32>
    %63 = vector.extract_strided_slice %51 {offsets = [0, 128], sizes = [8, 128], strides = [1, 1]} : vector<8x384xf32> to vector<8x128xf32>
    %64 = vector.extract_strided_slice %54 {offsets = [0, 128], sizes = [8, 128], strides = [1, 1]} : vector<8x384xf32> to vector<8x128xf32>
    %65 = arith.addf %63, %64 : vector<8x128xf32>
    %66 = arith.negf %65 : vector<8x128xf32>
    %67 = math.exp %66 : vector<8x128xf32>
    %cst_24 = arith.constant 1.000000e+00 : f32
    %68 = vector.broadcast %cst_24 : f32 to vector<8x128xf32>
    %69 = arith.addf %68, %67 : vector<8x128xf32>
    %70 = arith.divf %68, %69 : vector<8x128xf32>
    %71 = vector.extract_strided_slice %51 {offsets = [0, 256], sizes = [8, 128], strides = [1, 1]} : vector<8x384xf32> to vector<8x128xf32>
    %72 = vector.extract_strided_slice %54 {offsets = [0, 256], sizes = [8, 128], strides = [1, 1]} : vector<8x384xf32> to vector<8x128xf32>
    %73 = arith.mulf %62, %72 : vector<8x128xf32>
    %74 = arith.addf %71, %73 : vector<8x128xf32>
    %75 = math.tanh %74 : vector<8x128xf32>
    %cst_25 = arith.constant 1.000000e+00 : f32
    %76 = vector.broadcast %cst_25 : f32 to vector<8x128xf32>
    %77 = arith.subf %76, %70 : vector<8x128xf32>
    %78 = arith.mulf %77, %75 : vector<8x128xf32>
    %79 = arith.mulf %70, %47 : vector<8x128xf32>
    %80 = arith.addf %78, %79 : vector<8x128xf32>
    %c2_i32 = arith.constant 2 : i32
    %c8_i32_26 = arith.constant 8 : i32
    %81 = arith.muli %c2_i32, %c8_i32_26 : i32
    %82 = tpu.assume_multiple %81, 8 : i32
    %83 = arith.index_cast %82 : i32 to index
    %c0_27 = arith.constant 0 : index
    %84 = vector.load %arg8[%83, %c0_27] : memref<128x384xf32, #tpu.memory_space<vmem>>, vector<8x384xf32>
    %85 = arith.truncf %80 : vector<8x128xf32> to vector<8x128xbf16>
    %cst_28 = arith.constant dense<0.000000e+00> : vector<8x384xf32>
    %86 = tpu.matmul %85, %10, %cst_28 {dimension_numbers = #tpu.dot_dimension_numbers<[1], [0], [0], [1], [0, 0, 1, 1], [], []>} : vector<8x128xbf16>, vector<128x384xbf16>, vector<8x384xf32> -> vector<8x384xf32>
    %87 = arith.addf %86, %13 : vector<8x384xf32>
    %88 = vector.extract_strided_slice %84 {offsets = [0, 0], sizes = [8, 128], strides = [1, 1]} : vector<8x384xf32> to vector<8x128xf32>
    %89 = vector.extract_strided_slice %87 {offsets = [0, 0], sizes = [8, 128], strides = [1, 1]} : vector<8x384xf32> to vector<8x128xf32>
    %90 = arith.addf %88, %89 : vector<8x128xf32>
    %91 = arith.negf %90 : vector<8x128xf32>
    %92 = math.exp %91 : vector<8x128xf32>
    %cst_29 = arith.constant 1.000000e+00 : f32
    %93 = vector.broadcast %cst_29 : f32 to vector<8x128xf32>
    %94 = arith.addf %93, %92 : vector<8x128xf32>
    %95 = arith.divf %93, %94 : vector<8x128xf32>
    %96 = vector.extract_strided_slice %84 {offsets = [0, 128], sizes = [8, 128], strides = [1, 1]} : vector<8x384xf32> to vector<8x128xf32>
    %97 = vector.extract_strided_slice %87 {offsets = [0, 128], sizes = [8, 128], strides = [1, 1]} : vector<8x384xf32> to vector<8x128xf32>
    %98 = arith.addf %96, %97 : vector<8x128xf32>
    %99 = arith.negf %98 : vector<8x128xf32>
    %100 = math.exp %99 : vector<8x128xf32>
    %cst_30 = arith.constant 1.000000e+00 : f32
    %101 = vector.broadcast %cst_30 : f32 to vector<8x128xf32>
    %102 = arith.addf %101, %100 : vector<8x128xf32>
    %103 = arith.divf %101, %102 : vector<8x128xf32>
    %104 = vector.extract_strided_slice %84 {offsets = [0, 256], sizes = [8, 128], strides = [1, 1]} : vector<8x384xf32> to vector<8x128xf32>
    %105 = vector.extract_strided_slice %87 {offsets = [0, 256], sizes = [8, 128], strides = [1, 1]} : vector<8x384xf32> to vector<8x128xf32>
    %106 = arith.mulf %95, %105 : vector<8x128xf32>
    %107 = arith.addf %104, %106 : vector<8x128xf32>
    %108 = math.tanh %107 : vector<8x128xf32>
    %cst_31 = arith.constant 1.000000e+00 : f32
    %109 = vector.broadcast %cst_31 : f32 to vector<8x128xf32>
    %110 = arith.subf %109, %103 : vector<8x128xf32>
    %111 = arith.mulf %110, %108 : vector<8x128xf32>
    %112 = arith.mulf %103, %80 : vector<8x128xf32>
    %113 = arith.addf %111, %112 : vector<8x128xf32>
    %c3_i32 = arith.constant 3 : i32
    %c8_i32_32 = arith.constant 8 : i32
    %114 = arith.muli %c3_i32, %c8_i32_32 : i32
    %115 = tpu.assume_multiple %114, 8 : i32
    %116 = arith.index_cast %115 : i32 to index
    %c0_33 = arith.constant 0 : index
    %117 = vector.load %arg8[%116, %c0_33] : memref<128x384xf32, #tpu.memory_space<vmem>>, vector<8x384xf32>
    %118 = arith.truncf %113 : vector<8x128xf32> to vector<8x128xbf16>
    %cst_34 = arith.constant dense<0.000000e+00> : vector<8x384xf32>
    %119 = tpu.matmul %118, %10, %cst_34 {dimension_numbers = #tpu.dot_dimension_numbers<[1], [0], [0], [1], [0, 0, 1, 1], [], []>} : vector<8x128xbf16>, vector<128x384xbf16>, vector<8x384xf32> -> vector<8x384xf32>
    %120 = arith.addf %119, %13 : vector<8x384xf32>
    %121 = vector.extract_strided_slice %117 {offsets = [0, 0], sizes = [8, 128], strides = [1, 1]} : vector<8x384xf32> to vector<8x128xf32>
    %122 = vector.extract_strided_slice %120 {offsets = [0, 0], sizes = [8, 128], strides = [1, 1]} : vector<8x384xf32> to vector<8x128xf32>
    %123 = arith.addf %121, %122 : vector<8x128xf32>
    %124 = arith.negf %123 : vector<8x128xf32>
    %125 = math.exp %124 : vector<8x128xf32>
    %cst_35 = arith.constant 1.000000e+00 : f32
    %126 = vector.broadcast %cst_35 : f32 to vector<8x128xf32>
    %127 = arith.addf %126, %125 : vector<8x128xf32>
    %128 = arith.divf %126, %127 : vector<8x128xf32>
    %129 = vector.extract_strided_slice %117 {offsets = [0, 128], sizes = [8, 128], strides = [1, 1]} : vector<8x384xf32> to vector<8x128xf32>
    %130 = vector.extract_strided_slice %120 {offsets = [0, 128], sizes = [8, 128], strides = [1, 1]} : vector<8x384xf32> to vector<8x128xf32>
    %131 = arith.addf %129, %130 : vector<8x128xf32>
    %132 = arith.negf %131 : vector<8x128xf32>
    %133 = math.exp %132 : vector<8x128xf32>
    %cst_36 = arith.constant 1.000000e+00 : f32
    %134 = vector.broadcast %cst_36 : f32 to vector<8x128xf32>
    %135 = arith.addf %134, %133 : vector<8x128xf32>
    %136 = arith.divf %134, %135 : vector<8x128xf32>
    %137 = vector.extract_strided_slice %117 {offsets = [0, 256], sizes = [8, 128], strides = [1, 1]} : vector<8x384xf32> to vector<8x128xf32>
    %138 = vector.extract_strided_slice %120 {offsets = [0, 256], sizes = [8, 128], strides = [1, 1]} : vector<8x384xf32> to vector<8x128xf32>
    %139 = arith.mulf %128, %138 : vector<8x128xf32>
    %140 = arith.addf %137, %139 : vector<8x128xf32>
    %141 = math.tanh %140 : vector<8x128xf32>
    %cst_37 = arith.constant 1.000000e+00 : f32
    %142 = vector.broadcast %cst_37 : f32 to vector<8x128xf32>
    %143 = arith.subf %142, %136 : vector<8x128xf32>
    %144 = arith.mulf %143, %141 : vector<8x128xf32>
    %145 = arith.mulf %136, %113 : vector<8x128xf32>
    %146 = arith.addf %144, %145 : vector<8x128xf32>
    %c4_i32 = arith.constant 4 : i32
    %c8_i32_38 = arith.constant 8 : i32
    %147 = arith.muli %c4_i32, %c8_i32_38 : i32
    %148 = tpu.assume_multiple %147, 8 : i32
    %149 = arith.index_cast %148 : i32 to index
    %c0_39 = arith.constant 0 : index
    %150 = vector.load %arg8[%149, %c0_39] : memref<128x384xf32, #tpu.memory_space<vmem>>, vector<8x384xf32>
    %151 = arith.truncf %146 : vector<8x128xf32> to vector<8x128xbf16>
    %cst_40 = arith.constant dense<0.000000e+00> : vector<8x384xf32>
    %152 = tpu.matmul %151, %10, %cst_40 {dimension_numbers = #tpu.dot_dimension_numbers<[1], [0], [0], [1], [0, 0, 1, 1], [], []>} : vector<8x128xbf16>, vector<128x384xbf16>, vector<8x384xf32> -> vector<8x384xf32>
    %153 = arith.addf %152, %13 : vector<8x384xf32>
    %154 = vector.extract_strided_slice %150 {offsets = [0, 0], sizes = [8, 128], strides = [1, 1]} : vector<8x384xf32> to vector<8x128xf32>
    %155 = vector.extract_strided_slice %153 {offsets = [0, 0], sizes = [8, 128], strides = [1, 1]} : vector<8x384xf32> to vector<8x128xf32>
    %156 = arith.addf %154, %155 : vector<8x128xf32>
    %157 = arith.negf %156 : vector<8x128xf32>
    %158 = math.exp %157 : vector<8x128xf32>
    %cst_41 = arith.constant 1.000000e+00 : f32
    %159 = vector.broadcast %cst_41 : f32 to vector<8x128xf32>
    %160 = arith.addf %159, %158 : vector<8x128xf32>
    %161 = arith.divf %159, %160 : vector<8x128xf32>
    %162 = vector.extract_strided_slice %150 {offsets = [0, 128], sizes = [8, 128], strides = [1, 1]} : vector<8x384xf32> to vector<8x128xf32>
    %163 = vector.extract_strided_slice %153 {offsets = [0, 128], sizes = [8, 128], strides = [1, 1]} : vector<8x384xf32> to vector<8x128xf32>
    %164 = arith.addf %162, %163 : vector<8x128xf32>
    %165 = arith.negf %164 : vector<8x128xf32>
    %166 = math.exp %165 : vector<8x128xf32>
    %cst_42 = arith.constant 1.000000e+00 : f32
    %167 = vector.broadcast %cst_42 : f32 to vector<8x128xf32>
    %168 = arith.addf %167, %166 : vector<8x128xf32>
    %169 = arith.divf %167, %168 : vector<8x128xf32>
    %170 = vector.extract_strided_slice %150 {offsets = [0, 256], sizes = [8, 128], strides = [1, 1]} : vector<8x384xf32> to vector<8x128xf32>
    %171 = vector.extract_strided_slice %153 {offsets = [0, 256], sizes = [8, 128], strides = [1, 1]} : vector<8x384xf32> to vector<8x128xf32>
    %172 = arith.mulf %161, %171 : vector<8x128xf32>
    %173 = arith.addf %170, %172 : vector<8x128xf32>
    %174 = math.tanh %173 : vector<8x128xf32>
    %cst_43 = arith.constant 1.000000e+00 : f32
    %175 = vector.broadcast %cst_43 : f32 to vector<8x128xf32>
    %176 = arith.subf %175, %169 : vector<8x128xf32>
    %177 = arith.mulf %176, %174 : vector<8x128xf32>
    %178 = arith.mulf %169, %146 : vector<8x128xf32>
    %179 = arith.addf %177, %178 : vector<8x128xf32>
    %c5_i32 = arith.constant 5 : i32
    %c8_i32_44 = arith.constant 8 : i32
    %180 = arith.muli %c5_i32, %c8_i32_44 : i32
    %181 = tpu.assume_multiple %180, 8 : i32
    %182 = arith.index_cast %181 : i32 to index
    %c0_45 = arith.constant 0 : index
    %183 = vector.load %arg8[%182, %c0_45] : memref<128x384xf32, #tpu.memory_space<vmem>>, vector<8x384xf32>
    %184 = arith.truncf %179 : vector<8x128xf32> to vector<8x128xbf16>
    %cst_46 = arith.constant dense<0.000000e+00> : vector<8x384xf32>
    %185 = tpu.matmul %184, %10, %cst_46 {dimension_numbers = #tpu.dot_dimension_numbers<[1], [0], [0], [1], [0, 0, 1, 1], [], []>} : vector<8x128xbf16>, vector<128x384xbf16>, vector<8x384xf32> -> vector<8x384xf32>
    %186 = arith.addf %185, %13 : vector<8x384xf32>
    %187 = vector.extract_strided_slice %183 {offsets = [0, 0], sizes = [8, 128], strides = [1, 1]} : vector<8x384xf32> to vector<8x128xf32>
    %188 = vector.extract_strided_slice %186 {offsets = [0, 0], sizes = [8, 128], strides = [1, 1]} : vector<8x384xf32> to vector<8x128xf32>
    %189 = arith.addf %187, %188 : vector<8x128xf32>
    %190 = arith.negf %189 : vector<8x128xf32>
    %191 = math.exp %190 : vector<8x128xf32>
    %cst_47 = arith.constant 1.000000e+00 : f32
    %192 = vector.broadcast %cst_47 : f32 to vector<8x128xf32>
    %193 = arith.addf %192, %191 : vector<8x128xf32>
    %194 = arith.divf %192, %193 : vector<8x128xf32>
    %195 = vector.extract_strided_slice %183 {offsets = [0, 128], sizes = [8, 128], strides = [1, 1]} : vector<8x384xf32> to vector<8x128xf32>
    %196 = vector.extract_strided_slice %186 {offsets = [0, 128], sizes = [8, 128], strides = [1, 1]} : vector<8x384xf32> to vector<8x128xf32>
    %197 = arith.addf %195, %196 : vector<8x128xf32>
    %198 = arith.negf %197 : vector<8x128xf32>
    %199 = math.exp %198 : vector<8x128xf32>
    %cst_48 = arith.constant 1.000000e+00 : f32
    %200 = vector.broadcast %cst_48 : f32 to vector<8x128xf32>
    %201 = arith.addf %200, %199 : vector<8x128xf32>
    %202 = arith.divf %200, %201 : vector<8x128xf32>
    %203 = vector.extract_strided_slice %183 {offsets = [0, 256], sizes = [8, 128], strides = [1, 1]} : vector<8x384xf32> to vector<8x128xf32>
    %204 = vector.extract_strided_slice %186 {offsets = [0, 256], sizes = [8, 128], strides = [1, 1]} : vector<8x384xf32> to vector<8x128xf32>
    %205 = arith.mulf %194, %204 : vector<8x128xf32>
    %206 = arith.addf %203, %205 : vector<8x128xf32>
    %207 = math.tanh %206 : vector<8x128xf32>
    %cst_49 = arith.constant 1.000000e+00 : f32
    %208 = vector.broadcast %cst_49 : f32 to vector<8x128xf32>
    %209 = arith.subf %208, %202 : vector<8x128xf32>
    %210 = arith.mulf %209, %207 : vector<8x128xf32>
    %211 = arith.mulf %202, %179 : vector<8x128xf32>
    %212 = arith.addf %210, %211 : vector<8x128xf32>
    %c6_i32 = arith.constant 6 : i32
    %c8_i32_50 = arith.constant 8 : i32
    %213 = arith.muli %c6_i32, %c8_i32_50 : i32
    %214 = tpu.assume_multiple %213, 8 : i32
    %215 = arith.index_cast %214 : i32 to index
    %c0_51 = arith.constant 0 : index
    %216 = vector.load %arg8[%215, %c0_51] : memref<128x384xf32, #tpu.memory_space<vmem>>, vector<8x384xf32>
    %217 = arith.truncf %212 : vector<8x128xf32> to vector<8x128xbf16>
    %cst_52 = arith.constant dense<0.000000e+00> : vector<8x384xf32>
    %218 = tpu.matmul %217, %10, %cst_52 {dimension_numbers = #tpu.dot_dimension_numbers<[1], [0], [0], [1], [0, 0, 1, 1], [], []>} : vector<8x128xbf16>, vector<128x384xbf16>, vector<8x384xf32> -> vector<8x384xf32>
    %219 = arith.addf %218, %13 : vector<8x384xf32>
    %220 = vector.extract_strided_slice %216 {offsets = [0, 0], sizes = [8, 128], strides = [1, 1]} : vector<8x384xf32> to vector<8x128xf32>
    %221 = vector.extract_strided_slice %219 {offsets = [0, 0], sizes = [8, 128], strides = [1, 1]} : vector<8x384xf32> to vector<8x128xf32>
    %222 = arith.addf %220, %221 : vector<8x128xf32>
    %223 = arith.negf %222 : vector<8x128xf32>
    %224 = math.exp %223 : vector<8x128xf32>
    %cst_53 = arith.constant 1.000000e+00 : f32
    %225 = vector.broadcast %cst_53 : f32 to vector<8x128xf32>
    %226 = arith.addf %225, %224 : vector<8x128xf32>
    %227 = arith.divf %225, %226 : vector<8x128xf32>
    %228 = vector.extract_strided_slice %216 {offsets = [0, 128], sizes = [8, 128], strides = [1, 1]} : vector<8x384xf32> to vector<8x128xf32>
    %229 = vector.extract_strided_slice %219 {offsets = [0, 128], sizes = [8, 128], strides = [1, 1]} : vector<8x384xf32> to vector<8x128xf32>
    %230 = arith.addf %228, %229 : vector<8x128xf32>
    %231 = arith.negf %230 : vector<8x128xf32>
    %232 = math.exp %231 : vector<8x128xf32>
    %cst_54 = arith.constant 1.000000e+00 : f32
    %233 = vector.broadcast %cst_54 : f32 to vector<8x128xf32>
    %234 = arith.addf %233, %232 : vector<8x128xf32>
    %235 = arith.divf %233, %234 : vector<8x128xf32>
    %236 = vector.extract_strided_slice %216 {offsets = [0, 256], sizes = [8, 128], strides = [1, 1]} : vector<8x384xf32> to vector<8x128xf32>
    %237 = vector.extract_strided_slice %219 {offsets = [0, 256], sizes = [8, 128], strides = [1, 1]} : vector<8x384xf32> to vector<8x128xf32>
    %238 = arith.mulf %227, %237 : vector<8x128xf32>
    %239 = arith.addf %236, %238 : vector<8x128xf32>
    %240 = math.tanh %239 : vector<8x128xf32>
    %cst_55 = arith.constant 1.000000e+00 : f32
    %241 = vector.broadcast %cst_55 : f32 to vector<8x128xf32>
    %242 = arith.subf %241, %235 : vector<8x128xf32>
    %243 = arith.mulf %242, %240 : vector<8x128xf32>
    %244 = arith.mulf %235, %212 : vector<8x128xf32>
    %245 = arith.addf %243, %244 : vector<8x128xf32>
    %c7_i32 = arith.constant 7 : i32
    %c8_i32_56 = arith.constant 8 : i32
    %246 = arith.muli %c7_i32, %c8_i32_56 : i32
    %247 = tpu.assume_multiple %246, 8 : i32
    %248 = arith.index_cast %247 : i32 to index
    %c0_57 = arith.constant 0 : index
    %249 = vector.load %arg8[%248, %c0_57] : memref<128x384xf32, #tpu.memory_space<vmem>>, vector<8x384xf32>
    %250 = arith.truncf %245 : vector<8x128xf32> to vector<8x128xbf16>
    %cst_58 = arith.constant dense<0.000000e+00> : vector<8x384xf32>
    %251 = tpu.matmul %250, %10, %cst_58 {dimension_numbers = #tpu.dot_dimension_numbers<[1], [0], [0], [1], [0, 0, 1, 1], [], []>} : vector<8x128xbf16>, vector<128x384xbf16>, vector<8x384xf32> -> vector<8x384xf32>
    %252 = arith.addf %251, %13 : vector<8x384xf32>
    %253 = vector.extract_strided_slice %249 {offsets = [0, 0], sizes = [8, 128], strides = [1, 1]} : vector<8x384xf32> to vector<8x128xf32>
    %254 = vector.extract_strided_slice %252 {offsets = [0, 0], sizes = [8, 128], strides = [1, 1]} : vector<8x384xf32> to vector<8x128xf32>
    %255 = arith.addf %253, %254 : vector<8x128xf32>
    %256 = arith.negf %255 : vector<8x128xf32>
    %257 = math.exp %256 : vector<8x128xf32>
    %cst_59 = arith.constant 1.000000e+00 : f32
    %258 = vector.broadcast %cst_59 : f32 to vector<8x128xf32>
    %259 = arith.addf %258, %257 : vector<8x128xf32>
    %260 = arith.divf %258, %259 : vector<8x128xf32>
    %261 = vector.extract_strided_slice %249 {offsets = [0, 128], sizes = [8, 128], strides = [1, 1]} : vector<8x384xf32> to vector<8x128xf32>
    %262 = vector.extract_strided_slice %252 {offsets = [0, 128], sizes = [8, 128], strides = [1, 1]} : vector<8x384xf32> to vector<8x128xf32>
    %263 = arith.addf %261, %262 : vector<8x128xf32>
    %264 = arith.negf %263 : vector<8x128xf32>
    %265 = math.exp %264 : vector<8x128xf32>
    %cst_60 = arith.constant 1.000000e+00 : f32
    %266 = vector.broadcast %cst_60 : f32 to vector<8x128xf32>
    %267 = arith.addf %266, %265 : vector<8x128xf32>
    %268 = arith.divf %266, %267 : vector<8x128xf32>
    %269 = vector.extract_strided_slice %249 {offsets = [0, 256], sizes = [8, 128], strides = [1, 1]} : vector<8x384xf32> to vector<8x128xf32>
    %270 = vector.extract_strided_slice %252 {offsets = [0, 256], sizes = [8, 128], strides = [1, 1]} : vector<8x384xf32> to vector<8x128xf32>
    %271 = arith.mulf %260, %270 : vector<8x128xf32>
    %272 = arith.addf %269, %271 : vector<8x128xf32>
    %273 = math.tanh %272 : vector<8x128xf32>
    %cst_61 = arith.constant 1.000000e+00 : f32
    %274 = vector.broadcast %cst_61 : f32 to vector<8x128xf32>
    %275 = arith.subf %274, %268 : vector<8x128xf32>
    %276 = arith.mulf %275, %273 : vector<8x128xf32>
    %277 = arith.mulf %268, %245 : vector<8x128xf32>
    %278 = arith.addf %276, %277 : vector<8x128xf32>
    %c8_i32_62 = arith.constant 8 : i32
    %c8_i32_63 = arith.constant 8 : i32
    %279 = arith.muli %c8_i32_62, %c8_i32_63 : i32
    %280 = tpu.assume_multiple %279, 8 : i32
    %281 = arith.index_cast %280 : i32 to index
    %c0_64 = arith.constant 0 : index
    %282 = vector.load %arg8[%281, %c0_64] : memref<128x384xf32, #tpu.memory_space<vmem>>, vector<8x384xf32>
    %283 = arith.truncf %278 : vector<8x128xf32> to vector<8x128xbf16>
    %cst_65 = arith.constant dense<0.000000e+00> : vector<8x384xf32>
    %284 = tpu.matmul %283, %10, %cst_65 {dimension_numbers = #tpu.dot_dimension_numbers<[1], [0], [0], [1], [0, 0, 1, 1], [], []>} : vector<8x128xbf16>, vector<128x384xbf16>, vector<8x384xf32> -> vector<8x384xf32>
    %285 = arith.addf %284, %13 : vector<8x384xf32>
    %286 = vector.extract_strided_slice %282 {offsets = [0, 0], sizes = [8, 128], strides = [1, 1]} : vector<8x384xf32> to vector<8x128xf32>
    %287 = vector.extract_strided_slice %285 {offsets = [0, 0], sizes = [8, 128], strides = [1, 1]} : vector<8x384xf32> to vector<8x128xf32>
    %288 = arith.addf %286, %287 : vector<8x128xf32>
    %289 = arith.negf %288 : vector<8x128xf32>
    %290 = math.exp %289 : vector<8x128xf32>
    %cst_66 = arith.constant 1.000000e+00 : f32
    %291 = vector.broadcast %cst_66 : f32 to vector<8x128xf32>
    %292 = arith.addf %291, %290 : vector<8x128xf32>
    %293 = arith.divf %291, %292 : vector<8x128xf32>
    %294 = vector.extract_strided_slice %282 {offsets = [0, 128], sizes = [8, 128], strides = [1, 1]} : vector<8x384xf32> to vector<8x128xf32>
    %295 = vector.extract_strided_slice %285 {offsets = [0, 128], sizes = [8, 128], strides = [1, 1]} : vector<8x384xf32> to vector<8x128xf32>
    %296 = arith.addf %294, %295 : vector<8x128xf32>
    %297 = arith.negf %296 : vector<8x128xf32>
    %298 = math.exp %297 : vector<8x128xf32>
    %cst_67 = arith.constant 1.000000e+00 : f32
    %299 = vector.broadcast %cst_67 : f32 to vector<8x128xf32>
    %300 = arith.addf %299, %298 : vector<8x128xf32>
    %301 = arith.divf %299, %300 : vector<8x128xf32>
    %302 = vector.extract_strided_slice %282 {offsets = [0, 256], sizes = [8, 128], strides = [1, 1]} : vector<8x384xf32> to vector<8x128xf32>
    %303 = vector.extract_strided_slice %285 {offsets = [0, 256], sizes = [8, 128], strides = [1, 1]} : vector<8x384xf32> to vector<8x128xf32>
    %304 = arith.mulf %293, %303 : vector<8x128xf32>
    %305 = arith.addf %302, %304 : vector<8x128xf32>
    %306 = math.tanh %305 : vector<8x128xf32>
    %cst_68 = arith.constant 1.000000e+00 : f32
    %307 = vector.broadcast %cst_68 : f32 to vector<8x128xf32>
    %308 = arith.subf %307, %301 : vector<8x128xf32>
    %309 = arith.mulf %308, %306 : vector<8x128xf32>
    %310 = arith.mulf %301, %278 : vector<8x128xf32>
    %311 = arith.addf %309, %310 : vector<8x128xf32>
    %c9_i32 = arith.constant 9 : i32
    %c8_i32_69 = arith.constant 8 : i32
    %312 = arith.muli %c9_i32, %c8_i32_69 : i32
    %313 = tpu.assume_multiple %312, 8 : i32
    %314 = arith.index_cast %313 : i32 to index
    %c0_70 = arith.constant 0 : index
    %315 = vector.load %arg8[%314, %c0_70] : memref<128x384xf32, #tpu.memory_space<vmem>>, vector<8x384xf32>
    %316 = arith.truncf %311 : vector<8x128xf32> to vector<8x128xbf16>
    %cst_71 = arith.constant dense<0.000000e+00> : vector<8x384xf32>
    %317 = tpu.matmul %316, %10, %cst_71 {dimension_numbers = #tpu.dot_dimension_numbers<[1], [0], [0], [1], [0, 0, 1, 1], [], []>} : vector<8x128xbf16>, vector<128x384xbf16>, vector<8x384xf32> -> vector<8x384xf32>
    %318 = arith.addf %317, %13 : vector<8x384xf32>
    %319 = vector.extract_strided_slice %315 {offsets = [0, 0], sizes = [8, 128], strides = [1, 1]} : vector<8x384xf32> to vector<8x128xf32>
    %320 = vector.extract_strided_slice %318 {offsets = [0, 0], sizes = [8, 128], strides = [1, 1]} : vector<8x384xf32> to vector<8x128xf32>
    %321 = arith.addf %319, %320 : vector<8x128xf32>
    %322 = arith.negf %321 : vector<8x128xf32>
    %323 = math.exp %322 : vector<8x128xf32>
    %cst_72 = arith.constant 1.000000e+00 : f32
    %324 = vector.broadcast %cst_72 : f32 to vector<8x128xf32>
    %325 = arith.addf %324, %323 : vector<8x128xf32>
    %326 = arith.divf %324, %325 : vector<8x128xf32>
    %327 = vector.extract_strided_slice %315 {offsets = [0, 128], sizes = [8, 128], strides = [1, 1]} : vector<8x384xf32> to vector<8x128xf32>
    %328 = vector.extract_strided_slice %318 {offsets = [0, 128], sizes = [8, 128], strides = [1, 1]} : vector<8x384xf32> to vector<8x128xf32>
    %329 = arith.addf %327, %328 : vector<8x128xf32>
    %330 = arith.negf %329 : vector<8x128xf32>
    %331 = math.exp %330 : vector<8x128xf32>
    %cst_73 = arith.constant 1.000000e+00 : f32
    %332 = vector.broadcast %cst_73 : f32 to vector<8x128xf32>
    %333 = arith.addf %332, %331 : vector<8x128xf32>
    %334 = arith.divf %332, %333 : vector<8x128xf32>
    %335 = vector.extract_strided_slice %315 {offsets = [0, 256], sizes = [8, 128], strides = [1, 1]} : vector<8x384xf32> to vector<8x128xf32>
    %336 = vector.extract_strided_slice %318 {offsets = [0, 256], sizes = [8, 128], strides = [1, 1]} : vector<8x384xf32> to vector<8x128xf32>
    %337 = arith.mulf %326, %336 : vector<8x128xf32>
    %338 = arith.addf %335, %337 : vector<8x128xf32>
    %339 = math.tanh %338 : vector<8x128xf32>
    %cst_74 = arith.constant 1.000000e+00 : f32
    %340 = vector.broadcast %cst_74 : f32 to vector<8x128xf32>
    %341 = arith.subf %340, %334 : vector<8x128xf32>
    %342 = arith.mulf %341, %339 : vector<8x128xf32>
    %343 = arith.mulf %334, %311 : vector<8x128xf32>
    %344 = arith.addf %342, %343 : vector<8x128xf32>
    %c10_i32 = arith.constant 10 : i32
    %c8_i32_75 = arith.constant 8 : i32
    %345 = arith.muli %c10_i32, %c8_i32_75 : i32
    %346 = tpu.assume_multiple %345, 8 : i32
    %347 = arith.index_cast %346 : i32 to index
    %c0_76 = arith.constant 0 : index
    %348 = vector.load %arg8[%347, %c0_76] : memref<128x384xf32, #tpu.memory_space<vmem>>, vector<8x384xf32>
    %349 = arith.truncf %344 : vector<8x128xf32> to vector<8x128xbf16>
    %cst_77 = arith.constant dense<0.000000e+00> : vector<8x384xf32>
    %350 = tpu.matmul %349, %10, %cst_77 {dimension_numbers = #tpu.dot_dimension_numbers<[1], [0], [0], [1], [0, 0, 1, 1], [], []>} : vector<8x128xbf16>, vector<128x384xbf16>, vector<8x384xf32> -> vector<8x384xf32>
    %351 = arith.addf %350, %13 : vector<8x384xf32>
    %352 = vector.extract_strided_slice %348 {offsets = [0, 0], sizes = [8, 128], strides = [1, 1]} : vector<8x384xf32> to vector<8x128xf32>
    %353 = vector.extract_strided_slice %351 {offsets = [0, 0], sizes = [8, 128], strides = [1, 1]} : vector<8x384xf32> to vector<8x128xf32>
    %354 = arith.addf %352, %353 : vector<8x128xf32>
    %355 = arith.negf %354 : vector<8x128xf32>
    %356 = math.exp %355 : vector<8x128xf32>
    %cst_78 = arith.constant 1.000000e+00 : f32
    %357 = vector.broadcast %cst_78 : f32 to vector<8x128xf32>
    %358 = arith.addf %357, %356 : vector<8x128xf32>
    %359 = arith.divf %357, %358 : vector<8x128xf32>
    %360 = vector.extract_strided_slice %348 {offsets = [0, 128], sizes = [8, 128], strides = [1, 1]} : vector<8x384xf32> to vector<8x128xf32>
    %361 = vector.extract_strided_slice %351 {offsets = [0, 128], sizes = [8, 128], strides = [1, 1]} : vector<8x384xf32> to vector<8x128xf32>
    %362 = arith.addf %360, %361 : vector<8x128xf32>
    %363 = arith.negf %362 : vector<8x128xf32>
    %364 = math.exp %363 : vector<8x128xf32>
    %cst_79 = arith.constant 1.000000e+00 : f32
    %365 = vector.broadcast %cst_79 : f32 to vector<8x128xf32>
    %366 = arith.addf %365, %364 : vector<8x128xf32>
    %367 = arith.divf %365, %366 : vector<8x128xf32>
    %368 = vector.extract_strided_slice %348 {offsets = [0, 256], sizes = [8, 128], strides = [1, 1]} : vector<8x384xf32> to vector<8x128xf32>
    %369 = vector.extract_strided_slice %351 {offsets = [0, 256], sizes = [8, 128], strides = [1, 1]} : vector<8x384xf32> to vector<8x128xf32>
    %370 = arith.mulf %359, %369 : vector<8x128xf32>
    %371 = arith.addf %368, %370 : vector<8x128xf32>
    %372 = math.tanh %371 : vector<8x128xf32>
    %cst_80 = arith.constant 1.000000e+00 : f32
    %373 = vector.broadcast %cst_80 : f32 to vector<8x128xf32>
    %374 = arith.subf %373, %367 : vector<8x128xf32>
    %375 = arith.mulf %374, %372 : vector<8x128xf32>
    %376 = arith.mulf %367, %344 : vector<8x128xf32>
    %377 = arith.addf %375, %376 : vector<8x128xf32>
    %c11_i32 = arith.constant 11 : i32
    %c8_i32_81 = arith.constant 8 : i32
    %378 = arith.muli %c11_i32, %c8_i32_81 : i32
    %379 = tpu.assume_multiple %378, 8 : i32
    %380 = arith.index_cast %379 : i32 to index
    %c0_82 = arith.constant 0 : index
    %381 = vector.load %arg8[%380, %c0_82] : memref<128x384xf32, #tpu.memory_space<vmem>>, vector<8x384xf32>
    %382 = arith.truncf %377 : vector<8x128xf32> to vector<8x128xbf16>
    %cst_83 = arith.constant dense<0.000000e+00> : vector<8x384xf32>
    %383 = tpu.matmul %382, %10, %cst_83 {dimension_numbers = #tpu.dot_dimension_numbers<[1], [0], [0], [1], [0, 0, 1, 1], [], []>} : vector<8x128xbf16>, vector<128x384xbf16>, vector<8x384xf32> -> vector<8x384xf32>
    %384 = arith.addf %383, %13 : vector<8x384xf32>
    %385 = vector.extract_strided_slice %381 {offsets = [0, 0], sizes = [8, 128], strides = [1, 1]} : vector<8x384xf32> to vector<8x128xf32>
    %386 = vector.extract_strided_slice %384 {offsets = [0, 0], sizes = [8, 128], strides = [1, 1]} : vector<8x384xf32> to vector<8x128xf32>
    %387 = arith.addf %385, %386 : vector<8x128xf32>
    %388 = arith.negf %387 : vector<8x128xf32>
    %389 = math.exp %388 : vector<8x128xf32>
    %cst_84 = arith.constant 1.000000e+00 : f32
    %390 = vector.broadcast %cst_84 : f32 to vector<8x128xf32>
    %391 = arith.addf %390, %389 : vector<8x128xf32>
    %392 = arith.divf %390, %391 : vector<8x128xf32>
    %393 = vector.extract_strided_slice %381 {offsets = [0, 128], sizes = [8, 128], strides = [1, 1]} : vector<8x384xf32> to vector<8x128xf32>
    %394 = vector.extract_strided_slice %384 {offsets = [0, 128], sizes = [8, 128], strides = [1, 1]} : vector<8x384xf32> to vector<8x128xf32>
    %395 = arith.addf %393, %394 : vector<8x128xf32>
    %396 = arith.negf %395 : vector<8x128xf32>
    %397 = math.exp %396 : vector<8x128xf32>
    %cst_85 = arith.constant 1.000000e+00 : f32
    %398 = vector.broadcast %cst_85 : f32 to vector<8x128xf32>
    %399 = arith.addf %398, %397 : vector<8x128xf32>
    %400 = arith.divf %398, %399 : vector<8x128xf32>
    %401 = vector.extract_strided_slice %381 {offsets = [0, 256], sizes = [8, 128], strides = [1, 1]} : vector<8x384xf32> to vector<8x128xf32>
    %402 = vector.extract_strided_slice %384 {offsets = [0, 256], sizes = [8, 128], strides = [1, 1]} : vector<8x384xf32> to vector<8x128xf32>
    %403 = arith.mulf %392, %402 : vector<8x128xf32>
    %404 = arith.addf %401, %403 : vector<8x128xf32>
    %405 = math.tanh %404 : vector<8x128xf32>
    %cst_86 = arith.constant 1.000000e+00 : f32
    %406 = vector.broadcast %cst_86 : f32 to vector<8x128xf32>
    %407 = arith.subf %406, %400 : vector<8x128xf32>
    %408 = arith.mulf %407, %405 : vector<8x128xf32>
    %409 = arith.mulf %400, %377 : vector<8x128xf32>
    %410 = arith.addf %408, %409 : vector<8x128xf32>
    %c12_i32 = arith.constant 12 : i32
    %c8_i32_87 = arith.constant 8 : i32
    %411 = arith.muli %c12_i32, %c8_i32_87 : i32
    %412 = tpu.assume_multiple %411, 8 : i32
    %413 = arith.index_cast %412 : i32 to index
    %c0_88 = arith.constant 0 : index
    %414 = vector.load %arg8[%413, %c0_88] : memref<128x384xf32, #tpu.memory_space<vmem>>, vector<8x384xf32>
    %415 = arith.truncf %410 : vector<8x128xf32> to vector<8x128xbf16>
    %cst_89 = arith.constant dense<0.000000e+00> : vector<8x384xf32>
    %416 = tpu.matmul %415, %10, %cst_89 {dimension_numbers = #tpu.dot_dimension_numbers<[1], [0], [0], [1], [0, 0, 1, 1], [], []>} : vector<8x128xbf16>, vector<128x384xbf16>, vector<8x384xf32> -> vector<8x384xf32>
    %417 = arith.addf %416, %13 : vector<8x384xf32>
    %418 = vector.extract_strided_slice %414 {offsets = [0, 0], sizes = [8, 128], strides = [1, 1]} : vector<8x384xf32> to vector<8x128xf32>
    %419 = vector.extract_strided_slice %417 {offsets = [0, 0], sizes = [8, 128], strides = [1, 1]} : vector<8x384xf32> to vector<8x128xf32>
    %420 = arith.addf %418, %419 : vector<8x128xf32>
    %421 = arith.negf %420 : vector<8x128xf32>
    %422 = math.exp %421 : vector<8x128xf32>
    %cst_90 = arith.constant 1.000000e+00 : f32
    %423 = vector.broadcast %cst_90 : f32 to vector<8x128xf32>
    %424 = arith.addf %423, %422 : vector<8x128xf32>
    %425 = arith.divf %423, %424 : vector<8x128xf32>
    %426 = vector.extract_strided_slice %414 {offsets = [0, 128], sizes = [8, 128], strides = [1, 1]} : vector<8x384xf32> to vector<8x128xf32>
    %427 = vector.extract_strided_slice %417 {offsets = [0, 128], sizes = [8, 128], strides = [1, 1]} : vector<8x384xf32> to vector<8x128xf32>
    %428 = arith.addf %426, %427 : vector<8x128xf32>
    %429 = arith.negf %428 : vector<8x128xf32>
    %430 = math.exp %429 : vector<8x128xf32>
    %cst_91 = arith.constant 1.000000e+00 : f32
    %431 = vector.broadcast %cst_91 : f32 to vector<8x128xf32>
    %432 = arith.addf %431, %430 : vector<8x128xf32>
    %433 = arith.divf %431, %432 : vector<8x128xf32>
    %434 = vector.extract_strided_slice %414 {offsets = [0, 256], sizes = [8, 128], strides = [1, 1]} : vector<8x384xf32> to vector<8x128xf32>
    %435 = vector.extract_strided_slice %417 {offsets = [0, 256], sizes = [8, 128], strides = [1, 1]} : vector<8x384xf32> to vector<8x128xf32>
    %436 = arith.mulf %425, %435 : vector<8x128xf32>
    %437 = arith.addf %434, %436 : vector<8x128xf32>
    %438 = math.tanh %437 : vector<8x128xf32>
    %cst_92 = arith.constant 1.000000e+00 : f32
    %439 = vector.broadcast %cst_92 : f32 to vector<8x128xf32>
    %440 = arith.subf %439, %433 : vector<8x128xf32>
    %441 = arith.mulf %440, %438 : vector<8x128xf32>
    %442 = arith.mulf %433, %410 : vector<8x128xf32>
    %443 = arith.addf %441, %442 : vector<8x128xf32>
    %c13_i32 = arith.constant 13 : i32
    %c8_i32_93 = arith.constant 8 : i32
    %444 = arith.muli %c13_i32, %c8_i32_93 : i32
    %445 = tpu.assume_multiple %444, 8 : i32
    %446 = arith.index_cast %445 : i32 to index
    %c0_94 = arith.constant 0 : index
    %447 = vector.load %arg8[%446, %c0_94] : memref<128x384xf32, #tpu.memory_space<vmem>>, vector<8x384xf32>
    %448 = arith.truncf %443 : vector<8x128xf32> to vector<8x128xbf16>
    %cst_95 = arith.constant dense<0.000000e+00> : vector<8x384xf32>
    %449 = tpu.matmul %448, %10, %cst_95 {dimension_numbers = #tpu.dot_dimension_numbers<[1], [0], [0], [1], [0, 0, 1, 1], [], []>} : vector<8x128xbf16>, vector<128x384xbf16>, vector<8x384xf32> -> vector<8x384xf32>
    %450 = arith.addf %449, %13 : vector<8x384xf32>
    %451 = vector.extract_strided_slice %447 {offsets = [0, 0], sizes = [8, 128], strides = [1, 1]} : vector<8x384xf32> to vector<8x128xf32>
    %452 = vector.extract_strided_slice %450 {offsets = [0, 0], sizes = [8, 128], strides = [1, 1]} : vector<8x384xf32> to vector<8x128xf32>
    %453 = arith.addf %451, %452 : vector<8x128xf32>
    %454 = arith.negf %453 : vector<8x128xf32>
    %455 = math.exp %454 : vector<8x128xf32>
    %cst_96 = arith.constant 1.000000e+00 : f32
    %456 = vector.broadcast %cst_96 : f32 to vector<8x128xf32>
    %457 = arith.addf %456, %455 : vector<8x128xf32>
    %458 = arith.divf %456, %457 : vector<8x128xf32>
    %459 = vector.extract_strided_slice %447 {offsets = [0, 128], sizes = [8, 128], strides = [1, 1]} : vector<8x384xf32> to vector<8x128xf32>
    %460 = vector.extract_strided_slice %450 {offsets = [0, 128], sizes = [8, 128], strides = [1, 1]} : vector<8x384xf32> to vector<8x128xf32>
    %461 = arith.addf %459, %460 : vector<8x128xf32>
    %462 = arith.negf %461 : vector<8x128xf32>
    %463 = math.exp %462 : vector<8x128xf32>
    %cst_97 = arith.constant 1.000000e+00 : f32
    %464 = vector.broadcast %cst_97 : f32 to vector<8x128xf32>
    %465 = arith.addf %464, %463 : vector<8x128xf32>
    %466 = arith.divf %464, %465 : vector<8x128xf32>
    %467 = vector.extract_strided_slice %447 {offsets = [0, 256], sizes = [8, 128], strides = [1, 1]} : vector<8x384xf32> to vector<8x128xf32>
    %468 = vector.extract_strided_slice %450 {offsets = [0, 256], sizes = [8, 128], strides = [1, 1]} : vector<8x384xf32> to vector<8x128xf32>
    %469 = arith.mulf %458, %468 : vector<8x128xf32>
    %470 = arith.addf %467, %469 : vector<8x128xf32>
    %471 = math.tanh %470 : vector<8x128xf32>
    %cst_98 = arith.constant 1.000000e+00 : f32
    %472 = vector.broadcast %cst_98 : f32 to vector<8x128xf32>
    %473 = arith.subf %472, %466 : vector<8x128xf32>
    %474 = arith.mulf %473, %471 : vector<8x128xf32>
    %475 = arith.mulf %466, %443 : vector<8x128xf32>
    %476 = arith.addf %474, %475 : vector<8x128xf32>
    %c14_i32 = arith.constant 14 : i32
    %c8_i32_99 = arith.constant 8 : i32
    %477 = arith.muli %c14_i32, %c8_i32_99 : i32
    %478 = tpu.assume_multiple %477, 8 : i32
    %479 = arith.index_cast %478 : i32 to index
    %c0_100 = arith.constant 0 : index
    %480 = vector.load %arg8[%479, %c0_100] : memref<128x384xf32, #tpu.memory_space<vmem>>, vector<8x384xf32>
    %481 = arith.truncf %476 : vector<8x128xf32> to vector<8x128xbf16>
    %cst_101 = arith.constant dense<0.000000e+00> : vector<8x384xf32>
    %482 = tpu.matmul %481, %10, %cst_101 {dimension_numbers = #tpu.dot_dimension_numbers<[1], [0], [0], [1], [0, 0, 1, 1], [], []>} : vector<8x128xbf16>, vector<128x384xbf16>, vector<8x384xf32> -> vector<8x384xf32>
    %483 = arith.addf %482, %13 : vector<8x384xf32>
    %484 = vector.extract_strided_slice %480 {offsets = [0, 0], sizes = [8, 128], strides = [1, 1]} : vector<8x384xf32> to vector<8x128xf32>
    %485 = vector.extract_strided_slice %483 {offsets = [0, 0], sizes = [8, 128], strides = [1, 1]} : vector<8x384xf32> to vector<8x128xf32>
    %486 = arith.addf %484, %485 : vector<8x128xf32>
    %487 = arith.negf %486 : vector<8x128xf32>
    %488 = math.exp %487 : vector<8x128xf32>
    %cst_102 = arith.constant 1.000000e+00 : f32
    %489 = vector.broadcast %cst_102 : f32 to vector<8x128xf32>
    %490 = arith.addf %489, %488 : vector<8x128xf32>
    %491 = arith.divf %489, %490 : vector<8x128xf32>
    %492 = vector.extract_strided_slice %480 {offsets = [0, 128], sizes = [8, 128], strides = [1, 1]} : vector<8x384xf32> to vector<8x128xf32>
    %493 = vector.extract_strided_slice %483 {offsets = [0, 128], sizes = [8, 128], strides = [1, 1]} : vector<8x384xf32> to vector<8x128xf32>
    %494 = arith.addf %492, %493 : vector<8x128xf32>
    %495 = arith.negf %494 : vector<8x128xf32>
    %496 = math.exp %495 : vector<8x128xf32>
    %cst_103 = arith.constant 1.000000e+00 : f32
    %497 = vector.broadcast %cst_103 : f32 to vector<8x128xf32>
    %498 = arith.addf %497, %496 : vector<8x128xf32>
    %499 = arith.divf %497, %498 : vector<8x128xf32>
    %500 = vector.extract_strided_slice %480 {offsets = [0, 256], sizes = [8, 128], strides = [1, 1]} : vector<8x384xf32> to vector<8x128xf32>
    %501 = vector.extract_strided_slice %483 {offsets = [0, 256], sizes = [8, 128], strides = [1, 1]} : vector<8x384xf32> to vector<8x128xf32>
    %502 = arith.mulf %491, %501 : vector<8x128xf32>
    %503 = arith.addf %500, %502 : vector<8x128xf32>
    %504 = math.tanh %503 : vector<8x128xf32>
    %cst_104 = arith.constant 1.000000e+00 : f32
    %505 = vector.broadcast %cst_104 : f32 to vector<8x128xf32>
    %506 = arith.subf %505, %499 : vector<8x128xf32>
    %507 = arith.mulf %506, %504 : vector<8x128xf32>
    %508 = arith.mulf %499, %476 : vector<8x128xf32>
    %509 = arith.addf %507, %508 : vector<8x128xf32>
    %c15_i32 = arith.constant 15 : i32
    %c8_i32_105 = arith.constant 8 : i32
    %510 = arith.muli %c15_i32, %c8_i32_105 : i32
    %511 = tpu.assume_multiple %510, 8 : i32
    %512 = arith.index_cast %511 : i32 to index
    %c0_106 = arith.constant 0 : index
    %513 = vector.load %arg8[%512, %c0_106] : memref<128x384xf32, #tpu.memory_space<vmem>>, vector<8x384xf32>
    %514 = arith.truncf %509 : vector<8x128xf32> to vector<8x128xbf16>
    %cst_107 = arith.constant dense<0.000000e+00> : vector<8x384xf32>
    %515 = tpu.matmul %514, %10, %cst_107 {dimension_numbers = #tpu.dot_dimension_numbers<[1], [0], [0], [1], [0, 0, 1, 1], [], []>} : vector<8x128xbf16>, vector<128x384xbf16>, vector<8x384xf32> -> vector<8x384xf32>
    %516 = arith.addf %515, %13 : vector<8x384xf32>
    %517 = vector.extract_strided_slice %513 {offsets = [0, 0], sizes = [8, 128], strides = [1, 1]} : vector<8x384xf32> to vector<8x128xf32>
    %518 = vector.extract_strided_slice %516 {offsets = [0, 0], sizes = [8, 128], strides = [1, 1]} : vector<8x384xf32> to vector<8x128xf32>
    %519 = arith.addf %517, %518 : vector<8x128xf32>
    %520 = arith.negf %519 : vector<8x128xf32>
    %521 = math.exp %520 : vector<8x128xf32>
    %cst_108 = arith.constant 1.000000e+00 : f32
    %522 = vector.broadcast %cst_108 : f32 to vector<8x128xf32>
    %523 = arith.addf %522, %521 : vector<8x128xf32>
    %524 = arith.divf %522, %523 : vector<8x128xf32>
    %525 = vector.extract_strided_slice %513 {offsets = [0, 128], sizes = [8, 128], strides = [1, 1]} : vector<8x384xf32> to vector<8x128xf32>
    %526 = vector.extract_strided_slice %516 {offsets = [0, 128], sizes = [8, 128], strides = [1, 1]} : vector<8x384xf32> to vector<8x128xf32>
    %527 = arith.addf %525, %526 : vector<8x128xf32>
    %528 = arith.negf %527 : vector<8x128xf32>
    %529 = math.exp %528 : vector<8x128xf32>
    %cst_109 = arith.constant 1.000000e+00 : f32
    %530 = vector.broadcast %cst_109 : f32 to vector<8x128xf32>
    %531 = arith.addf %530, %529 : vector<8x128xf32>
    %532 = arith.divf %530, %531 : vector<8x128xf32>
    %533 = vector.extract_strided_slice %513 {offsets = [0, 256], sizes = [8, 128], strides = [1, 1]} : vector<8x384xf32> to vector<8x128xf32>
    %534 = vector.extract_strided_slice %516 {offsets = [0, 256], sizes = [8, 128], strides = [1, 1]} : vector<8x384xf32> to vector<8x128xf32>
    %535 = arith.mulf %524, %534 : vector<8x128xf32>
    %536 = arith.addf %533, %535 : vector<8x128xf32>
    %537 = math.tanh %536 : vector<8x128xf32>
    %cst_110 = arith.constant 1.000000e+00 : f32
    %538 = vector.broadcast %cst_110 : f32 to vector<8x128xf32>
    %539 = arith.subf %538, %532 : vector<8x128xf32>
    %540 = arith.mulf %539, %537 : vector<8x128xf32>
    %541 = arith.mulf %532, %509 : vector<8x128xf32>
    %542 = arith.addf %540, %541 : vector<8x128xf32>
    %c16_i32 = arith.constant 16 : i32
    %c0_111 = arith.constant 0 : index
    %c0_112 = arith.constant 0 : index
    %543 = vector.load %arg7[%c0_111, %c0_112] : memref<8x128xf32, #tpu.memory_space<vmem>>, vector<8x128xf32>
    tpu.vector_store %arg7[%c0_111, %c0_112], %542 {strides = array<i32>} : memref<8x128xf32, #tpu.memory_space<vmem>>, vector<8x128xf32>,
    %c0_i32_113 = arith.constant 0 : i32
    %544 = arith.cmpi eq, %arg0, %c0_i32_113 : i32
    %545 = arith.extui %544 : i1 to i32
    %c0_i32_114 = arith.constant 0 : i32
    %546 = arith.cmpi ne, %545, %c0_i32_114 : i32
    scf.if %546 {
      %c0_115 = arith.constant 0 : index
      %c0_116 = arith.constant 0 : index
      %547 = vector.load %arg7[%c0_115, %c0_116] : memref<8x128xf32, #tpu.memory_space<vmem>>, vector<8x128xf32>
      %c0_117 = arith.constant 0 : index
      %c0_118 = arith.constant 0 : index
      %548 = vector.load %arg6[%c0_117, %c0_118] : memref<8x128xf32, #tpu.memory_space<vmem>>, vector<8x128xf32>
      tpu.vector_store %arg6[%c0_117, %c0_118], %547 {strides = array<i32>} : memref<8x128xf32, #tpu.memory_space<vmem>>, vector<8x128xf32>,
    } else {
    }
    return
  }
  func.func @transform_0(%arg0: i32) -> (i32, i32) {
    %c0_i32 = arith.constant 0 : i32
    %c0_i32_0 = arith.constant 0 : i32
    return %arg0, %c0_i32 : i32, i32
  }
  func.func @transform_1(%arg0: i32) -> (i32, i32) {
    %c0_i32 = arith.constant 0 : i32
    %c0_i32_0 = arith.constant 0 : i32
    %c0_i32_1 = arith.constant 0 : i32
    return %c0_i32, %c0_i32_0 : i32, i32
  }
  func.func @transform_2(%arg0: i32) -> (i32, i32) {
    %c0_i32 = arith.constant 0 : i32
    %c0_i32_0 = arith.constant 0 : i32
    %c0_i32_1 = arith.constant 0 : i32
    return %c0_i32, %c0_i32_0 : i32, i32
  }
  func.func @transform_3(%arg0: i32) -> (i32, i32) {
    %c0_i32 = arith.constant 0 : i32
    %c0_i32_0 = arith.constant 0 : i32
    %c0_i32_1 = arith.constant 0 : i32
    return %c0_i32, %c0_i32_0 : i32, i32
  }
  func.func @transform_4(%arg0: i32) -> (i32, i32) {
    %c0_i32 = arith.constant 0 : i32
    %c0_i32_0 = arith.constant 0 : i32
    %c0_i32_1 = arith.constant 0 : i32
    return %c0_i32, %c0_i32_0 : i32, i32
  }
  func.func @transform_5(%arg0: i32) -> (i32, i32) {
    %c0_i32 = arith.constant 0 : i32
    %c0_i32_0 = arith.constant 0 : i32
    %c0_i32_1 = arith.constant 0 : i32
    return %c0_i32, %c0_i32_0 : i32, i32
  }
}

module attributes {stable_mosaic.version = 11 : i64} {
  func.func @gru_head_kernel(%arg0: i32, %arg1: memref<64x64xbf16, #tpu.memory_space<vmem>>, %arg2: memref<64x384xbf16, #tpu.memory_space<vmem>>, %arg3: memref<128x384xbf16, #tpu.memory_space<vmem>>, %arg4: memref<1x384xf32, #tpu.memory_space<vmem>>, %arg5: memref<1x384xf32, #tpu.memory_space<vmem>>, %arg6: memref<8x128xf32, #tpu.memory_space<vmem>>, %arg7: memref<256x64xbf16, #tpu.memory_space<vmem>>, %arg8: memref<1x64xf32, #tpu.memory_space<vmem>>, %arg9: memref<64x16xbf16, #tpu.memory_space<vmem>>, %arg10: memref<1x16xf32, #tpu.memory_space<vmem>>, %arg11: memref<16x1xbf16, #tpu.memory_space<vmem>>, %arg12: memref<1x1xf32, #tpu.memory_space<vmem>>, %arg13: memref<8x1xf32, #tpu.memory_space<vmem>>, %arg14: memref<8x128xf32, #tpu.memory_space<vmem>>, %arg15: memref<64x384xf32, #tpu.memory_space<vmem>>) attributes {dimension_semantics = [#tpu.dimension_semantics<arbitrary>], iteration_bounds = array<i64: 1>, scalar_prefetch = 0 : i64, scratch_operands = 2 : i64, tpu.core_type = #tpu.core_type<tc>, window_params = [{transform_indices = @transform_0, window_bounds = array<i64: 64, 64>}, {pipeline_mode = #tpu.pipeline_mode<synchronous>, transform_indices = @transform_1, window_bounds = array<i64: 64, 384>}, {pipeline_mode = #tpu.pipeline_mode<synchronous>, transform_indices = @transform_2, window_bounds = array<i64: 128, 384>}, {pipeline_mode = #tpu.pipeline_mode<synchronous>, transform_indices = @transform_3, window_bounds = array<i64: 1, 384>}, {pipeline_mode = #tpu.pipeline_mode<synchronous>, transform_indices = @transform_4, window_bounds = array<i64: 1, 384>}, {pipeline_mode = #tpu.pipeline_mode<synchronous>, transform_indices = @transform_5, window_bounds = array<i64: 8, 128>}, {pipeline_mode = #tpu.pipeline_mode<synchronous>, transform_indices = @transform_6, window_bounds = array<i64: 256, 64>}, {pipeline_mode = #tpu.pipeline_mode<synchronous>, transform_indices = @transform_7, window_bounds = array<i64: 1, 64>}, {pipeline_mode = #tpu.pipeline_mode<synchronous>, transform_indices = @transform_8, window_bounds = array<i64: 64, 16>}, {pipeline_mode = #tpu.pipeline_mode<synchronous>, transform_indices = @transform_9, window_bounds = array<i64: 1, 16>}, {pipeline_mode = #tpu.pipeline_mode<synchronous>, transform_indices = @transform_10, window_bounds = array<i64: 16, 1>}, {pipeline_mode = #tpu.pipeline_mode<synchronous>, transform_indices = @transform_11, window_bounds = array<i64: 1, 1>}, {pipeline_mode = #tpu.pipeline_mode<synchronous>, transform_indices = @transform_12, window_bounds = array<i64: 8, 1>}]} {
    %c0_i32 = arith.constant 0 : i32
    %0 = arith.cmpi eq, %arg0, %c0_i32 : i32
    %1 = arith.extui %0 : i1 to i32
    %c0_i32_0 = arith.constant 0 : i32
    %2 = arith.cmpi ne, %1, %c0_i32_0 : i32
    scf.if %2 {
      %cst_67 = arith.constant 0.000000e+00 : f32
      %283 = vector.broadcast %cst_67 : f32 to vector<8x128xf32>
      %c0_68 = arith.constant 0 : index
      %c0_69 = arith.constant 0 : index
      %284 = vector.load %arg14[%c0_68, %c0_69] : memref<8x128xf32, #tpu.memory_space<vmem>>, vector<8x128xf32>
      tpu.vector_store %arg14[%c0_68, %c0_69], %283 {strides = array<i32>} : memref<8x128xf32, #tpu.memory_space<vmem>>, vector<8x128xf32>,
    } else {
    }
    %c0 = arith.constant 0 : index
    %c0_1 = arith.constant 0 : index
    %3 = vector.load %arg1[%c0, %c0_1] : memref<64x64xbf16, #tpu.memory_space<vmem>>, vector<64x64xbf16>
    %c0_2 = arith.constant 0 : index
    %c0_3 = arith.constant 0 : index
    %4 = vector.load %arg2[%c0_2, %c0_3] : memref<64x384xbf16, #tpu.memory_space<vmem>>, vector<64x384xbf16>
    %cst = arith.constant dense<0.000000e+00> : vector<64x384xf32>
    %5 = tpu.matmul %3, %4, %cst {dimension_numbers = #tpu.dot_dimension_numbers<[1], [0], [0], [1], [0, 0, 1, 1], [], []>} : vector<64x64xbf16>, vector<64x384xbf16>, vector<64x384xf32> -> vector<64x384xf32>
    %c0_4 = arith.constant 0 : index
    %c0_5 = arith.constant 0 : index
    %6 = vector.load %arg4[%c0_4, %c0_5] : memref<1x384xf32, #tpu.memory_space<vmem>>, vector<1x384xf32>
    %7 = vector.broadcast %6 : vector<1x384xf32> to vector<64x384xf32>
    %8 = arith.addf %5, %7 : vector<64x384xf32>
    %c0_6 = arith.constant 0 : index
    %c0_7 = arith.constant 0 : index
    %9 = vector.load %arg15[%c0_6, %c0_7] : memref<64x384xf32, #tpu.memory_space<vmem>>, vector<64x384xf32>
    tpu.vector_store %arg15[%c0_6, %c0_7], %8 {strides = array<i32>} : memref<64x384xf32, #tpu.memory_space<vmem>>, vector<64x384xf32>,
    %c0_8 = arith.constant 0 : index
    %c0_9 = arith.constant 0 : index
    %10 = vector.load %arg3[%c0_8, %c0_9] : memref<128x384xbf16, #tpu.memory_space<vmem>>, vector<128x384xbf16>
    %c0_10 = arith.constant 0 : index
    %c0_11 = arith.constant 0 : index
    %11 = vector.load %arg5[%c0_10, %c0_11] : memref<1x384xf32, #tpu.memory_space<vmem>>, vector<1x384xf32>
    %12 = vector.shape_cast %11 : vector<1x384xf32> to vector<1x384xf32>
    %13 = vector.broadcast %12 : vector<1x384xf32> to vector<8x384xf32>
    %c0_12 = arith.constant 0 : index
    %c0_13 = arith.constant 0 : index
    %14 = vector.load %arg14[%c0_12, %c0_13] : memref<8x128xf32, #tpu.memory_space<vmem>>, vector<8x128xf32>
    %c0_i32_14 = arith.constant 0 : i32
    %c8_i32 = arith.constant 8 : i32
    %15 = arith.muli %c0_i32_14, %c8_i32 : i32
    %16 = tpu.assume_multiple %15, 8 : i32
    %17 = arith.index_cast %16 : i32 to index
    %c0_15 = arith.constant 0 : index
    %18 = vector.load %arg15[%17, %c0_15] : memref<64x384xf32, #tpu.memory_space<vmem>>, vector<8x384xf32>
    %19 = arith.truncf %14 : vector<8x128xf32> to vector<8x128xbf16>
    %cst_16 = arith.constant dense<0.000000e+00> : vector<8x384xf32>
    %20 = tpu.matmul %19, %10, %cst_16 {dimension_numbers = #tpu.dot_dimension_numbers<[1], [0], [0], [1], [0, 0, 1, 1], [], []>} : vector<8x128xbf16>, vector<128x384xbf16>, vector<8x384xf32> -> vector<8x384xf32>
    %21 = arith.addf %20, %13 : vector<8x384xf32>
    %22 = vector.extract_strided_slice %18 {offsets = [0, 0], sizes = [8, 128], strides = [1, 1]} : vector<8x384xf32> to vector<8x128xf32>
    %23 = vector.extract_strided_slice %21 {offsets = [0, 0], sizes = [8, 128], strides = [1, 1]} : vector<8x384xf32> to vector<8x128xf32>
    %24 = arith.addf %22, %23 : vector<8x128xf32>
    %25 = arith.negf %24 : vector<8x128xf32>
    %26 = math.exp %25 : vector<8x128xf32>
    %cst_17 = arith.constant 1.000000e+00 : f32
    %27 = vector.broadcast %cst_17 : f32 to vector<8x128xf32>
    %28 = arith.addf %27, %26 : vector<8x128xf32>
    %29 = arith.divf %27, %28 : vector<8x128xf32>
    %30 = vector.extract_strided_slice %18 {offsets = [0, 128], sizes = [8, 128], strides = [1, 1]} : vector<8x384xf32> to vector<8x128xf32>
    %31 = vector.extract_strided_slice %21 {offsets = [0, 128], sizes = [8, 128], strides = [1, 1]} : vector<8x384xf32> to vector<8x128xf32>
    %32 = arith.addf %30, %31 : vector<8x128xf32>
    %33 = arith.negf %32 : vector<8x128xf32>
    %34 = math.exp %33 : vector<8x128xf32>
    %cst_18 = arith.constant 1.000000e+00 : f32
    %35 = vector.broadcast %cst_18 : f32 to vector<8x128xf32>
    %36 = arith.addf %35, %34 : vector<8x128xf32>
    %37 = arith.divf %35, %36 : vector<8x128xf32>
    %38 = vector.extract_strided_slice %18 {offsets = [0, 256], sizes = [8, 128], strides = [1, 1]} : vector<8x384xf32> to vector<8x128xf32>
    %39 = vector.extract_strided_slice %21 {offsets = [0, 256], sizes = [8, 128], strides = [1, 1]} : vector<8x384xf32> to vector<8x128xf32>
    %40 = arith.mulf %29, %39 : vector<8x128xf32>
    %41 = arith.addf %38, %40 : vector<8x128xf32>
    %42 = math.tanh %41 : vector<8x128xf32>
    %cst_19 = arith.constant 1.000000e+00 : f32
    %43 = vector.broadcast %cst_19 : f32 to vector<8x128xf32>
    %44 = arith.subf %43, %37 : vector<8x128xf32>
    %45 = arith.mulf %44, %42 : vector<8x128xf32>
    %46 = arith.mulf %37, %14 : vector<8x128xf32>
    %47 = arith.addf %45, %46 : vector<8x128xf32>
    %c1_i32 = arith.constant 1 : i32
    %c8_i32_20 = arith.constant 8 : i32
    %48 = arith.muli %c1_i32, %c8_i32_20 : i32
    %49 = tpu.assume_multiple %48, 8 : i32
    %50 = arith.index_cast %49 : i32 to index
    %c0_21 = arith.constant 0 : index
    %51 = vector.load %arg15[%50, %c0_21] : memref<64x384xf32, #tpu.memory_space<vmem>>, vector<8x384xf32>
    %52 = arith.truncf %47 : vector<8x128xf32> to vector<8x128xbf16>
    %cst_22 = arith.constant dense<0.000000e+00> : vector<8x384xf32>
    %53 = tpu.matmul %52, %10, %cst_22 {dimension_numbers = #tpu.dot_dimension_numbers<[1], [0], [0], [1], [0, 0, 1, 1], [], []>} : vector<8x128xbf16>, vector<128x384xbf16>, vector<8x384xf32> -> vector<8x384xf32>
    %54 = arith.addf %53, %13 : vector<8x384xf32>
    %55 = vector.extract_strided_slice %51 {offsets = [0, 0], sizes = [8, 128], strides = [1, 1]} : vector<8x384xf32> to vector<8x128xf32>
    %56 = vector.extract_strided_slice %54 {offsets = [0, 0], sizes = [8, 128], strides = [1, 1]} : vector<8x384xf32> to vector<8x128xf32>
    %57 = arith.addf %55, %56 : vector<8x128xf32>
    %58 = arith.negf %57 : vector<8x128xf32>
    %59 = math.exp %58 : vector<8x128xf32>
    %cst_23 = arith.constant 1.000000e+00 : f32
    %60 = vector.broadcast %cst_23 : f32 to vector<8x128xf32>
    %61 = arith.addf %60, %59 : vector<8x128xf32>
    %62 = arith.divf %60, %61 : vector<8x128xf32>
    %63 = vector.extract_strided_slice %51 {offsets = [0, 128], sizes = [8, 128], strides = [1, 1]} : vector<8x384xf32> to vector<8x128xf32>
    %64 = vector.extract_strided_slice %54 {offsets = [0, 128], sizes = [8, 128], strides = [1, 1]} : vector<8x384xf32> to vector<8x128xf32>
    %65 = arith.addf %63, %64 : vector<8x128xf32>
    %66 = arith.negf %65 : vector<8x128xf32>
    %67 = math.exp %66 : vector<8x128xf32>
    %cst_24 = arith.constant 1.000000e+00 : f32
    %68 = vector.broadcast %cst_24 : f32 to vector<8x128xf32>
    %69 = arith.addf %68, %67 : vector<8x128xf32>
    %70 = arith.divf %68, %69 : vector<8x128xf32>
    %71 = vector.extract_strided_slice %51 {offsets = [0, 256], sizes = [8, 128], strides = [1, 1]} : vector<8x384xf32> to vector<8x128xf32>
    %72 = vector.extract_strided_slice %54 {offsets = [0, 256], sizes = [8, 128], strides = [1, 1]} : vector<8x384xf32> to vector<8x128xf32>
    %73 = arith.mulf %62, %72 : vector<8x128xf32>
    %74 = arith.addf %71, %73 : vector<8x128xf32>
    %75 = math.tanh %74 : vector<8x128xf32>
    %cst_25 = arith.constant 1.000000e+00 : f32
    %76 = vector.broadcast %cst_25 : f32 to vector<8x128xf32>
    %77 = arith.subf %76, %70 : vector<8x128xf32>
    %78 = arith.mulf %77, %75 : vector<8x128xf32>
    %79 = arith.mulf %70, %47 : vector<8x128xf32>
    %80 = arith.addf %78, %79 : vector<8x128xf32>
    %c2_i32 = arith.constant 2 : i32
    %c8_i32_26 = arith.constant 8 : i32
    %81 = arith.muli %c2_i32, %c8_i32_26 : i32
    %82 = tpu.assume_multiple %81, 8 : i32
    %83 = arith.index_cast %82 : i32 to index
    %c0_27 = arith.constant 0 : index
    %84 = vector.load %arg15[%83, %c0_27] : memref<64x384xf32, #tpu.memory_space<vmem>>, vector<8x384xf32>
    %85 = arith.truncf %80 : vector<8x128xf32> to vector<8x128xbf16>
    %cst_28 = arith.constant dense<0.000000e+00> : vector<8x384xf32>
    %86 = tpu.matmul %85, %10, %cst_28 {dimension_numbers = #tpu.dot_dimension_numbers<[1], [0], [0], [1], [0, 0, 1, 1], [], []>} : vector<8x128xbf16>, vector<128x384xbf16>, vector<8x384xf32> -> vector<8x384xf32>
    %87 = arith.addf %86, %13 : vector<8x384xf32>
    %88 = vector.extract_strided_slice %84 {offsets = [0, 0], sizes = [8, 128], strides = [1, 1]} : vector<8x384xf32> to vector<8x128xf32>
    %89 = vector.extract_strided_slice %87 {offsets = [0, 0], sizes = [8, 128], strides = [1, 1]} : vector<8x384xf32> to vector<8x128xf32>
    %90 = arith.addf %88, %89 : vector<8x128xf32>
    %91 = arith.negf %90 : vector<8x128xf32>
    %92 = math.exp %91 : vector<8x128xf32>
    %cst_29 = arith.constant 1.000000e+00 : f32
    %93 = vector.broadcast %cst_29 : f32 to vector<8x128xf32>
    %94 = arith.addf %93, %92 : vector<8x128xf32>
    %95 = arith.divf %93, %94 : vector<8x128xf32>
    %96 = vector.extract_strided_slice %84 {offsets = [0, 128], sizes = [8, 128], strides = [1, 1]} : vector<8x384xf32> to vector<8x128xf32>
    %97 = vector.extract_strided_slice %87 {offsets = [0, 128], sizes = [8, 128], strides = [1, 1]} : vector<8x384xf32> to vector<8x128xf32>
    %98 = arith.addf %96, %97 : vector<8x128xf32>
    %99 = arith.negf %98 : vector<8x128xf32>
    %100 = math.exp %99 : vector<8x128xf32>
    %cst_30 = arith.constant 1.000000e+00 : f32
    %101 = vector.broadcast %cst_30 : f32 to vector<8x128xf32>
    %102 = arith.addf %101, %100 : vector<8x128xf32>
    %103 = arith.divf %101, %102 : vector<8x128xf32>
    %104 = vector.extract_strided_slice %84 {offsets = [0, 256], sizes = [8, 128], strides = [1, 1]} : vector<8x384xf32> to vector<8x128xf32>
    %105 = vector.extract_strided_slice %87 {offsets = [0, 256], sizes = [8, 128], strides = [1, 1]} : vector<8x384xf32> to vector<8x128xf32>
    %106 = arith.mulf %95, %105 : vector<8x128xf32>
    %107 = arith.addf %104, %106 : vector<8x128xf32>
    %108 = math.tanh %107 : vector<8x128xf32>
    %cst_31 = arith.constant 1.000000e+00 : f32
    %109 = vector.broadcast %cst_31 : f32 to vector<8x128xf32>
    %110 = arith.subf %109, %103 : vector<8x128xf32>
    %111 = arith.mulf %110, %108 : vector<8x128xf32>
    %112 = arith.mulf %103, %80 : vector<8x128xf32>
    %113 = arith.addf %111, %112 : vector<8x128xf32>
    %c3_i32 = arith.constant 3 : i32
    %c8_i32_32 = arith.constant 8 : i32
    %114 = arith.muli %c3_i32, %c8_i32_32 : i32
    %115 = tpu.assume_multiple %114, 8 : i32
    %116 = arith.index_cast %115 : i32 to index
    %c0_33 = arith.constant 0 : index
    %117 = vector.load %arg15[%116, %c0_33] : memref<64x384xf32, #tpu.memory_space<vmem>>, vector<8x384xf32>
    %118 = arith.truncf %113 : vector<8x128xf32> to vector<8x128xbf16>
    %cst_34 = arith.constant dense<0.000000e+00> : vector<8x384xf32>
    %119 = tpu.matmul %118, %10, %cst_34 {dimension_numbers = #tpu.dot_dimension_numbers<[1], [0], [0], [1], [0, 0, 1, 1], [], []>} : vector<8x128xbf16>, vector<128x384xbf16>, vector<8x384xf32> -> vector<8x384xf32>
    %120 = arith.addf %119, %13 : vector<8x384xf32>
    %121 = vector.extract_strided_slice %117 {offsets = [0, 0], sizes = [8, 128], strides = [1, 1]} : vector<8x384xf32> to vector<8x128xf32>
    %122 = vector.extract_strided_slice %120 {offsets = [0, 0], sizes = [8, 128], strides = [1, 1]} : vector<8x384xf32> to vector<8x128xf32>
    %123 = arith.addf %121, %122 : vector<8x128xf32>
    %124 = arith.negf %123 : vector<8x128xf32>
    %125 = math.exp %124 : vector<8x128xf32>
    %cst_35 = arith.constant 1.000000e+00 : f32
    %126 = vector.broadcast %cst_35 : f32 to vector<8x128xf32>
    %127 = arith.addf %126, %125 : vector<8x128xf32>
    %128 = arith.divf %126, %127 : vector<8x128xf32>
    %129 = vector.extract_strided_slice %117 {offsets = [0, 128], sizes = [8, 128], strides = [1, 1]} : vector<8x384xf32> to vector<8x128xf32>
    %130 = vector.extract_strided_slice %120 {offsets = [0, 128], sizes = [8, 128], strides = [1, 1]} : vector<8x384xf32> to vector<8x128xf32>
    %131 = arith.addf %129, %130 : vector<8x128xf32>
    %132 = arith.negf %131 : vector<8x128xf32>
    %133 = math.exp %132 : vector<8x128xf32>
    %cst_36 = arith.constant 1.000000e+00 : f32
    %134 = vector.broadcast %cst_36 : f32 to vector<8x128xf32>
    %135 = arith.addf %134, %133 : vector<8x128xf32>
    %136 = arith.divf %134, %135 : vector<8x128xf32>
    %137 = vector.extract_strided_slice %117 {offsets = [0, 256], sizes = [8, 128], strides = [1, 1]} : vector<8x384xf32> to vector<8x128xf32>
    %138 = vector.extract_strided_slice %120 {offsets = [0, 256], sizes = [8, 128], strides = [1, 1]} : vector<8x384xf32> to vector<8x128xf32>
    %139 = arith.mulf %128, %138 : vector<8x128xf32>
    %140 = arith.addf %137, %139 : vector<8x128xf32>
    %141 = math.tanh %140 : vector<8x128xf32>
    %cst_37 = arith.constant 1.000000e+00 : f32
    %142 = vector.broadcast %cst_37 : f32 to vector<8x128xf32>
    %143 = arith.subf %142, %136 : vector<8x128xf32>
    %144 = arith.mulf %143, %141 : vector<8x128xf32>
    %145 = arith.mulf %136, %113 : vector<8x128xf32>
    %146 = arith.addf %144, %145 : vector<8x128xf32>
    %c4_i32 = arith.constant 4 : i32
    %c8_i32_38 = arith.constant 8 : i32
    %147 = arith.muli %c4_i32, %c8_i32_38 : i32
    %148 = tpu.assume_multiple %147, 8 : i32
    %149 = arith.index_cast %148 : i32 to index
    %c0_39 = arith.constant 0 : index
    %150 = vector.load %arg15[%149, %c0_39] : memref<64x384xf32, #tpu.memory_space<vmem>>, vector<8x384xf32>
    %151 = arith.truncf %146 : vector<8x128xf32> to vector<8x128xbf16>
    %cst_40 = arith.constant dense<0.000000e+00> : vector<8x384xf32>
    %152 = tpu.matmul %151, %10, %cst_40 {dimension_numbers = #tpu.dot_dimension_numbers<[1], [0], [0], [1], [0, 0, 1, 1], [], []>} : vector<8x128xbf16>, vector<128x384xbf16>, vector<8x384xf32> -> vector<8x384xf32>
    %153 = arith.addf %152, %13 : vector<8x384xf32>
    %154 = vector.extract_strided_slice %150 {offsets = [0, 0], sizes = [8, 128], strides = [1, 1]} : vector<8x384xf32> to vector<8x128xf32>
    %155 = vector.extract_strided_slice %153 {offsets = [0, 0], sizes = [8, 128], strides = [1, 1]} : vector<8x384xf32> to vector<8x128xf32>
    %156 = arith.addf %154, %155 : vector<8x128xf32>
    %157 = arith.negf %156 : vector<8x128xf32>
    %158 = math.exp %157 : vector<8x128xf32>
    %cst_41 = arith.constant 1.000000e+00 : f32
    %159 = vector.broadcast %cst_41 : f32 to vector<8x128xf32>
    %160 = arith.addf %159, %158 : vector<8x128xf32>
    %161 = arith.divf %159, %160 : vector<8x128xf32>
    %162 = vector.extract_strided_slice %150 {offsets = [0, 128], sizes = [8, 128], strides = [1, 1]} : vector<8x384xf32> to vector<8x128xf32>
    %163 = vector.extract_strided_slice %153 {offsets = [0, 128], sizes = [8, 128], strides = [1, 1]} : vector<8x384xf32> to vector<8x128xf32>
    %164 = arith.addf %162, %163 : vector<8x128xf32>
    %165 = arith.negf %164 : vector<8x128xf32>
    %166 = math.exp %165 : vector<8x128xf32>
    %cst_42 = arith.constant 1.000000e+00 : f32
    %167 = vector.broadcast %cst_42 : f32 to vector<8x128xf32>
    %168 = arith.addf %167, %166 : vector<8x128xf32>
    %169 = arith.divf %167, %168 : vector<8x128xf32>
    %170 = vector.extract_strided_slice %150 {offsets = [0, 256], sizes = [8, 128], strides = [1, 1]} : vector<8x384xf32> to vector<8x128xf32>
    %171 = vector.extract_strided_slice %153 {offsets = [0, 256], sizes = [8, 128], strides = [1, 1]} : vector<8x384xf32> to vector<8x128xf32>
    %172 = arith.mulf %161, %171 : vector<8x128xf32>
    %173 = arith.addf %170, %172 : vector<8x128xf32>
    %174 = math.tanh %173 : vector<8x128xf32>
    %cst_43 = arith.constant 1.000000e+00 : f32
    %175 = vector.broadcast %cst_43 : f32 to vector<8x128xf32>
    %176 = arith.subf %175, %169 : vector<8x128xf32>
    %177 = arith.mulf %176, %174 : vector<8x128xf32>
    %178 = arith.mulf %169, %146 : vector<8x128xf32>
    %179 = arith.addf %177, %178 : vector<8x128xf32>
    %c5_i32 = arith.constant 5 : i32
    %c8_i32_44 = arith.constant 8 : i32
    %180 = arith.muli %c5_i32, %c8_i32_44 : i32
    %181 = tpu.assume_multiple %180, 8 : i32
    %182 = arith.index_cast %181 : i32 to index
    %c0_45 = arith.constant 0 : index
    %183 = vector.load %arg15[%182, %c0_45] : memref<64x384xf32, #tpu.memory_space<vmem>>, vector<8x384xf32>
    %184 = arith.truncf %179 : vector<8x128xf32> to vector<8x128xbf16>
    %cst_46 = arith.constant dense<0.000000e+00> : vector<8x384xf32>
    %185 = tpu.matmul %184, %10, %cst_46 {dimension_numbers = #tpu.dot_dimension_numbers<[1], [0], [0], [1], [0, 0, 1, 1], [], []>} : vector<8x128xbf16>, vector<128x384xbf16>, vector<8x384xf32> -> vector<8x384xf32>
    %186 = arith.addf %185, %13 : vector<8x384xf32>
    %187 = vector.extract_strided_slice %183 {offsets = [0, 0], sizes = [8, 128], strides = [1, 1]} : vector<8x384xf32> to vector<8x128xf32>
    %188 = vector.extract_strided_slice %186 {offsets = [0, 0], sizes = [8, 128], strides = [1, 1]} : vector<8x384xf32> to vector<8x128xf32>
    %189 = arith.addf %187, %188 : vector<8x128xf32>
    %190 = arith.negf %189 : vector<8x128xf32>
    %191 = math.exp %190 : vector<8x128xf32>
    %cst_47 = arith.constant 1.000000e+00 : f32
    %192 = vector.broadcast %cst_47 : f32 to vector<8x128xf32>
    %193 = arith.addf %192, %191 : vector<8x128xf32>
    %194 = arith.divf %192, %193 : vector<8x128xf32>
    %195 = vector.extract_strided_slice %183 {offsets = [0, 128], sizes = [8, 128], strides = [1, 1]} : vector<8x384xf32> to vector<8x128xf32>
    %196 = vector.extract_strided_slice %186 {offsets = [0, 128], sizes = [8, 128], strides = [1, 1]} : vector<8x384xf32> to vector<8x128xf32>
    %197 = arith.addf %195, %196 : vector<8x128xf32>
    %198 = arith.negf %197 : vector<8x128xf32>
    %199 = math.exp %198 : vector<8x128xf32>
    %cst_48 = arith.constant 1.000000e+00 : f32
    %200 = vector.broadcast %cst_48 : f32 to vector<8x128xf32>
    %201 = arith.addf %200, %199 : vector<8x128xf32>
    %202 = arith.divf %200, %201 : vector<8x128xf32>
    %203 = vector.extract_strided_slice %183 {offsets = [0, 256], sizes = [8, 128], strides = [1, 1]} : vector<8x384xf32> to vector<8x128xf32>
    %204 = vector.extract_strided_slice %186 {offsets = [0, 256], sizes = [8, 128], strides = [1, 1]} : vector<8x384xf32> to vector<8x128xf32>
    %205 = arith.mulf %194, %204 : vector<8x128xf32>
    %206 = arith.addf %203, %205 : vector<8x128xf32>
    %207 = math.tanh %206 : vector<8x128xf32>
    %cst_49 = arith.constant 1.000000e+00 : f32
    %208 = vector.broadcast %cst_49 : f32 to vector<8x128xf32>
    %209 = arith.subf %208, %202 : vector<8x128xf32>
    %210 = arith.mulf %209, %207 : vector<8x128xf32>
    %211 = arith.mulf %202, %179 : vector<8x128xf32>
    %212 = arith.addf %210, %211 : vector<8x128xf32>
    %c6_i32 = arith.constant 6 : i32
    %c8_i32_50 = arith.constant 8 : i32
    %213 = arith.muli %c6_i32, %c8_i32_50 : i32
    %214 = tpu.assume_multiple %213, 8 : i32
    %215 = arith.index_cast %214 : i32 to index
    %c0_51 = arith.constant 0 : index
    %216 = vector.load %arg15[%215, %c0_51] : memref<64x384xf32, #tpu.memory_space<vmem>>, vector<8x384xf32>
    %217 = arith.truncf %212 : vector<8x128xf32> to vector<8x128xbf16>
    %cst_52 = arith.constant dense<0.000000e+00> : vector<8x384xf32>
    %218 = tpu.matmul %217, %10, %cst_52 {dimension_numbers = #tpu.dot_dimension_numbers<[1], [0], [0], [1], [0, 0, 1, 1], [], []>} : vector<8x128xbf16>, vector<128x384xbf16>, vector<8x384xf32> -> vector<8x384xf32>
    %219 = arith.addf %218, %13 : vector<8x384xf32>
    %220 = vector.extract_strided_slice %216 {offsets = [0, 0], sizes = [8, 128], strides = [1, 1]} : vector<8x384xf32> to vector<8x128xf32>
    %221 = vector.extract_strided_slice %219 {offsets = [0, 0], sizes = [8, 128], strides = [1, 1]} : vector<8x384xf32> to vector<8x128xf32>
    %222 = arith.addf %220, %221 : vector<8x128xf32>
    %223 = arith.negf %222 : vector<8x128xf32>
    %224 = math.exp %223 : vector<8x128xf32>
    %cst_53 = arith.constant 1.000000e+00 : f32
    %225 = vector.broadcast %cst_53 : f32 to vector<8x128xf32>
    %226 = arith.addf %225, %224 : vector<8x128xf32>
    %227 = arith.divf %225, %226 : vector<8x128xf32>
    %228 = vector.extract_strided_slice %216 {offsets = [0, 128], sizes = [8, 128], strides = [1, 1]} : vector<8x384xf32> to vector<8x128xf32>
    %229 = vector.extract_strided_slice %219 {offsets = [0, 128], sizes = [8, 128], strides = [1, 1]} : vector<8x384xf32> to vector<8x128xf32>
    %230 = arith.addf %228, %229 : vector<8x128xf32>
    %231 = arith.negf %230 : vector<8x128xf32>
    %232 = math.exp %231 : vector<8x128xf32>
    %cst_54 = arith.constant 1.000000e+00 : f32
    %233 = vector.broadcast %cst_54 : f32 to vector<8x128xf32>
    %234 = arith.addf %233, %232 : vector<8x128xf32>
    %235 = arith.divf %233, %234 : vector<8x128xf32>
    %236 = vector.extract_strided_slice %216 {offsets = [0, 256], sizes = [8, 128], strides = [1, 1]} : vector<8x384xf32> to vector<8x128xf32>
    %237 = vector.extract_strided_slice %219 {offsets = [0, 256], sizes = [8, 128], strides = [1, 1]} : vector<8x384xf32> to vector<8x128xf32>
    %238 = arith.mulf %227, %237 : vector<8x128xf32>
    %239 = arith.addf %236, %238 : vector<8x128xf32>
    %240 = math.tanh %239 : vector<8x128xf32>
    %cst_55 = arith.constant 1.000000e+00 : f32
    %241 = vector.broadcast %cst_55 : f32 to vector<8x128xf32>
    %242 = arith.subf %241, %235 : vector<8x128xf32>
    %243 = arith.mulf %242, %240 : vector<8x128xf32>
    %244 = arith.mulf %235, %212 : vector<8x128xf32>
    %245 = arith.addf %243, %244 : vector<8x128xf32>
    %c7_i32 = arith.constant 7 : i32
    %c8_i32_56 = arith.constant 8 : i32
    %246 = arith.muli %c7_i32, %c8_i32_56 : i32
    %247 = tpu.assume_multiple %246, 8 : i32
    %248 = arith.index_cast %247 : i32 to index
    %c0_57 = arith.constant 0 : index
    %249 = vector.load %arg15[%248, %c0_57] : memref<64x384xf32, #tpu.memory_space<vmem>>, vector<8x384xf32>
    %250 = arith.truncf %245 : vector<8x128xf32> to vector<8x128xbf16>
    %cst_58 = arith.constant dense<0.000000e+00> : vector<8x384xf32>
    %251 = tpu.matmul %250, %10, %cst_58 {dimension_numbers = #tpu.dot_dimension_numbers<[1], [0], [0], [1], [0, 0, 1, 1], [], []>} : vector<8x128xbf16>, vector<128x384xbf16>, vector<8x384xf32> -> vector<8x384xf32>
    %252 = arith.addf %251, %13 : vector<8x384xf32>
    %253 = vector.extract_strided_slice %249 {offsets = [0, 0], sizes = [8, 128], strides = [1, 1]} : vector<8x384xf32> to vector<8x128xf32>
    %254 = vector.extract_strided_slice %252 {offsets = [0, 0], sizes = [8, 128], strides = [1, 1]} : vector<8x384xf32> to vector<8x128xf32>
    %255 = arith.addf %253, %254 : vector<8x128xf32>
    %256 = arith.negf %255 : vector<8x128xf32>
    %257 = math.exp %256 : vector<8x128xf32>
    %cst_59 = arith.constant 1.000000e+00 : f32
    %258 = vector.broadcast %cst_59 : f32 to vector<8x128xf32>
    %259 = arith.addf %258, %257 : vector<8x128xf32>
    %260 = arith.divf %258, %259 : vector<8x128xf32>
    %261 = vector.extract_strided_slice %249 {offsets = [0, 128], sizes = [8, 128], strides = [1, 1]} : vector<8x384xf32> to vector<8x128xf32>
    %262 = vector.extract_strided_slice %252 {offsets = [0, 128], sizes = [8, 128], strides = [1, 1]} : vector<8x384xf32> to vector<8x128xf32>
    %263 = arith.addf %261, %262 : vector<8x128xf32>
    %264 = arith.negf %263 : vector<8x128xf32>
    %265 = math.exp %264 : vector<8x128xf32>
    %cst_60 = arith.constant 1.000000e+00 : f32
    %266 = vector.broadcast %cst_60 : f32 to vector<8x128xf32>
    %267 = arith.addf %266, %265 : vector<8x128xf32>
    %268 = arith.divf %266, %267 : vector<8x128xf32>
    %269 = vector.extract_strided_slice %249 {offsets = [0, 256], sizes = [8, 128], strides = [1, 1]} : vector<8x384xf32> to vector<8x128xf32>
    %270 = vector.extract_strided_slice %252 {offsets = [0, 256], sizes = [8, 128], strides = [1, 1]} : vector<8x384xf32> to vector<8x128xf32>
    %271 = arith.mulf %260, %270 : vector<8x128xf32>
    %272 = arith.addf %269, %271 : vector<8x128xf32>
    %273 = math.tanh %272 : vector<8x128xf32>
    %cst_61 = arith.constant 1.000000e+00 : f32
    %274 = vector.broadcast %cst_61 : f32 to vector<8x128xf32>
    %275 = arith.subf %274, %268 : vector<8x128xf32>
    %276 = arith.mulf %275, %273 : vector<8x128xf32>
    %277 = arith.mulf %268, %245 : vector<8x128xf32>
    %278 = arith.addf %276, %277 : vector<8x128xf32>
    %c8_i32_62 = arith.constant 8 : i32
    %c0_63 = arith.constant 0 : index
    %c0_64 = arith.constant 0 : index
    %279 = vector.load %arg14[%c0_63, %c0_64] : memref<8x128xf32, #tpu.memory_space<vmem>>, vector<8x128xf32>
    tpu.vector_store %arg14[%c0_63, %c0_64], %278 {strides = array<i32>} : memref<8x128xf32, #tpu.memory_space<vmem>>, vector<8x128xf32>,
    %c0_i32_65 = arith.constant 0 : i32
    %280 = arith.cmpi eq, %arg0, %c0_i32_65 : i32
    %281 = arith.extui %280 : i1 to i32
    %c0_i32_66 = arith.constant 0 : i32
    %282 = arith.cmpi ne, %281, %c0_i32_66 : i32
    scf.if %282 {
      %c0_67 = arith.constant 0 : index
      %c0_68 = arith.constant 0 : index
      %283 = vector.load %arg6[%c0_67, %c0_68] : memref<8x128xf32, #tpu.memory_space<vmem>>, vector<8x128xf32>
      %c0_69 = arith.constant 0 : index
      %c0_70 = arith.constant 0 : index
      %284 = vector.load %arg14[%c0_69, %c0_70] : memref<8x128xf32, #tpu.memory_space<vmem>>, vector<8x128xf32>
      %285 = tpu.concatenate %283, %284 in 1 : vector<8x128xf32>, vector<8x128xf32> -> vector<8x256xf32>
      %286 = arith.truncf %285 : vector<8x256xf32> to vector<8x256xbf16>
      %c0_71 = arith.constant 0 : index
      %c0_72 = arith.constant 0 : index
      %287 = vector.load %arg7[%c0_71, %c0_72] : memref<256x64xbf16, #tpu.memory_space<vmem>>, vector<256x64xbf16>
      %cst_73 = arith.constant dense<0.000000e+00> : vector<8x64xf32>
      %288 = tpu.matmul %286, %287, %cst_73 {dimension_numbers = #tpu.dot_dimension_numbers<[1], [0], [0], [1], [0, 0, 1, 1], [], []>} : vector<8x256xbf16>, vector<256x64xbf16>, vector<8x64xf32> -> vector<8x64xf32>
      %c0_74 = arith.constant 0 : index
      %c0_75 = arith.constant 0 : index
      %289 = vector.load %arg8[%c0_74, %c0_75] : memref<1x64xf32, #tpu.memory_space<vmem>>, vector<1x64xf32>
      %290 = vector.broadcast %289 : vector<1x64xf32> to vector<8x64xf32>
      %291 = arith.addf %288, %290 : vector<8x64xf32>
      %cst_76 = arith.constant 0.000000e+00 : f32
      %292 = vector.broadcast %cst_76 : f32 to vector<8x64xf32>
      %293 = arith.cmpf oge, %291, %292 : vector<8x64xf32>
      %cst_77 = arith.constant 0.00999999977 : f32
      %294 = vector.broadcast %cst_77 : f32 to vector<8x64xf32>
      %295 = arith.mulf %294, %291 : vector<8x64xf32>
      %296 = arith.select %293, %291, %295 : vector<8x64xi1>, vector<8x64xf32>
      %297 = arith.truncf %296 : vector<8x64xf32> to vector<8x64xbf16>
      %c0_78 = arith.constant 0 : index
      %c0_79 = arith.constant 0 : index
      %298 = vector.load %arg9[%c0_78, %c0_79] : memref<64x16xbf16, #tpu.memory_space<vmem>>, vector<64x16xbf16>
      %cst_80 = arith.constant dense<0.000000e+00> : vector<8x16xf32>
      %299 = tpu.matmul %297, %298, %cst_80 {dimension_numbers = #tpu.dot_dimension_numbers<[1], [0], [0], [1], [0, 0, 1, 1], [], []>} : vector<8x64xbf16>, vector<64x16xbf16>, vector<8x16xf32> -> vector<8x16xf32>
      %c0_81 = arith.constant 0 : index
      %c0_82 = arith.constant 0 : index
      %300 = vector.load %arg10[%c0_81, %c0_82] : memref<1x16xf32, #tpu.memory_space<vmem>>, vector<1x16xf32>
      %301 = vector.broadcast %300 : vector<1x16xf32> to vector<8x16xf32>
      %302 = arith.addf %299, %301 : vector<8x16xf32>
      %cst_83 = arith.constant 0.000000e+00 : f32
      %303 = vector.broadcast %cst_83 : f32 to vector<8x16xf32>
      %304 = arith.cmpf oge, %302, %303 : vector<8x16xf32>
      %cst_84 = arith.constant 0.00999999977 : f32
      %305 = vector.broadcast %cst_84 : f32 to vector<8x16xf32>
      %306 = arith.mulf %305, %302 : vector<8x16xf32>
      %307 = arith.select %304, %302, %306 : vector<8x16xi1>, vector<8x16xf32>
      %308 = arith.truncf %307 : vector<8x16xf32> to vector<8x16xbf16>
      %c0_85 = arith.constant 0 : index
      %c0_86 = arith.constant 0 : index
      %309 = vector.load %arg11[%c0_85, %c0_86] : memref<16x1xbf16, #tpu.memory_space<vmem>>, vector<16x1xbf16>
      %cst_87 = arith.constant dense<0.000000e+00> : vector<8x1xf32>
      %310 = tpu.matmul %308, %309, %cst_87 {dimension_numbers = #tpu.dot_dimension_numbers<[1], [0], [0], [1], [0, 0, 1, 1], [], []>} : vector<8x16xbf16>, vector<16x1xbf16>, vector<8x1xf32> -> vector<8x1xf32>
      %c0_88 = arith.constant 0 : index
      %c0_89 = arith.constant 0 : index
      %311 = vector.load %arg12[%c0_88, %c0_89] : memref<1x1xf32, #tpu.memory_space<vmem>>, vector<1x1xf32>
      %312 = vector.broadcast %311 : vector<1x1xf32> to vector<8x1xf32>
      %313 = arith.addf %310, %312 : vector<8x1xf32>
      %c0_90 = arith.constant 0 : index
      %c0_91 = arith.constant 0 : index
      %314 = vector.load %arg13[%c0_90, %c0_91] : memref<8x1xf32, #tpu.memory_space<vmem>>, vector<8x1xf32>
      tpu.vector_store %arg13[%c0_90, %c0_91], %313 {strides = array<i32>} : memref<8x1xf32, #tpu.memory_space<vmem>>, vector<8x1xf32>,
    } else {
    }
    return
  }
  func.func @transform_0(%arg0: i32) -> (i32, i32) {
    %c0_i32 = arith.constant 0 : i32
    %c0_i32_0 = arith.constant 0 : i32
    return %arg0, %c0_i32 : i32, i32
  }
  func.func @transform_1(%arg0: i32) -> (i32, i32) {
    %c0_i32 = arith.constant 0 : i32
    %c0_i32_0 = arith.constant 0 : i32
    %c0_i32_1 = arith.constant 0 : i32
    return %c0_i32, %c0_i32_0 : i32, i32
  }
  func.func @transform_2(%arg0: i32) -> (i32, i32) {
    %c0_i32 = arith.constant 0 : i32
    %c0_i32_0 = arith.constant 0 : i32
    %c0_i32_1 = arith.constant 0 : i32
    return %c0_i32, %c0_i32_0 : i32, i32
  }
  func.func @transform_3(%arg0: i32) -> (i32, i32) {
    %c0_i32 = arith.constant 0 : i32
    %c0_i32_0 = arith.constant 0 : i32
    %c0_i32_1 = arith.constant 0 : i32
    return %c0_i32, %c0_i32_0 : i32, i32
  }
  func.func @transform_4(%arg0: i32) -> (i32, i32) {
    %c0_i32 = arith.constant 0 : i32
    %c0_i32_0 = arith.constant 0 : i32
    %c0_i32_1 = arith.constant 0 : i32
    return %c0_i32, %c0_i32_0 : i32, i32
  }
  func.func @transform_5(%arg0: i32) -> (i32, i32) {
    %c0_i32 = arith.constant 0 : i32
    %c0_i32_0 = arith.constant 0 : i32
    %c0_i32_1 = arith.constant 0 : i32
    return %c0_i32, %c0_i32_0 : i32, i32
  }
  func.func @transform_6(%arg0: i32) -> (i32, i32) {
    %c0_i32 = arith.constant 0 : i32
    %c0_i32_0 = arith.constant 0 : i32
    %c0_i32_1 = arith.constant 0 : i32
    return %c0_i32, %c0_i32_0 : i32, i32
  }
  func.func @transform_7(%arg0: i32) -> (i32, i32) {
    %c0_i32 = arith.constant 0 : i32
    %c0_i32_0 = arith.constant 0 : i32
    %c0_i32_1 = arith.constant 0 : i32
    return %c0_i32, %c0_i32_0 : i32, i32
  }
  func.func @transform_8(%arg0: i32) -> (i32, i32) {
    %c0_i32 = arith.constant 0 : i32
    %c0_i32_0 = arith.constant 0 : i32
    %c0_i32_1 = arith.constant 0 : i32
    return %c0_i32, %c0_i32_0 : i32, i32
  }
  func.func @transform_9(%arg0: i32) -> (i32, i32) {
    %c0_i32 = arith.constant 0 : i32
    %c0_i32_0 = arith.constant 0 : i32
    %c0_i32_1 = arith.constant 0 : i32
    return %c0_i32, %c0_i32_0 : i32, i32
  }
  func.func @transform_10(%arg0: i32) -> (i32, i32) {
    %c0_i32 = arith.constant 0 : i32
    %c0_i32_0 = arith.constant 0 : i32
    %c0_i32_1 = arith.constant 0 : i32
    return %c0_i32, %c0_i32_0 : i32, i32
  }
  func.func @transform_11(%arg0: i32) -> (i32, i32) {
    %c0_i32 = arith.constant 0 : i32
    %c0_i32_0 = arith.constant 0 : i32
    %c0_i32_1 = arith.constant 0 : i32
    return %c0_i32, %c0_i32_0 : i32, i32
  }
  func.func @transform_12(%arg0: i32) -> (i32, i32) {
    %c0_i32 = arith.constant 0 : i32
    %c0_i32_0 = arith.constant 0 : i32
    %c0_i32_1 = arith.constant 0 : i32
    return %c0_i32, %c0_i32_0 : i32, i32
  }
}

</mosaic_0001>

<bundles_post_ra>
// kernel: gru_freeze_forward.3
= control target key start
LH: loop header
LB: loop body
LE: loop exit
PB: predicated region body
PF: predicated region fallthrough
CT: control target
= control target key end

     0   :  { %v3161_v1 = vmov 0   ;;  %vm174_vm0 = vcmask 523264   ;;  %v3163_v25 = vmov 0.0   ;;  %vm2320_vm1 = vmmov 0   ;;  %s3148_s1 = inlined_call_operand.vmem [shape: bf16[64,384], index: 1, kind: input, shape index: {}]   ;;  %s3149_s0 = inlined_call_operand.vmem [shape: bf16[64,64], index: 0, kind: input, shape index: {}]   ;;  %s3150_s2 = inlined_call_operand.vmem [shape: bf16[128,384], index: 2, kind: input, shape index: {}]   ;;  %s3151_s3 = inlined_call_operand.vmem [shape: f32[1,384], index: 3, kind: input, shape index: {}]   ;;  %s3152_s4 = inlined_call_operand.vmem [shape: f32[1,384], index: 4, kind: input, shape index: {}]   ;;  %s3153_s6 = inlined_call_operand.vmem [shape: bf16[256,64], index: 6, kind: input, shape index: {}]   ;;  %s3154_s8 = inlined_call_operand.vmem [shape: bf16[64,16], index: 8, kind: input, shape index: {}]   ;;  %s3155_s5 = inlined_call_operand.vmem [shape: f32[8,128], index: 5, kind: input, shape index: {}]   ;;  %s3156_s7 = inlined_call_operand.vmem [shape: f32[1,64], index: 7, kind: input, shape index: {}]   ;;  %s3157_s10 = inlined_call_operand.vmem [shape: bf16[16,1], index: 10, kind: input, shape index: {}]   ;;  %s3158_s11 = inlined_call_operand.<no memory space> [shape: f32[1,1], index: 11, kind: input, shape index: {}]   ;;  %s3159_s9 = inlined_call_operand.vmem [shape: f32[1,16], index: 9, kind: input, shape index: {}]   ;;  %s3160_s12 = inlined_call_operand.vmem [shape: f32[8,1], index: 12, kind: output, shape index: {}]  }
   0x1   :  { %v2141_v0 = vld [vmem:[%s3148_s1 + $0x4] ss:$12 sps:$4 sm:$0xff]   ;;  %219 = vmatprep.mubr.bf16.mxu0 %v3161_v1  ;;  %v2143_v2 = vld [vmem:[%s3148_s1] ss:$12 sps:$4 sm:$0xff]   ;;  %v2144_v3 = vld [vmem:[%s3148_s1 + $0x1c] ss:$12 sps:$4 sm:$0xff]   ;;  %v75_v43 = vlaneseq }
   0x2   :  { %187 = vmatprep.subr.bf16.mxu0 %v2141_v0  ;;  %v2146_v4 = vld [vmem:[%s3148_s1 + $0x18] ss:$12 sps:$4 sm:$0xff]   ;;  %v2147_v5 = vld [vmem:[%s3148_s1 + $0x34] ss:$12 sps:$4 sm:$0xff]   ;;  %v2149_v7 = vld [vmem:[%s3148_s1 + $0x30] ss:$12 sps:$4 sm:$0xff]  }
   0x3   :  { %188 = vmatpush1.bf16.msra.mxu0 %v2143_v2  ;;  %v2153_v6 = vld [vmem:[%s3149_s0] sm:$0xff]   ;;  %v2150_v8 = vld [vmem:[%s3148_s1 + $0x4c] ss:$12 sps:$4 sm:$0xff]   ;;  %v2152_v9 = vld [vmem:[%s3148_s1 + $0x48] ss:$12 sps:$4 sm:$0xff]   ;;  %v2321_v40 = vmov 0.0|0.0  }
   0x4   :  { %189 = vmatprep.subr.bf16.mxu0 %v2144_v3  ;;  %1951 = vmatprep.mubr.msk.bf16.mxu1 %vm174_vm0, %v2153_v6  ;;  %v2419_v10 = vld [vmem:[%s3150_s2 + $0x4] ss:$12 sps:$4 sm:$0xff]   ;;  %v2164_v11 = vld [vmem:[%s3148_s1 + $0x8] ss:$12 sps:$4 sm:$0xff]   ;;  %v2168_v12 = vld [vmem:[%s3148_s1 + $0x20] ss:$12 sps:$4 sm:$0xff]  }
   0x5   :  { %1943 = vmatprep.subr.bf16.mxu1 %v2164_v11  ;;  %v2430_v13 = vld [vmem:[%s3150_s2] ss:$12 sps:$4 sm:$0xff]   ;;  %v2436_v14 = vld [vmem:[%s3150_s2 + $0x1c] ss:$12 sps:$4 sm:$0xff]   ;;  %v2173_v15 = vld [vmem:[%s3148_s1 + $0x38] ss:$12 sps:$4 sm:$0xff]  }
   0x6   :  { %1944 = vmatpush3.bf16.msra.mxu1 %v2164_v11  ;;  %v2446_v16 = vld [vmem:[%s3150_s2 + $0x18] ss:$12 sps:$4 sm:$0xff]   ;;  %v2453_v17 = vld [vmem:[%s3150_s2 + $0x34] ss:$12 sps:$4 sm:$0xff]   ;;  %v2177_v18 = vld [vmem:[%s3148_s1 + $0x50] ss:$12 sps:$4 sm:$0xff]  }
   0x7   :  { %190 = vmatpush1.bf16.msra.mxu0 %v2146_v4  ;;  %1945 = vmatprep.subr.bf16.mxu1 %v2168_v12  ;;  %v2160_v19 = vld [vmem:[%s3149_s0 + $0x8] sm:$0xff]   ;;  %v2465_v20 = vld [vmem:[%s3150_s2 + $0x30] ss:$12 sps:$4 sm:$0xff]   ;;  %v2522_v30 = vld [vmem:[%s3150_s2 + $0x78] ss:$12 sps:$4 sm:$0xff]   ;;  %v2639_v44 = vshrl.u32 %v75_v43, 7 }
   0x8   :  { %191 = vmatprep.subr.bf16.mxu0 %v2147_v5  ;;  %v2471_v21 = vld [vmem:[%s3150_s2 + $0x4c] ss:$12 sps:$4 sm:$0xff]   ;;  %v2477_v22 = vld [vmem:[%s3150_s2 + $0x48] ss:$12 sps:$4 sm:$0xff]   ;;  %v2484_v23 = vld [vmem:[%s3150_s2 + $0x64] ss:$12 sps:$4 sm:$0xff]  }
   0x9   :  { %v2490_v24 = vld [vmem:[%s3150_s2 + $0x8] ss:$12 sps:$4 sm:$0xff]   ;;  %v2500_v27 = vld [vmem:[%s3150_s2 + $0x60] ss:$12 sps:$4 sm:$0xff]   ;;  %v2535_v32 = vld [vmem:[%s3150_s2 + $0x38] ss:$12 sps:$4 sm:$0xff]  }
   0xa   :  { %1946 = vmatpush3.bf16.msra.mxu1 %v2168_v12  ;;  %v2169_v26 = vld [vmem:[%s3149_s0 + $0x10] sm:$0xff]   ;;  %v2507_v28 = vld [vmem:[%s3150_s2 + $0x7c] ss:$12 sps:$4 sm:$0xff]   ;;  %v2513_v29 = vld [vmem:[%s3150_s2 + $0x20] ss:$12 sps:$4 sm:$0xff]   ;;  %v77_v45 = vsub.s32 0, %v2639_v44 }
   0xb   :  { %192 = vmatpush1.bf16.msra.mxu0 %v2149_v7  ;;  %1947 = vmatprep.subr.bf16.mxu1 %v2173_v15  ;;  %v2529_v31 = vld [vmem:[%s3150_s2 + $0x94] ss:$12 sps:$4 sm:$0xff]   ;;  %v2178_v33 = vld [vmem:[%s3149_s0 + $0x18] sm:$0xff]   ;;  %v81_v47 = vsub.s32 1, %v2639_v44  ;;  %v3165_v56 = vsub.s32 2, %v2639_v44  ;;  %vm1687_vm4 = vcmask 130048  }
   0xc   :  { %193 = vmatprep.subr.bf16.mxu0 %v2150_v8  ;;  %v2545_v34 = vld [vmem:[%s3150_s2 + $0x90] ss:$12 sps:$4 sm:$0xff]   ;;  %v2552_v35 = vld [vmem:[%s3150_s2 + $0xac] ss:$12 sps:$4 sm:$0xff]   ;;  %v2568_v37 = vld [vmem:[%s3150_s2 + $0xa8] ss:$12 sps:$4 sm:$0xff]  }
   0xd   :  { %v2558_v36 = vld [vmem:[%s3150_s2 + $0x50] ss:$12 sps:$4 sm:$0xff]   ;;  %v2576_v38 = vld [vmem:[%s3150_s2 + $0x68] ss:$12 sps:$4 sm:$0xff]   ;;  %v2584_v39 = vld [vmem:[%s3150_s2 + $0x80] ss:$12 sps:$4 sm:$0xff]  }
   0xe   :  { %1948 = vmatpush3.bf16.msra.mxu1 %v2173_v15  ;;  %v2594_v41 = vld [vmem:[%s3150_s2 + $0x98] ss:$12 sps:$4 sm:$0xff]   ;;  %v2603_v42 = vld [vmem:[%s3150_s2 + $0xb0] ss:$12 sps:$4 sm:$0xff]   ;;  %v73_v46 = vld [vmem:[%s3151_s3] sm:$0x7] }
   0xf   :  { %194 = vmatpush1.bf16.msra.mxu0 %v2152_v9  ;;  %1949 = vmatprep.subr.bf16.mxu1 %v2177_v18  ;;  %v78_v49 = vrot.slane %v73_v46, %v77_v45  ;;  %v82_v51 = vrot.slane %v73_v46, %v81_v47  ;;  %v2657_v62 = vrot.slane %v73_v46, %v3165_v56  ;;  %vm1731_vm5 = vcmask 7168  }
  0x10   :  { %534 = vmatprep.subr.bf16.mxu0 %v2419_v10 }
  0x12   :  { %1760 = vmatmul.mubr.msk.bf16.vlgmr.msra.gmra.mrb[0].mxu0 %vm174_vm0, %v2153_v6  ;;  %1950 = vmatpush3.bf16.msra.mxu1 %v2177_v18 }
  0x13   :  { %535 = vmatpush1.bf16.msra.mxu0 %v2430_v13  ;;  %229 = vmatprep.mubr.bf16.mxu0 %v3161_v1 }
  0x14   :  { %536 = vmatprep.subr.bf16.mxu0 %v2436_v14  ;;  %1959 = vmatprep.subr.bf16.mxu1 %v3163_v25 }
  0x15   :  { %1952 = vmatmul.mubr.msk.bf16.vlgmr.msra.gmra.mrb[0].mxu1 %vm174_vm0, %v2160_v19 }
  0x16   :  { %1960 = vmatpush3.bf16.msra.mxu1 %v2490_v24  ;;  %1955 = vmatprep.mubr.msk.bf16.mxu1 %vm174_vm0, %v2169_v26 }
  0x17   :  { %537 = vmatpush1.bf16.msra.mxu0 %v2446_v16  ;;  %1961 = vmatprep.subr.bf16.mxu1 %v3163_v25 }
  0x18   :  { %538 = vmatprep.subr.bf16.mxu0 %v2453_v17 }
  0x1a   :  { %1761 = vmatmul.mubr.msk.bf16.gmra.mrb[4].mxu0 %vm174_vm0, %v2160_v19  ;;  %1962 = vmatpush3.bf16.msra.mxu1 %v2513_v29 }
  0x1b   :  { %539 = vmatpush1.bf16.msra.mxu0 %v2465_v20  ;;  %239 = vmatprep.mubr.bf16.mxu0 %v3161_v1 }
  0x1c   :  { %540 = vmatprep.subr.bf16.mxu0 %v2471_v21  ;;  %1963 = vmatprep.subr.bf16.mxu1 %v3163_v25 }
  0x1d   :  { %1956 = vmatmul.mubr.msk.bf16.gmra.mrb[4].mxu1 %vm174_vm0, %v2178_v33 }
  0x1e   :  { %1964 = vmatpush3.bf16.msra.mxu1 %v2535_v32  ;;  %1975 = vmatprep.mubr.msk.bf16.mxu1 %vm2320_vm1, %v3163_v25 }
  0x1f   :  { %541 = vmatpush1.bf16.msra.mxu0 %v2477_v22  ;;  %1965 = vmatprep.subr.bf16.mxu1 %v3163_v25 }
  0x20   :  { %542 = vmatprep.subr.bf16.mxu0 %v2484_v23 }
  0x22   :  { %1762 = vmatmul.mubr.msk.bf16.gmra.mrb[8].mxu0 %vm174_vm0, %v2169_v26  ;;  %1966 = vmatpush3.bf16.msra.mxu1 %v2558_v36 }
  0x23   :  { %543 = vmatpush1.bf16.msra.mxu0 %v2500_v27  ;;  %249 = vmatprep.mubr.bf16.mxu0 %v3161_v1 }
  0x24   :  { %544 = vmatprep.subr.bf16.mxu0 %v2507_v28  ;;  %1967 = vmatprep.subr.bf16.mxu1 %v3163_v25 }
  0x26   :  { %1968 = vmatpush3.bf16.msra.mxu1 %v2576_v38 }
  0x27   :  { %545 = vmatpush1.bf16.msra.mxu0 %v2522_v30  ;;  %1969 = vmatprep.subr.bf16.mxu1 %v3163_v25 }
  0x28   :  { %546 = vmatprep.subr.bf16.mxu0 %v2529_v31 }
  0x2a   :  { %1763 = vmatmul.mubr.msk.bf16.gmra.mrb[12].mxu0 %vm174_vm0, %v2178_v33  ;;  %1970 = vmatpush3.bf16.msra.mxu1 %v2584_v39 }
  0x2b   :  { %547 = vmatpush1.bf16.msra.mxu0 %v2545_v34  ;;  %566 = vmatprep.mubr.bf16.mxu0 %v3161_v1 }
  0x2c   :  { %548 = vmatprep.subr.bf16.mxu0 %v2552_v35  ;;  %1971 = vmatprep.subr.bf16.mxu1 %v3163_v25 }
  0x2e   :  { %1972 = vmatpush3.bf16.msra.mxu1 %v2594_v41 }
  0x2f   :  { %549 = vmatpush1.bf16.msra.mxu0 %v2568_v37  ;;  %1973 = vmatprep.subr.bf16.mxu1 %v3163_v25 }
  0x30   :  { %643 = vmatprep.subr.bf16.mxu0 %v2419_v10 }
  0x32   :  { %567 = vmatmul.mubr.bf16.vlgmr.msra.gmra.mrb[16].mxu0 %v2321_v40  ;;  %1974 = vmatpush3.bf16.msra.mxu1 %v2603_v42 }
  0x33   :  { %644 = vmatpush1.bf16.msra.mxu0 %v2430_v13  ;;  %675 = vmatprep.mubr.bf16.mxu0 %v3161_v1 }
  0x34   :  { %645 = vmatprep.subr.bf16.mxu0 %v2436_v14  ;;  %1979 = vmatprep.subr.bf16.mxu1 %v3163_v25 }
  0x35   :  { %1976 = vmatmul.mubr.bf16.vlgmr.msra.gmra.mrb[8].mxu1 %v2321_v40 }
  0x36   :  { %1980 = vmatpush3.bf16.msra.mxu1 %v2490_v24  ;;  %1995 = vmatprep.mubr.msk.bf16.mxu1 %vm2320_vm1, %v3163_v25 }
  0x37   :  { %646 = vmatpush1.bf16.msra.mxu0 %v2446_v16  ;;  %1981 = vmatprep.subr.bf16.mxu1 %v3163_v25 }
  0x38   :  { %647 = vmatprep.subr.bf16.mxu0 %v2453_v17 }
  0x3a   :  { %1982 = vmatpush3.bf16.msra.mxu1 %v2513_v29 }
  0x3b   :  { %648 = vmatpush1.bf16.msra.mxu0 %v2465_v20  ;;  %1983 = vmatprep.subr.bf16.mxu1 %v3163_v25 }
  0x3c   :  { %649 = vmatprep.subr.bf16.mxu0 %v2471_v21 }
  0x3e   :  { %1984 = vmatpush3.bf16.msra.mxu1 %v2535_v32 }
  0x3f   :  { %650 = vmatpush1.bf16.msra.mxu0 %v2477_v22  ;;  %1985 = vmatprep.subr.bf16.mxu1 %v3163_v25 }
  0x40   :  { %651 = vmatprep.subr.bf16.mxu0 %v2484_v23 }
  0x42   :  { %1986 = vmatpush3.bf16.msra.mxu1 %v2558_v36 }
  0x43   :  { %652 = vmatpush1.bf16.msra.mxu0 %v2500_v27  ;;  %1987 = vmatprep.subr.bf16.mxu1 %v3163_v25 }
  0x44   :  { %653 = vmatprep.subr.bf16.mxu0 %v2507_v28 }
  0x46   :  { %1988 = vmatpush3.bf16.msra.mxu1 %v2576_v38 }
  0x47   :  { %654 = vmatpush1.bf16.msra.mxu0 %v2522_v30  ;;  %1989 = vmatprep.subr.bf16.mxu1 %v3163_v25 }
  0x48   :  { %655 = vmatprep.subr.bf16.mxu0 %v2529_v31 }
  0x4a   :  { %1990 = vmatpush3.bf16.msra.mxu1 %v2584_v39 }
  0x4b   :  { %656 = vmatpush1.bf16.msra.mxu0 %v2545_v34  ;;  %1991 = vmatprep.subr.bf16.mxu1 %v3163_v25 }
  0x4c   :  { %657 = vmatprep.subr.bf16.mxu0 %v2552_v35 }
  0x4e   :  { %1992 = vmatpush3.bf16.msra.mxu1 %v2594_v41 }
  0x4f   :  { %658 = vmatpush1.bf16.msra.mxu0 %v2568_v37  ;;  %1993 = vmatprep.subr.bf16.mxu1 %v3163_v25 }
  0x50   :  { %752 = vmatprep.subr.bf16.mxu0 %v2419_v10 }
  0x52   :  { %1994 = vmatpush3.bf16.msra.mxu1 %v2603_v42 }
  0x53   :  { %1999 = vmatprep.subr.bf16.mxu1 %v3163_v25 }
  0xe5   :  { %v221_v48 = vpop.f32.mrb[0].mxu0 }
  0xe6   :  { %v223_v50 = vpop.f32.mrb[1].mxu0  ;;  %v222_v25 = vadd.f32 %v221_v48, %v78_v49 }
  0xe7   :  { %v225_v52 = vpop.f32.mrb[2].mxu0  ;;  %v224_v56 = vadd.f32 %v223_v50, %v82_v51 }
  0xe8   :  { %v2646_v53 = vadd.f32 %v225_v52, %v78_v49  ;;  %v227_v54 = vpop.f32.mrb[3].mxu0  ;;  %v1953_v3 = vpop.f32.mrb[0].mxu1 }
  0xe9   :  { %v2648_v55 = vadd.f32 %v227_v54, %v82_v51  ;;  %v2664_v4 = vadd.f32 %v1953_v3, %v2657_v62  ;;  %v294_v5 = vpop.f32.mrb[1].mxu1 }
  0xea   :  { %v1954_v6 = vpop.f32.mrb[2].mxu1 }
  0xeb   :  { %v2667_v8 = vadd.f32 %v1954_v6, %v2657_v62  ;;  %v297_v9 = vpop.f32.mrb[3].mxu1 }
  0xec   :  { %v2672_v15 = vadd.f32 %v297_v9, %v2657_v62 }
  0xed   :  { %v231_v57 = vpop.f32.mrb[4].mxu0 }
  0xee   :  { %v2651_v58 = vadd.f32 %v231_v57, %v78_v49  ;;  %v233_v59 = vpop.f32.mrb[5].mxu0 }
  0xef   :  { %v2653_v60 = vadd.f32 %v233_v59, %v82_v51  ;;  %v235_v61 = vpop.f32.mrb[6].mxu0 }
  0xf0   :  { %v2659_v63 = vadd.f32 %v235_v61, %v78_v49  ;;  %v237_v0 = vpop.f32.mrb[7].mxu0  ;;  %v1957_v43 = vpop.f32.mrb[4].mxu1 }
  0xf1   :  { %v2661_v2 = vadd.f32 %v237_v0, %v82_v51  ;;  %v2681_v46 = vadd.f32 %v1957_v43, %v2657_v62  ;;  %v310_v52 = vpop.f32.mrb[5].mxu1 }
  0xf2   :  { %v2684_v54 = vadd.f32 %v310_v52, %v2657_v62  ;;  %v1958_v57 = vpop.f32.mrb[6].mxu1 }
  0xf3   :  { %3167 = vst [vmem:[#allocation6_spill] sm:$0xff] %v2681_v46  ;;  %v2687_v61 = vadd.f32 %v1958_v57, %v2657_v62  ;;  %v313_v0 = vpop.f32.mrb[7].mxu1 }
  0xf5   :  { %v241_v7 = vpop.f32.mrb[8].mxu0  ;;  %3168 = vst [vmem:[#allocation7_spill] sm:$0xff] %v2687_v61 }
  0xf6   :  { %v2669_v11 = vadd.f32 %v241_v7, %v78_v49  ;;  %v243_v12 = vpop.f32.mrb[9].mxu0  ;;  %v2692_v7 = vadd.f32 %v313_v0, %v2657_v62 }
  0xf7   :  { %v2674_v18 = vadd.f32 %v243_v12, %v82_v51  ;;  %v245_v19 = vpop.f32.mrb[10].mxu0 }
  0xf8   :  { %v2676_v26 = vadd.f32 %v245_v19, %v78_v49  ;;  %v247_v33 = vpop.f32.mrb[11].mxu0  ;;  %3170 = vst [vmem:[#allocation9_spill] sm:$0xff] %v2692_v7  ;;  %v381_v19 = vld [vmem:[%s3152_s4] sm:$0x7] }
  0xf9   :  { %v2678_v40 = vadd.f32 %v247_v33, %v82_v51  ;;  %v2703_v57 = vrot.slane %v381_v19, %v77_v45 }
  0xfb   :  { %3166 = vst [vmem:[#allocation5_spill] sm:$0xff] %v2678_v40 }
  0xfd   :  { %v251_v59 = vpop.f32.mrb[12].mxu0 }
  0xfe   :  { %v2689_v3 = vadd.f32 %v251_v59, %v78_v49  ;;  %v253_v6 = vpop.f32.mrb[13].mxu0  ;;  %v2705_v59 = vrot.slane %v381_v19, %v81_v47 }
  0xff   :  { %v2694_v9 = vadd.f32 %v253_v6, %v82_v51  ;;  %v255_v12 = vpop.f32.mrb[14].mxu0 }
 0x100   :  { %3169 = vst [vmem:[#allocation8_spill] sm:$0xff] %v2689_v3  ;;  %v2699_v33 = vadd.f32 %v255_v12, %v78_v49  ;;  %v257_v43 = vpop.f32.mrb[15].mxu0 }
 0x101   :  { %3171 = vst [vmem:[#allocation10_spill] sm:$0xff] %v2694_v9  ;;  %v2701_v52 = vadd.f32 %v257_v43, %v82_v51 }
 0x102   :  { %3172 = vst [vmem:[#allocation11_spill] sm:$0xff] %v2699_v33 }
 0x103   :  { %3173 = vst [vmem:[#allocation12_spill] sm:$0xff] %v2701_v52 }
 0x105   :  { %v568_v1 = vpop.f32.mrb[16].mxu0 }
 0x106   :  { %v569_v0 = vadd.f32 %v568_v1, %v2703_v57  ;;  %v570_v6 = vpop.f32.mrb[17].mxu0  ;;  %v3174_v1 = vsub.s32 2, %v2639_v44 }
 0x107   :  { %v571_v61 = vadd.f32 %v570_v6, %v2705_v59  ;;  %v572_v46 = vpop.f32.mrb[18].mxu0 }
 0x108   :  { %v615_v9 = vadd.f32 %v569_v0, %v222_v25  ;;  %v573_v3 = vpop.f32.mrb[19].mxu0  ;;  %v609_v52 = vpop.f32.mrb[8].mxu1  ;;  %v2711_v49 = vrot.slane %v381_v19, %v3174_v1  ;;  %v295_v46 = vadd.f32 %v294_v5, %v2657_v62  ;;  %v3175_v62 = vmov 0.0  }
 0x109   :  { %v622_v12 = vadd.f32 %v571_v61, %v224_v56  ;;  %v1977_v45 = vpop.f32.mrb[9].mxu1  ;;  %v3176_v5 = vmov 0  }
 0x10a   :  { %v1792_v33 = vmul.f32 -1.442695, %v615_v9  ;;  %v612_v47 = vpop.f32.mrb[10].mxu1  ;;  %v610_v25 = vadd.f32 %v609_v52, %v2711_v49 }
 0x10b   :  { %v1793_v43 = vmul.f32 -1.442695, %v622_v12  ;;  %v1978_v7 = vpop.f32.mrb[11].mxu1 }
 0x10c   :  { %2214 = vpow2.f32 %v1792_v33 }
 0x10d   :  { %2216 = vpow2.f32 %v1793_v43 }
 0x116   :  { %v2215_v40 = vpop.eup %2214 }
 0x117   :  { %v619_v48 = vadd.f32 1.0, %v2215_v40  ;;  %v2217_v50 = vpop.eup %2216 }
 0x118   :  { %v626_v51 = vadd.f32 1.0, %v2217_v50 }
 0x119   :  { %2218 = vrcp.f32 %v619_v48 }
 0x11a   :  { %2220 = vrcp.f32 %v626_v51 }
 0x123   :  { %v2219_v56 = vpop.eup %2218 }
 0x124   :  { %v629_v61 = vmul.f32 %v2219_v56, %v610_v25  ;;  %v2221_v9 = vpop.eup %2220 }
 0x125   :  { %v632_v7 = vsub.f32 1.0, %v2221_v9  ;;  %v634_v0 = vmul.f32 0.0, %v2221_v9 }
 0x126   :  { %v630_v3 = vadd.f32 %v629_v61, %v295_v46 }
 0x128   :  { %2222 = vtanh.f32 %v630_v3 }
 0x132   :  { %v2223_v33 = vpop.eup %2222 }
 0x133   :  { %v633_v40 = vmul.f32 %v2223_v33, %v632_v7 }
 0x135   :  { %v2715_v6 = vadd.f32 %v634_v0, %v633_v40 }
 0x137   :  { %v642_v44 = vpack.c.bf16 %v2715_v6, %v2715_v6 }
 0x139   :  { %676 = vmatmul.mubr.bf16.vlgmr.msra.gmra.mrb[20].mxu0 %v642_v44  ;;  %1996 = vmatmul.mubr.bf16.vlgmr.msra.gmra.mrb[12].mxu1 %v642_v44 }
 0x13a   :  { %753 = vmatpush1.bf16.msra.mxu0 %v2430_v13  ;;  %2000 = vmatpush3.bf16.msra.mxu1 %v2490_v24 }
 0x13b   :  { %754 = vmatprep.subr.bf16.mxu0 %v2436_v14  ;;  %2001 = vmatprep.subr.bf16.mxu1 %v3175_v62 }
 0x13c   :  { %784 = vmatprep.mubr.bf16.mxu0 %v3176_v5  ;;  %2015 = vmatprep.mubr.msk.bf16.mxu1 %vm2320_vm1, %v3175_v62 }
 0x13e   :  { %755 = vmatpush1.bf16.msra.mxu0 %v2446_v16  ;;  %2002 = vmatpush3.bf16.msra.mxu1 %v2513_v29 }
 0x13f   :  { %756 = vmatprep.subr.bf16.mxu0 %v2453_v17  ;;  %2003 = vmatprep.subr.bf16.mxu1 %v3175_v62 }
 0x142   :  { %757 = vmatpush1.bf16.msra.mxu0 %v2465_v20  ;;  %2004 = vmatpush3.bf16.msra.mxu1 %v2535_v32 }
 0x143   :  { %758 = vmatprep.subr.bf16.mxu0 %v2471_v21  ;;  %2005 = vmatprep.subr.bf16.mxu1 %v3175_v62 }
 0x146   :  { %759 = vmatpush1.bf16.msra.mxu0 %v2477_v22  ;;  %2006 = vmatpush3.bf16.msra.mxu1 %v2558_v36 }
 0x147   :  { %760 = vmatprep.subr.bf16.mxu0 %v2484_v23  ;;  %2007 = vmatprep.subr.bf16.mxu1 %v3175_v62 }
 0x14a   :  { %761 = vmatpush1.bf16.msra.mxu0 %v2500_v27  ;;  %2008 = vmatpush3.bf16.msra.mxu1 %v2576_v38 }
 0x14b   :  { %762 = vmatprep.subr.bf16.mxu0 %v2507_v28  ;;  %2009 = vmatprep.subr.bf16.mxu1 %v3175_v62 }
 0x14e   :  { %763 = vmatpush1.bf16.msra.mxu0 %v2522_v30  ;;  %2010 = vmatpush3.bf16.msra.mxu1 %v2584_v39 }
 0x14f   :  { %764 = vmatprep.subr.bf16.mxu0 %v2529_v31  ;;  %2011 = vmatprep.subr.bf16.mxu1 %v3175_v62 }
 0x152   :  { %765 = vmatpush1.bf16.msra.mxu0 %v2545_v34  ;;  %2012 = vmatpush3.bf16.msra.mxu1 %v2594_v41 }
 0x153   :  { %766 = vmatprep.subr.bf16.mxu0 %v2552_v35  ;;  %2013 = vmatprep.subr.bf16.mxu1 %v3175_v62 }
 0x156   :  { %767 = vmatpush1.bf16.msra.mxu0 %v2568_v37  ;;  %2014 = vmatpush3.bf16.msra.mxu1 %v2603_v42 }
 0x157   :  { %861 = vmatprep.subr.bf16.mxu0 %v2419_v10  ;;  %2019 = vmatprep.subr.bf16.mxu1 %v3175_v62 }
 0x20c   :  { %v677_v19 = vpop.f32.mrb[20].mxu0  ;;  %v718_v52 = vpop.f32.mrb[12].mxu1 }
 0x20d   :  { %v678_v12 = vadd.f32 %v677_v19, %v2703_v57  ;;  %v679_v43 = vpop.f32.mrb[21].mxu0  ;;  %v1997_v45 = vpop.f32.mrb[13].mxu1  ;;  %v719_v40 = vadd.f32 %v718_v52, %v2711_v49 }
 0x20e   :  { %v680_v47 = vadd.f32 %v679_v43, %v2705_v59  ;;  %v681_v48 = vpop.f32.mrb[22].mxu0  ;;  %v721_v1 = vpop.f32.mrb[14].mxu1 }
 0x20f   :  { %v724_v50 = vadd.f32 %v678_v12, %v2646_v53  ;;  %v682_v51 = vpop.f32.mrb[23].mxu0  ;;  %v1998_v25 = vpop.f32.mrb[15].mxu1 }
 0x210   :  { %v731_v56 = vadd.f32 %v680_v47, %v2648_v55 }
 0x211   :  { %v1794_v46 = vmul.f32 -1.442695, %v724_v50 }
 0x212   :  { %v1795_v61 = vmul.f32 -1.442695, %v731_v56 }
 0x213   :  { %2224 = vpow2.f32 %v1794_v46 }
 0x214   :  { %2226 = vpow2.f32 %v1795_v61 }
 0x21d   :  { %v2225_v3 = vpop.eup %2224 }
 0x21e   :  { %v728_v9 = vadd.f32 1.0, %v2225_v3  ;;  %v2227_v7 = vpop.eup %2226 }
 0x21f   :  { %v735_v33 = vadd.f32 1.0, %v2227_v7 }
 0x220   :  { %2228 = vrcp.f32 %v728_v9 }
 0x221   :  { %2230 = vrcp.f32 %v735_v33 }
 0x22a   :  { %v2229_v0 = vpop.eup %2228 }
 0x22b   :  { %v738_v44 = vmul.f32 %v2229_v0, %v719_v40  ;;  %v2231_v19 = vpop.eup %2230 }
 0x22c   :  { %v741_v12 = vsub.f32 1.0, %v2231_v19  ;;  %v743_v45 = vmul.f32 %v2231_v19, %v2715_v6 }
 0x22d   :  { %v739_v53 = vadd.f32 %v738_v44, %v2672_v15 }
 0x22f   :  { %2232 = vtanh.f32 %v739_v53 }
 0x239   :  { %v2233_v55 = vpop.eup %2232 }
 0x23a   :  { %v742_v43 = vmul.f32 %v2233_v55, %v741_v12 }
 0x23c   :  { %v2761_v47 = vadd.f32 %v743_v45, %v742_v43 }
 0x23e   :  { %v751_v48 = vpack.c.bf16 %v2761_v47, %v2761_v47 }
 0x240   :  { %785 = vmatmul.mubr.bf16.vlgmr.msra.gmra.mrb[24].mxu0 %v751_v48  ;;  %2016 = vmatmul.mubr.bf16.vlgmr.msra.gmra.mrb[16].mxu1 %v751_v48 }
 0x241   :  { %862 = vmatpush1.bf16.msra.mxu0 %v2430_v13  ;;  %2020 = vmatpush3.bf16.msra.mxu1 %v2490_v24 }
 0x242   :  { %863 = vmatprep.subr.bf16.mxu0 %v2436_v14  ;;  %2021 = vmatprep.subr.bf16.mxu1 %v3175_v62 }
 0x243   :  { %893 = vmatprep.mubr.bf16.mxu0 %v3176_v5  ;;  %2035 = vmatprep.mubr.msk.bf16.mxu1 %vm2320_vm1, %v3175_v62 }
 0x245   :  { %864 = vmatpush1.bf16.msra.mxu0 %v2446_v16  ;;  %2022 = vmatpush3.bf16.msra.mxu1 %v2513_v29 }
 0x246   :  { %865 = vmatprep.subr.bf16.mxu0 %v2453_v17  ;;  %2023 = vmatprep.subr.bf16.mxu1 %v3175_v62 }
 0x249   :  { %866 = vmatpush1.bf16.msra.mxu0 %v2465_v20  ;;  %2024 = vmatpush3.bf16.msra.mxu1 %v2535_v32 }
 0x24a   :  { %867 = vmatprep.subr.bf16.mxu0 %v2471_v21  ;;  %2025 = vmatprep.subr.bf16.mxu1 %v3175_v62 }
 0x24d   :  { %868 = vmatpush1.bf16.msra.mxu0 %v2477_v22  ;;  %2026 = vmatpush3.bf16.msra.mxu1 %v2558_v36 }
 0x24e   :  { %869 = vmatprep.subr.bf16.mxu0 %v2484_v23  ;;  %2027 = vmatprep.subr.bf16.mxu1 %v3175_v62 }
 0x251   :  { %870 = vmatpush1.bf16.msra.mxu0 %v2500_v27  ;;  %2028 = vmatpush3.bf16.msra.mxu1 %v2576_v38 }
 0x252   :  { %871 = vmatprep.subr.bf16.mxu0 %v2507_v28  ;;  %2029 = vmatprep.subr.bf16.mxu1 %v3175_v62 }
 0x255   :  { %872 = vmatpush1.bf16.msra.mxu0 %v2522_v30  ;;  %2030 = vmatpush3.bf16.msra.mxu1 %v2584_v39 }
 0x256   :  { %873 = vmatprep.subr.bf16.mxu0 %v2529_v31  ;;  %2031 = vmatprep.subr.bf16.mxu1 %v3175_v62 }
 0x259   :  { %874 = vmatpush1.bf16.msra.mxu0 %v2545_v34  ;;  %2032 = vmatpush3.bf16.msra.mxu1 %v2594_v41 }
 0x25a   :  { %875 = vmatprep.subr.bf16.mxu0 %v2552_v35  ;;  %2033 = vmatprep.subr.bf16.mxu1 %v3175_v62 }
 0x25d   :  { %876 = vmatpush1.bf16.msra.mxu0 %v2568_v37  ;;  %2034 = vmatpush3.bf16.msra.mxu1 %v2603_v42 }
 0x25e   :  { %970 = vmatprep.subr.bf16.mxu0 %v2419_v10  ;;  %2039 = vmatprep.subr.bf16.mxu1 %v3175_v62 }
 0x313   :  { %v786_v15 = vpop.f32.mrb[24].mxu0  ;;  %v827_v6 = vpop.f32.mrb[16].mxu1 }
 0x314   :  { %v787_v52 = vadd.f32 %v786_v15, %v2703_v57  ;;  %v788_v1 = vpop.f32.mrb[25].mxu0  ;;  %v2017_v50 = vpop.f32.mrb[17].mxu1  ;;  %v828_v19 = vadd.f32 %v827_v6, %v2711_v49 }
 0x315   :  { %v789_v51 = vadd.f32 %v788_v1, %v2705_v59  ;;  %v790_v25 = vpop.f32.mrb[26].mxu0  ;;  %v830_v56 = vpop.f32.mrb[18].mxu1 }
 0x316   :  { %v833_v46 = vadd.f32 %v787_v52, %v2651_v58  ;;  %v791_v61 = vpop.f32.mrb[27].mxu0  ;;  %v2018_v3 = vpop.f32.mrb[19].mxu1 }
 0x317   :  { %v840_v9 = vadd.f32 %v789_v51, %v2653_v60 }
 0x318   :  { %v1796_v7 = vmul.f32 -1.442695, %v833_v46 }
 0x319   :  { %v1797_v33 = vmul.f32 -1.442695, %v840_v9 }
 0x31a   :  { %2234 = vpow2.f32 %v1796_v7 }
 0x31b   :  { %2236 = vpow2.f32 %v1797_v33 }
 0x324   :  { %v2235_v40 = vpop.eup %2234 }
 0x325   :  { %v837_v0 = vadd.f32 1.0, %v2235_v40  ;;  %v2237_v44 = vpop.eup %2236 }
 0x326   :  { %v844_v53 = vadd.f32 1.0, %v2237_v44 }
 0x327   :  { %2238 = vrcp.f32 %v837_v0 }
 0x328   :  { %2240 = vrcp.f32 %v844_v53 }
 0x331   :  { %v2239_v12 = vpop.eup %2238 }
 0x332   :  { %v847_v55 = vmul.f32 %v2239_v12, %v828_v19  ;;  %v2241_v43 = vpop.eup %2240 }
 0x333   :  { %v850_v45 = vsub.f32 1.0, %v2241_v43  ;;  %v852_v15 = vmul.f32 %v2241_v43, %v2761_v47 }
 0x334   :  { %v848_v58 = vadd.f32 %v847_v55, %v2664_v4 }
 0x336   :  { %2242 = vtanh.f32 %v848_v58 }
 0x340   :  { %v2243_v60 = vpop.eup %2242 }
 0x341   :  { %v851_v48 = vmul.f32 %v2243_v60, %v850_v45 }
 0x343   :  { %v2807_v52 = vadd.f32 %v852_v15, %v851_v48 }
 0x345   :  { %v860_v1 = vpack.c.bf16 %v2807_v52, %v2807_v52 }
 0x347   :  { %894 = vmatmul.mubr.bf16.vlgmr.msra.gmra.mrb[28].mxu0 %v860_v1  ;;  %2036 = vmatmul.mubr.bf16.vlgmr.msra.gmra.mrb[20].mxu1 %v860_v1 }
 0x348   :  { %971 = vmatpush1.bf16.msra.mxu0 %v2430_v13  ;;  %2040 = vmatpush3.bf16.msra.mxu1 %v2490_v24 }
 0x349   :  { %972 = vmatprep.subr.bf16.mxu0 %v2436_v14  ;;  %2041 = vmatprep.subr.bf16.mxu1 %v3175_v62 }
 0x34a   :  { %1002 = vmatprep.mubr.bf16.mxu0 %v3176_v5  ;;  %2055 = vmatprep.mubr.msk.bf16.mxu1 %vm2320_vm1, %v3175_v62 }
 0x34c   :  { %973 = vmatpush1.bf16.msra.mxu0 %v2446_v16  ;;  %2042 = vmatpush3.bf16.msra.mxu1 %v2513_v29 }
 0x34d   :  { %974 = vmatprep.subr.bf16.mxu0 %v2453_v17  ;;  %2043 = vmatprep.subr.bf16.mxu1 %v3175_v62 }
 0x350   :  { %975 = vmatpush1.bf16.msra.mxu0 %v2465_v20  ;;  %2044 = vmatpush3.bf16.msra.mxu1 %v2535_v32 }
 0x351   :  { %976 = vmatprep.subr.bf16.mxu0 %v2471_v21  ;;  %2045 = vmatprep.subr.bf16.mxu1 %v3175_v62 }
 0x354   :  { %977 = vmatpush1.bf16.msra.mxu0 %v2477_v22  ;;  %2046 = vmatpush3.bf16.msra.mxu1 %v2558_v36 }
 0x355   :  { %978 = vmatprep.subr.bf16.mxu0 %v2484_v23  ;;  %2047 = vmatprep.subr.bf16.mxu1 %v3175_v62 }
 0x358   :  { %979 = vmatpush1.bf16.msra.mxu0 %v2500_v27  ;;  %2048 = vmatpush3.bf16.msra.mxu1 %v2576_v38 }
 0x359   :  { %980 = vmatprep.subr.bf16.mxu0 %v2507_v28  ;;  %2049 = vmatprep.subr.bf16.mxu1 %v3175_v62 }
 0x35c   :  { %981 = vmatpush1.bf16.msra.mxu0 %v2522_v30  ;;  %2050 = vmatpush3.bf16.msra.mxu1 %v2584_v39 }
 0x35d   :  { %982 = vmatprep.subr.bf16.mxu0 %v2529_v31  ;;  %2051 = vmatprep.subr.bf16.mxu1 %v3175_v62 }
 0x360   :  { %983 = vmatpush1.bf16.msra.mxu0 %v2545_v34  ;;  %2052 = vmatpush3.bf16.msra.mxu1 %v2594_v41 }
 0x361   :  { %984 = vmatprep.subr.bf16.mxu0 %v2552_v35  ;;  %2053 = vmatprep.subr.bf16.mxu1 %v3175_v62 }
 0x364   :  { %985 = vmatpush1.bf16.msra.mxu0 %v2568_v37  ;;  %2054 = vmatpush3.bf16.msra.mxu1 %v2603_v42 }
 0x365   :  { %1079 = vmatprep.subr.bf16.mxu0 %v2419_v10  ;;  %2059 = vmatprep.subr.bf16.mxu1 %v3175_v62 }
 0x41a   :  { %v895_v4 = vpop.f32.mrb[28].mxu0  ;;  %v936_v47 = vpop.f32.mrb[20].mxu1 }
 0x41b   :  { %v896_v6 = vadd.f32 %v895_v4, %v2703_v57  ;;  %v897_v50 = vpop.f32.mrb[29].mxu0  ;;  %v2037_v51 = vpop.f32.mrb[21].mxu1  ;;  %v937_v12 = vadd.f32 %v936_v47, %v2711_v49 }
 0x41c   :  { %v898_v25 = vadd.f32 %v897_v50, %v2705_v59  ;;  %v899_v56 = vpop.f32.mrb[30].mxu0  ;;  %v939_v46 = vpop.f32.mrb[22].mxu1 }
 0x41d   :  { %v942_v61 = vadd.f32 %v896_v6, %v2659_v63  ;;  %v900_v3 = vpop.f32.mrb[31].mxu0  ;;  %v2038_v9 = vpop.f32.mrb[23].mxu1 }
 0x41e   :  { %v949_v7 = vadd.f32 %v898_v25, %v2661_v2 }
 0x41f   :  { %v1798_v33 = vmul.f32 -1.442695, %v942_v61 }
 0x420   :  { %v1799_v40 = vmul.f32 -1.442695, %v949_v7 }
 0x421   :  { %2244 = vpow2.f32 %v1798_v33 }
 0x422   :  { %2246 = vpow2.f32 %v1799_v40 }
 0x42b   :  { %v2245_v0 = vpop.eup %2244 }
 0x42c   :  { %v946_v44 = vadd.f32 1.0, %v2245_v0  ;;  %v2247_v53 = vpop.eup %2246 }
 0x42d   :  { %v953_v19 = vadd.f32 1.0, %v2247_v53 }
 0x42e   :  { %2248 = vrcp.f32 %v946_v44 }
 0x42f   :  { %2250 = vrcp.f32 %v953_v19 }
 0x438   :  { %v2249_v55 = vpop.eup %2248 }
 0x439   :  { %v956_v58 = vmul.f32 %v2249_v55, %v937_v12  ;;  %v2251_v43 = vpop.eup %2250 }
 0x43a   :  { %v959_v45 = vsub.f32 1.0, %v2251_v43  ;;  %v961_v48 = vmul.f32 %v2251_v43, %v2807_v52 }
 0x43b   :  { %v957_v63 = vadd.f32 %v956_v58, %v2667_v8  ;;  %v2906_v58 = vld [vmem:[%s3150_s2] ss:$12 sps:$4 sm:$0xff]  }
 0x43d   :  { %2252 = vtanh.f32 %v957_v63  ;;  %v2923_v63 = vld [vmem:[%s3150_s2 + $0x18] ss:$12 sps:$4 sm:$0xff]  }
 0x447   :  { %v2253_v2 = vpop.eup %2252 }
 0x448   :  { %v960_v60 = vmul.f32 %v2253_v2, %v959_v45 }
 0x44a   :  { %v2853_v15 = vadd.f32 %v961_v48, %v960_v60 }
 0x44c   :  { %v969_v1 = vpack.c.bf16 %v2853_v15, %v2853_v15 }
 0x44e   :  { %1003 = vmatmul.mubr.bf16.vlgmr.msra.gmra.mrb[32].mxu0 %v969_v1  ;;  %2056 = vmatmul.mubr.bf16.vlgmr.msra.gmra.mrb[24].mxu1 %v969_v1 }
 0x44f   :  { %1080 = vmatpush1.bf16.msra.mxu0 %v2430_v13  ;;  %2060 = vmatpush3.bf16.msra.mxu1 %v2490_v24 }
 0x450   :  { %1081 = vmatprep.subr.bf16.mxu0 %v2436_v14  ;;  %2061 = vmatprep.subr.bf16.mxu1 %v3175_v62 }
 0x451   :  { %1111 = vmatprep.mubr.bf16.mxu0 %v3176_v5  ;;  %2075 = vmatprep.mubr.msk.bf16.mxu1 %vm2320_vm1, %v3175_v62 }
 0x453   :  { %1082 = vmatpush1.bf16.msra.mxu0 %v2446_v16  ;;  %2062 = vmatpush3.bf16.msra.mxu1 %v2513_v29 }
 0x454   :  { %1083 = vmatprep.subr.bf16.mxu0 %v2453_v17  ;;  %2063 = vmatprep.subr.bf16.mxu1 %v3175_v62 }
 0x457   :  { %1084 = vmatpush1.bf16.msra.mxu0 %v2465_v20  ;;  %2064 = vmatpush3.bf16.msra.mxu1 %v2535_v32 }
 0x458   :  { %1085 = vmatprep.subr.bf16.mxu0 %v2471_v21  ;;  %2065 = vmatprep.subr.bf16.mxu1 %v3175_v62 }
 0x45b   :  { %1086 = vmatpush1.bf16.msra.mxu0 %v2477_v22  ;;  %2066 = vmatpush3.bf16.msra.mxu1 %v2558_v36 }
 0x45c   :  { %1087 = vmatprep.subr.bf16.mxu0 %v2484_v23  ;;  %2067 = vmatprep.subr.bf16.mxu1 %v3175_v62 }
 0x45f   :  { %1088 = vmatpush1.bf16.msra.mxu0 %v2500_v27  ;;  %2068 = vmatpush3.bf16.msra.mxu1 %v2576_v38 }
 0x460   :  { %1089 = vmatprep.subr.bf16.mxu0 %v2507_v28  ;;  %2069 = vmatprep.subr.bf16.mxu1 %v3175_v62 }
 0x463   :  { %1090 = vmatpush1.bf16.msra.mxu0 %v2522_v30  ;;  %2070 = vmatpush3.bf16.msra.mxu1 %v2584_v39 }
 0x464   :  { %1091 = vmatprep.subr.bf16.mxu0 %v2529_v31  ;;  %2071 = vmatprep.subr.bf16.mxu1 %v3175_v62 }
 0x467   :  { %1092 = vmatpush1.bf16.msra.mxu0 %v2545_v34  ;;  %2072 = vmatpush3.bf16.msra.mxu1 %v2594_v41 }
 0x468   :  { %1093 = vmatprep.subr.bf16.mxu0 %v2552_v35  ;;  %2073 = vmatprep.subr.bf16.mxu1 %v3175_v62 }
 0x46b   :  { %1094 = vmatpush1.bf16.msra.mxu0 %v2568_v37  ;;  %2074 = vmatpush3.bf16.msra.mxu1 %v2603_v42 }
 0x46c   :  { %1188 = vmatprep.subr.bf16.mxu0 %v2419_v10  ;;  %2079 = vmatprep.subr.bf16.mxu1 %v3175_v62 }
 0x521   :  { %v1004_v13 = vpop.f32.mrb[32].mxu0  ;;  %v1045_v14 = vpop.f32.mrb[24].mxu1 }
 0x522   :  { %v1005_v16 = vadd.f32 %v1004_v13, %v2703_v57  ;;  %v1006_v17 = vpop.f32.mrb[33].mxu0  ;;  %v2057_v8 = vpop.f32.mrb[25].mxu1  ;;  %v1046_v7 = vadd.f32 %v1045_v14, %v2711_v49 }
 0x523   :  { %v1007_v52 = vadd.f32 %v1006_v17, %v2705_v59  ;;  %v1008_v4 = vpop.f32.mrb[34].mxu0  ;;  %v1048_v47 = vpop.f32.mrb[26].mxu1 }
 0x524   :  { %v1051_v6 = vadd.f32 %v1005_v16, %v2669_v11  ;;  %v1009_v50 = vpop.f32.mrb[35].mxu0  ;;  %v2058_v51 = vpop.f32.mrb[27].mxu1  ;;  %v2299_v4 = vld [vmem:[%s3150_s2 + $0x8] ss:$12 sps:$4 sm:$0xff]   ;;  %v2300_v47 = vld [vmem:[%s3150_s2 + $0x20] ss:$12 sps:$4 sm:$0xff]  }
 0x525   :  { %v1058_v25 = vadd.f32 %v1007_v52, %v2674_v18  ;;  %v2303_v50 = vld [vmem:[%s3150_s2 + $0x4c] ss:$12 sps:$4 sm:$0xff]   ;;  %v2304_v51 = vld [vmem:[%s3150_s2 + $0x48] ss:$12 sps:$4 sm:$0xff]  }
 0x526   :  { %v1800_v56 = vmul.f32 -1.442695, %v1051_v6  ;;  %v2301_v6 = vld [vmem:[%s3150_s2 + $0x30] ss:$12 sps:$4 sm:$0xff]  }
 0x527   :  { %v1801_v10 = vmul.f32 -1.442695, %v1058_v25  ;;  %v2305_v25 = vld [vmem:[%s3150_s2 + $0x50] ss:$12 sps:$4 sm:$0xff]  }
 0x528   :  { %2254 = vpow2.f32 %v1800_v56  ;;  %v2306_v56 = vld [vmem:[%s3150_s2 + $0x64] ss:$12 sps:$4 sm:$0xff]  }
 0x529   :  { %2256 = vpow2.f32 %v1801_v10  ;;  %v2307_v10 = vld [vmem:[%s3150_s2 + $0x60] ss:$12 sps:$4 sm:$0xff]  }
 0x532   :  { %v2255_v46 = vpop.eup %2254 }
 0x533   :  { %v1055_v61 = vadd.f32 1.0, %v2255_v46  ;;  %v2257_v3 = vpop.eup %2256  ;;  %v2308_v46 = vld [vmem:[%s3150_s2 + $0x68] ss:$12 sps:$4 sm:$0xff]  }
 0x534   :  { %v1062_v9 = vadd.f32 1.0, %v2257_v3  ;;  %v2310_v3 = vld [vmem:[%s3150_s2 + $0x78] ss:$12 sps:$4 sm:$0xff]  }
 0x535   :  { %2258 = vrcp.f32 %v1055_v61  ;;  %v2309_v61 = vld [vmem:[%s3150_s2 + $0x7c] ss:$12 sps:$4 sm:$0xff]  }
 0x536   :  { %2260 = vrcp.f32 %v1062_v9  ;;  %v2311_v9 = vld [vmem:[%s3150_s2 + $0x80] ss:$12 sps:$4 sm:$0xff]  }
 0x53f   :  { %v2259_v33 = vpop.eup %2258 }
 0x540   :  { %v1065_v40 = vmul.f32 %v2259_v33, %v1046_v7  ;;  %v2261_v0 = vpop.eup %2260  ;;  %v2312_v7 = vld [vmem:[%s3150_s2 + $0x94] ss:$12 sps:$4 sm:$0xff]   ;;  %v2313_v33 = vld [vmem:[%s3150_s2 + $0x90] ss:$12 sps:$4 sm:$0xff]  }
 0x541   :  { %v1068_v44 = vsub.f32 1.0, %v2261_v0  ;;  %v1070_v19 = vmul.f32 %v2261_v0, %v2853_v15  ;;  %v3178_v15 = vld [vmem:[#allocation9_spill] sm:$0xff] }
 0x542   :  { %v1066_v11 = vadd.f32 %v1065_v40, %v2684_v54  ;;  %v2913_v54 = vld [vmem:[%s3150_s2 + $0x1c] ss:$12 sps:$4 sm:$0xff]   ;;  %v2314_v40 = vld [vmem:[%s3150_s2 + $0x98] ss:$12 sps:$4 sm:$0xff]  }
 0x543   :  { %v2316_v0 = vld [vmem:[%s3150_s2 + $0xa8] ss:$12 sps:$4 sm:$0xff]  }
 0x544   :  { %2262 = vtanh.f32 %v1066_v11  ;;  %v2315_v11 = vld [vmem:[%s3150_s2 + $0xac] ss:$12 sps:$4 sm:$0xff]  }
 0x54e   :  { %v2263_v18 = vpop.eup %2262 }
 0x54f   :  { %v1069_v53 = vmul.f32 %v2263_v18, %v1068_v44  ;;  %v2317_v44 = vld [vmem:[%s3150_s2 + $0xb0] ss:$12 sps:$4 sm:$0xff]  }
 0x551   :  { %v2899_v12 = vadd.f32 %v1070_v19, %v1069_v53 }
 0x553   :  { %v1078_v55 = vpack.c.bf16 %v2899_v12, %v2899_v12 }
 0x555   :  { %1112 = vmatmul.mubr.bf16.vlgmr.msra.gmra.mrb[36].mxu0 %v1078_v55  ;;  %2076 = vmatmul.mubr.bf16.vlgmr.msra.gmra.mrb[28].mxu1 %v1078_v55 }
 0x556   :  { %1189 = vmatpush1.bf16.msra.mxu0 %v2906_v58  ;;  %2080 = vmatpush3.bf16.msra.mxu1 %v2490_v24  ;;  %v2930_v24 = vld [vmem:[%s3150_s2 + $0x34] ss:$12 sps:$4 sm:$0xff]  }
 0x557   :  { %1190 = vmatprep.subr.bf16.mxu0 %v2913_v54  ;;  %2081 = vmatprep.subr.bf16.mxu1 %v3175_v62 }
 0x558   :  { %1220 = vmatprep.mubr.bf16.mxu0 %v3176_v5  ;;  %2095 = vmatprep.mubr.msk.bf16.mxu1 %vm2320_vm1, %v3175_v62 }
 0x55a   :  { %1191 = vmatpush1.bf16.msra.mxu0 %v2923_v63  ;;  %2082 = vmatpush3.bf16.msra.mxu1 %v2513_v29 }
 0x55b   :  { %1192 = vmatprep.subr.bf16.mxu0 %v2930_v24  ;;  %2083 = vmatprep.subr.bf16.mxu1 %v3175_v62 }
 0x55e   :  { %1193 = vmatpush1.bf16.msra.mxu0 %v2465_v20  ;;  %2084 = vmatpush3.bf16.msra.mxu1 %v2535_v32  ;;  %v2298_v20 = vld [vmem:[%s3150_s2 + $0x4] ss:$12 sps:$4 sm:$0xff]  }
 0x55f   :  { %1194 = vmatprep.subr.bf16.mxu0 %v2471_v21  ;;  %2085 = vmatprep.subr.bf16.mxu1 %v3175_v62 }
 0x562   :  { %1195 = vmatpush1.bf16.msra.mxu0 %v2477_v22  ;;  %2086 = vmatpush3.bf16.msra.mxu1 %v2558_v36  ;;  %v3177_v36 = vld [vmem:[#allocation5_spill] sm:$0xff] }
 0x563   :  { %1196 = vmatprep.subr.bf16.mxu0 %v2484_v23  ;;  %2087 = vmatprep.subr.bf16.mxu1 %v3175_v62 }
 0x566   :  { %1197 = vmatpush1.bf16.msra.mxu0 %v2500_v27  ;;  %2088 = vmatpush3.bf16.msra.mxu1 %v2576_v38 }
 0x567   :  { %1198 = vmatprep.subr.bf16.mxu0 %v2507_v28  ;;  %2089 = vmatprep.subr.bf16.mxu1 %v3175_v62 }
 0x56a   :  { %1199 = vmatpush1.bf16.msra.mxu0 %v2522_v30  ;;  %2090 = vmatpush3.bf16.msra.mxu1 %v2584_v39 }
 0x56b   :  { %1200 = vmatprep.subr.bf16.mxu0 %v2529_v31  ;;  %2091 = vmatprep.subr.bf16.mxu1 %v3175_v62 }
 0x56e   :  { %1201 = vmatpush1.bf16.msra.mxu0 %v2545_v34  ;;  %2092 = vmatpush3.bf16.msra.mxu1 %v2594_v41 }
 0x56f   :  { %1202 = vmatprep.subr.bf16.mxu0 %v2552_v35  ;;  %2093 = vmatprep.subr.bf16.mxu1 %v3175_v62 }
 0x572   :  { %1203 = vmatpush1.bf16.msra.mxu0 %v2568_v37  ;;  %2094 = vmatpush3.bf16.msra.mxu1 %v2603_v42 }
 0x573   :  { %1297 = vmatprep.subr.bf16.mxu0 %v2298_v20  ;;  %2099 = vmatprep.subr.bf16.mxu1 %v3175_v62 }
 0x628   :  { %v1113_v21 = vpop.f32.mrb[36].mxu0  ;;  %v1154_v22 = vpop.f32.mrb[28].mxu1 }
 0x629   :  { %v1114_v23 = vadd.f32 %v1113_v21, %v2703_v57  ;;  %v1115_v27 = vpop.f32.mrb[37].mxu0  ;;  %v2077_v28 = vpop.f32.mrb[29].mxu1  ;;  %v1155_v2 = vadd.f32 %v1154_v22, %v2711_v49 }
 0x62a   :  { %v1116_v29 = vadd.f32 %v1115_v27, %v2705_v59  ;;  %v1117_v30 = vpop.f32.mrb[38].mxu0  ;;  %v1157_v31 = vpop.f32.mrb[30].mxu1 }
 0x62b   :  { %v1160_v32 = vadd.f32 %v1114_v23, %v2676_v26  ;;  %v1118_v34 = vpop.f32.mrb[39].mxu0  ;;  %v2078_v35 = vpop.f32.mrb[31].mxu1  ;;  %v3180_v23 = vld [vmem:[#allocation10_spill] sm:$0xff] }
 0x62c   :  { %v1167_v37 = vadd.f32 %v1116_v29, %v3177_v36 }
 0x62d   :  { %v1802_v38 = vmul.f32 -1.442695, %v1160_v32 }
 0x62e   :  { %v1803_v39 = vmul.f32 -1.442695, %v1167_v37 }
 0x62f   :  { %2264 = vpow2.f32 %v1802_v38  ;;  %v3181_v38 = vld [vmem:[#allocation6_spill] sm:$0xff] }
 0x630   :  { %2266 = vpow2.f32 %v1803_v39 }
 0x639   :  { %v2265_v41 = vpop.eup %2264 }
 0x63a   :  { %v1164_v42 = vadd.f32 1.0, %v2265_v41  ;;  %v2267_v43 = vpop.eup %2266 }
 0x63b   :  { %v1171_v45 = vadd.f32 1.0, %v2267_v43 }
 0x63c   :  { %2268 = vrcp.f32 %v1164_v42 }
 0x63d   :  { %2270 = vrcp.f32 %v1171_v45 }
 0x646   :  { %v2269_v60 = vpop.eup %2268 }
 0x647   :  { %v1174_v48 = vmul.f32 %v2269_v60, %v1155_v2  ;;  %v2271_v1 = vpop.eup %2270 }
 0x648   :  { %v1177_v13 = vsub.f32 1.0, %v2271_v1  ;;  %v1179_v17 = vmul.f32 %v2271_v1, %v2899_v12  ;;  %v2195_v1 = vld [vmem:[%s3153_s6 + $0x48] sm:$0xff]  }
 0x649   :  { %v1175_v26 = vadd.f32 %v1174_v48, %v3178_v15  ;;  %v2193_v15 = vld [vmem:[%s3153_s6 + $0x40] sm:$0xff]  }
 0x64b   :  { %2272 = vtanh.f32 %v1175_v26  ;;  %v2194_v26 = vld [vmem:[%s3153_s6] sm:$0xff]  }
 0x655   :  { %v2273_v14 = vpop.eup %2272 }
 0x656   :  { %v1178_v16 = vmul.f32 %v2273_v14, %v1177_v13  ;;  %v2196_v13 = vld [vmem:[%s3153_s6 + $0x8] sm:$0xff]   ;;  %v2197_v14 = vld [vmem:[%s3153_s6 + $0x50] sm:$0xff]  }
 0x658   :  { %v2967_v8 = vadd.f32 %v1179_v17, %v1178_v16  ;;  %v2198_v16 = vld [vmem:[%s3153_s6 + $0x10] sm:$0xff]   ;;  %v2199_v17 = vld [vmem:[%s3153_s6 + $0x58] sm:$0xff]  }
 0x65a   :  { %v1187_v52 = vpack.c.bf16 %v2967_v8, %v2967_v8 }
 0x65c   :  { %1221 = vmatmul.mubr.bf16.vlgmr.msra.gmra.mrb[40].mxu0 %v1187_v52  ;;  %2096 = vmatmul.mubr.bf16.vlgmr.msra.gmra.mrb[32].mxu1 %v1187_v52  ;;  %v2201_v52 = vld [vmem:[%s3153_s6 + $0x60] sm:$0xff]  }
 0x65d   :  { %1298 = vmatpush1.bf16.msra.mxu0 %v2906_v58  ;;  %2100 = vmatpush3.bf16.msra.mxu1 %v2299_v4  ;;  %v2202_v4 = vld [vmem:[%s3153_s6 + $0x20] sm:$0xff]  }
 0x65e   :  { %1299 = vmatprep.subr.bf16.mxu0 %v2913_v54  ;;  %2101 = vmatprep.subr.bf16.mxu1 %v3175_v62 }
 0x65f   :  { %1329 = vmatprep.mubr.bf16.mxu0 %v3176_v5  ;;  %2115 = vmatprep.mubr.msk.bf16.mxu1 %vm2320_vm1, %v3175_v62  ;;  %v2302_v5 = vld [vmem:[%s3150_s2 + $0x38] ss:$12 sps:$4 sm:$0xff]  }
 0x661   :  { %1300 = vmatpush1.bf16.msra.mxu0 %v2923_v63  ;;  %2102 = vmatpush3.bf16.msra.mxu1 %v2300_v47  ;;  %v2203_v47 = vld [vmem:[%s3153_s6 + $0x68] sm:$0xff]  }
 0x662   :  { %1301 = vmatprep.subr.bf16.mxu0 %v2930_v24  ;;  %2103 = vmatprep.subr.bf16.mxu1 %v3175_v62  ;;  %v3179_v24 = vld [vmem:[#allocation8_spill] sm:$0xff] }
 0x665   :  { %1302 = vmatpush1.bf16.msra.mxu0 %v2301_v6  ;;  %2104 = vmatpush3.bf16.msra.mxu1 %v2302_v5  ;;  %v2204_v6 = vld [vmem:[%s3153_s6 + $0x28] sm:$0xff]   ;;  %v2205_v5 = vld [vmem:[%s3153_s6 + $0x70] sm:$0xff]  }
 0x666   :  { %1303 = vmatprep.subr.bf16.mxu0 %v2303_v50  ;;  %2105 = vmatprep.subr.bf16.mxu1 %v3175_v62  ;;  %v2206_v50 = vld [vmem:[%s3153_s6 + $0x30] sm:$0xff]  }
 0x669   :  { %1304 = vmatpush1.bf16.msra.mxu0 %v2304_v51  ;;  %2106 = vmatpush3.bf16.msra.mxu1 %v2305_v25  ;;  %v2207_v51 = vld [vmem:[%s3153_s6 + $0x78] sm:$0xff]  }
 0x66a   :  { %1305 = vmatprep.subr.bf16.mxu0 %v2306_v56  ;;  %2107 = vmatprep.subr.bf16.mxu1 %v3175_v62  ;;  %v2208_v25 = vld [vmem:[%s3153_s6 + $0x38] sm:$0xff]   ;;  %v2209_v56 = vld [vmem:[%s3154_s8] sm:$0xff]  }
 0x66d   :  { %1306 = vmatpush1.bf16.msra.mxu0 %v2307_v10  ;;  %2108 = vmatpush3.bf16.msra.mxu1 %v2308_v46 }
 0x66e   :  { %1307 = vmatprep.subr.bf16.mxu0 %v2309_v61  ;;  %2109 = vmatprep.subr.bf16.mxu1 %v3175_v62 }
 0x671   :  { %1308 = vmatpush1.bf16.msra.mxu0 %v2310_v3  ;;  %2110 = vmatpush3.bf16.msra.mxu1 %v2311_v9 }
 0x672   :  { %1309 = vmatprep.subr.bf16.mxu0 %v2312_v7  ;;  %2111 = vmatprep.subr.bf16.mxu1 %v3175_v62 }
 0x675   :  { %1310 = vmatpush1.bf16.msra.mxu0 %v2313_v33  ;;  %2112 = vmatpush3.bf16.msra.mxu1 %v2314_v40 }
 0x676   :  { %1311 = vmatprep.subr.bf16.mxu0 %v2315_v11  ;;  %2113 = vmatprep.subr.bf16.mxu1 %v3175_v62  ;;  %v3182_v11 = vld [vmem:[#allocation11_spill] sm:$0xff] }
 0x679   :  { %1312 = vmatpush1.bf16.msra.mxu0 %v2316_v0  ;;  %2114 = vmatpush3.bf16.msra.mxu1 %v2317_v44 }
 0x67a   :  { %2119 = vmatprep.subr.bf16.mxu1 %v3175_v62  ;;  %1914 = vmatprep.subr.bf16.mxu0 %v2193_v15 }
 0x72f   :  { %v1222_v18 = vpop.f32.mrb[40].mxu0  ;;  %v1263_v53 = vpop.f32.mrb[32].mxu1 }
 0x730   :  { %v1223_v19 = vadd.f32 %v1222_v18, %v2703_v57  ;;  %v1224_v12 = vpop.f32.mrb[41].mxu0  ;;  %v2097_v55 = vpop.f32.mrb[33].mxu1  ;;  %v1264_v35 = vadd.f32 %v1263_v53, %v2711_v49  ;;  %v3183_v53 = vld [vmem:[#allocation12_spill] sm:$0xff] }
 0x731   :  { %v1225_v58 = vadd.f32 %v1224_v12, %v2705_v59  ;;  %v1226_v54 = vpop.f32.mrb[42].mxu0  ;;  %v1266_v63 = vpop.f32.mrb[34].mxu1 }
 0x732   :  { %v1269_v20 = vadd.f32 %v1223_v19, %v3179_v24  ;;  %v1227_v21 = vpop.f32.mrb[43].mxu0  ;;  %v2098_v22 = vpop.f32.mrb[35].mxu1 }
 0x733   :  { %v1276_v27 = vadd.f32 %v1225_v58, %v3180_v23  ;;  %v3184_v21 = vld [vmem:[#allocation7_spill] sm:$0xff] }
 0x734   :  { %v1804_v28 = vmul.f32 -1.442695, %v1269_v20 }
 0x735   :  { %v1805_v29 = vmul.f32 -1.442695, %v1276_v27 }
 0x736   :  { %2274 = vpow2.f32 %v1804_v28 }
 0x737   :  { %2276 = vpow2.f32 %v1805_v29 }
 0x740   :  { %v2275_v30 = vpop.eup %2274 }
 0x741   :  { %v1273_v31 = vadd.f32 1.0, %v2275_v30  ;;  %v2277_v32 = vpop.eup %2276 }
 0x742   :  { %v1280_v34 = vadd.f32 1.0, %v2277_v32 }
 0x743   :  { %2278 = vrcp.f32 %v1273_v31  ;;  %v1403_v31 = vld [vmem:[%s3155_s5] sm:$0xff] }
 0x744   :  { %2280 = vrcp.f32 %v1280_v34  ;;  %v1405_v34 = vpack.c.bf16 %v1403_v31, %v1403_v31 }
 0x74d   :  { %v2279_v36 = vpop.eup %2278 }
 0x74e   :  { %v1283_v37 = vmul.f32 %v2279_v36, %v1264_v35  ;;  %v2281_v41 = vpop.eup %2280  ;;  %v2211_v36 = vld [vmem:[%s3154_s8 + $0x10] sm:$0xff]  }
 0x74f   :  { %v1286_v42 = vsub.f32 1.0, %v2281_v41  ;;  %v1288_v2 = vmul.f32 %v2281_v41, %v2967_v8  ;;  %v2200_v8 = vld [vmem:[%s3153_s6 + $0x18] sm:$0xff]  }
 0x750   :  { %v1284_v39 = vadd.f32 %v1283_v37, %v3181_v38  ;;  %v2212_v37 = vld [vmem:[%s3154_s8 + $0x18] sm:$0xff]  }
 0x752   :  { %2282 = vtanh.f32 %v1284_v39  ;;  %v1808_v39 = vld [vmem:[%s3156_s7] ss:$0 sm:$0xff] }
 0x75c   :  { %v2283_v43 = vpop.eup %2282 }
 0x75d   :  { %v1287_v45 = vmul.f32 %v2283_v43, %v1286_v42 }
 0x75f   :  { %v3050_v60 = vadd.f32 %v1288_v2, %v1287_v45 }
 0x761   :  { %v1296_v48 = vpack.c.bf16 %v3050_v60, %v3050_v60 }
 0x763   :  { %1330 = vmatmul.mubr.bf16.vlgmr.msra.gmra.mrb[44].mxu0 %v1296_v48  ;;  %2116 = vmatmul.mubr.bf16.vlgmr.msra.gmra.mrb[36].mxu1 %v1296_v48 }
 0x764   :  { %2127 = vmatprep.mubr.msk.bf16.mxu1 %vm2320_vm1, %v3175_v62  ;;  %1915 = vmatpush3.bf16.msra.mxu0 %v2194_v26  ;;  %v2213_v26 = vld [vmem:[%s3157_s10] sm:$0xff]  }
 0x765   :  { %1916 = vmatprep.subr.bf16.mxu0 %v2195_v1  ;;  %2120 = vmatpush3.bf16.msra.mxu1 %v2209_v56  ;;  %v17_v1 = vstv %s3158_s11 }
 0x766   :  { %2121 = vmatprep.subr.bf16.mxu1 %v3175_v62  ;;  %18 = vst [vmem:[#allocation4] sm:$0x1] %v17_v1 }
 0x768   :  { %1917 = vmatpush3.bf16.msra.mxu0 %v2196_v13  ;;  %v1825_v13 = vld [vmem:[%s3159_s9] ss:$0 sm:$0xff] }
 0x769   :  { %1918 = vmatprep.subr.bf16.mxu0 %v2197_v14 }
 0x76c   :  { %1919 = vmatpush3.bf16.msra.mxu0 %v2198_v16 }
 0x76d   :  { %1920 = vmatprep.subr.bf16.mxu0 %v2199_v17 }
 0x770   :  { %1921 = vmatpush3.bf16.msra.mxu0 %v2200_v8 }
 0x771   :  { %1922 = vmatprep.subr.bf16.mxu0 %v2201_v52 }
 0x774   :  { %1923 = vmatpush3.bf16.msra.mxu0 %v2202_v4 }
 0x775   :  { %1924 = vmatprep.subr.bf16.mxu0 %v2203_v47 }
 0x778   :  { %1925 = vmatpush3.bf16.msra.mxu0 %v2204_v6  ;;  %v1831_v6 = vld [vmem:[#allocation4] ss:$0 sm:$0xff] }
 0x779   :  { %1926 = vmatprep.subr.bf16.mxu0 %v2205_v5 }
 0x77c   :  { %1927 = vmatpush3.bf16.msra.mxu0 %v2206_v50 }
 0x77d   :  { %1928 = vmatprep.subr.bf16.mxu0 %v2207_v51 }
 0x780   :  { %1929 = vmatpush3.bf16.msra.mxu0 %v2208_v25 }
 0x836   :  { %v1331_v10 = vpop.f32.mrb[44].mxu0  ;;  %v1372_v46 = vpop.f32.mrb[36].mxu1 }
 0x837   :  { %v1332_v61 = vadd.f32 %v1331_v10, %v2703_v57  ;;  %v1333_v3 = vpop.f32.mrb[45].mxu0  ;;  %v2117_v9 = vpop.f32.mrb[37].mxu1  ;;  %v1373_v24 = vadd.f32 %v1372_v46, %v2711_v49  ;;  %v2210_v49 = vld [vmem:[%s3154_s8 + $0x8] sm:$0xff]  }
 0x838   :  { %v1334_v7 = vadd.f32 %v1333_v3, %v2705_v59  ;;  %v1335_v33 = vpop.f32.mrb[46].mxu0  ;;  %v1375_v40 = vpop.f32.mrb[38].mxu1  ;;  %2122 = vmatpush3.bf16.msra.mxu1 %v2210_v49 }
 0x839   :  { %v1378_v0 = vadd.f32 %v1332_v61, %v3182_v11  ;;  %v1336_v44 = vpop.f32.mrb[47].mxu0  ;;  %v2118_v18 = vpop.f32.mrb[39].mxu1  ;;  %2123 = vmatprep.subr.bf16.mxu1 %v3175_v62 }
 0x83a   :  { %v1385_v19 = vadd.f32 %v1334_v7, %v3183_v53 }
 0x83b   :  { %v1806_v12 = vmul.f32 -1.442695, %v1378_v0 }
 0x83c   :  { %v1807_v55 = vmul.f32 -1.442695, %v1385_v19  ;;  %2124 = vmatpush3.bf16.msra.mxu1 %v2211_v36 }
 0x83d   :  { %2284 = vpow2.f32 %v1806_v12  ;;  %2125 = vmatprep.subr.bf16.mxu1 %v3175_v62 }
 0x83e   :  { %2286 = vpow2.f32 %v1807_v55 }
 0x840   :  { %2126 = vmatpush3.bf16.msra.mxu1 %v2212_v37 }
 0x841   :  { %2131 = vmatprep.subr.bf16.mxu1 %v3175_v62 }
 0x847   :  { %v2285_v58 = vpop.eup %2284 }
 0x848   :  { %v1382_v54 = vadd.f32 1.0, %v2285_v58  ;;  %v2287_v57 = vpop.eup %2286 }
 0x849   :  { %v1389_v63 = vadd.f32 1.0, %v2287_v57 }
 0x84a   :  { %2288 = vrcp.f32 %v1382_v54 }
 0x84b   :  { %2290 = vrcp.f32 %v1389_v63 }
 0x854   :  { %v2289_v59 = vpop.eup %2288 }
 0x855   :  { %v1392_v20 = vmul.f32 %v2289_v59, %v1373_v24  ;;  %v2291_v23 = vpop.eup %2290 }
 0x856   :  { %v1395_v27 = vsub.f32 1.0, %v2291_v23  ;;  %v1397_v30 = vmul.f32 %v2291_v23, %v3050_v60 }
 0x857   :  { %v1393_v22 = vadd.f32 %v1392_v20, %v3184_v21 }
 0x859   :  { %2292 = vtanh.f32 %v1393_v22 }
 0x863   :  { %v2293_v28 = vpop.eup %2292 }
 0x864   :  { %v1396_v29 = vmul.f32 %v2293_v28, %v1395_v27 }
 0x866   :  { %v1398_v32 = vadd.f32 %v1397_v30, %v1396_v29 }
 0x868   :  { %v1406_v35 = vpack.c.bf16 %v1398_v32, %v1398_v32 }
 0x86a   :  { %1574 = vmatprep.mubr.bf16.mxu0 %v1406_v35 }
 0x86b   :  { %1575 = vmatmul.mubr.bf16.vlgmr.msra.gmra.mrb[48].mxu0 %v1405_v34 }
 0x93e   :  { %v1930_v38 = vpop.f32.mrb[48].mxu0 }
 0x93f   :  { %v1931_v41 = vpop.f32.mrb[49].mxu0 }
 0x940   :  { %v1932_v42 = vadd.f32 %v1931_v41, %v1930_v38  ;;  %v1933_v43 = vpop.f32.mrb[50].mxu0 }
 0x941   :  { %v1934_v45 = vpop.f32.mrb[51].mxu0 }
 0x942   :  { %v1577_v2 = vadd.f32 %v1932_v42, %v1808_v39 }
 0x944   :  { %vm1582_vm2 = vcmp.ge.f32.partialorder %v1577_v2, 0.0  ;;  %v1583_v60 = vmul.f32 0.01, %v1577_v2 }
 0x946   :  { %v1584_v48 = vsel %vm1582_vm2, %v1577_v2, %v1583_v60 }
 0x947   :  { %v1585_v15 = vpack.c.bf16 %v1584_v48, %v1584_v48 }
 0x949   :  { %2128 = vmatmul.mubr.msk.bf16.vlgmr.msra.gmra.mrb[40].mxu1 %vm174_vm0, %v1585_v15 }
 0x94a   :  { %2133 = vmatprep.mubr.msk.bf16.mxu1 %vm2320_vm1, %v3175_v62  ;;  %2132 = vmatpush3.bf16.msra.mxu1 %v2213_v26 }
 0xa1c   :  { %v1662_v14 = vpop.f32.mrb[40].mxu1 }
 0xa1d   :  { %v1663_v16 = vadd.f32 %v1825_v13, %v1662_v14  ;;  %v2129_v17 = vpop.f32.mrb[41].mxu1 }
 0xa1e   :  { %v1665_v8 = vpop.f32.mrb[42].mxu1 }
 0xa1f   :  { %vm1668_vm3 = vcmp.ge.f32.partialorder %v1663_v16, 0.0  ;;  %v1669_v62 = vmul.f32 0.01, %v1663_v16  ;;  %v2130_v52 = vpop.f32.mrb[43].mxu1 }
 0xa21   :  { %v1670_v4 = vsel %vm1668_vm3, %v1663_v16, %v1669_v62 }
 0xa22   :  { %v1671_v47 = vpack.c.bf16 %v1670_v4, %v1670_v4 }
 0xa24   :  { %2134 = vmatmul.mubr.msk.bf16.vlgmr.msra.gmra.mrb[44].mxu1 %vm1687_vm4, %v1671_v47 }
 0xaf7   :  { %v1725_v5 = vpop.f32.mrb[44].mxu1 }
 0xaf8   :  { %v1726_v50 = vadd.f32 %v1831_v6, %v1725_v5  ;;  %v2135_v51 = vpop.f32.mrb[45].mxu1 }
 0xaf9   :  { %v1728_v25 = vpop.f32.mrb[46].mxu1 }
 0xafa   :  { %1732 = vst.msk [vmem:[%s3160_s12] sm:$0xff] %vm1731_vm5, %v1726_v50  ;;  %v2136_v56 = vpop.f32.mrb[47].mxu1 }

// kernel: gru_freeze_forward.2
= control target key start
LH: loop header
LB: loop body
LE: loop exit
PB: predicated region body
PF: predicated region fallthrough
CT: control target
= control target key end

     0   :  { %v4662_v1 = vmov 0   ;;  %vm179_vm0 = vcmask 523264   ;;  %v4664_v13 = vmov 0.0   ;;  %vm3279_vm1 = vmmov 0   ;;  %s4656_s1 = inlined_call_operand.vmem [shape: bf16[64,384], index: 1, kind: input, shape index: {}]   ;;  %s4657_s0 = inlined_call_operand.vmem [shape: bf16[128,64], index: 0, kind: input, shape index: {}]   ;;  %s4658_s2 = inlined_call_operand.vmem [shape: bf16[128,384], index: 2, kind: input, shape index: {}]   ;;  %s4659_s3 = inlined_call_operand.vmem [shape: f32[1,384], index: 3, kind: input, shape index: {}]   ;;  %s4660_s4 = inlined_call_operand.vmem [shape: f32[1,384], index: 4, kind: input, shape index: {}]   ;;  %s4661_s5 = inlined_call_operand.vmem [shape: f32[8,128], index: 5, kind: output, shape index: {}]  }
   0x1   :  { %v3013_v0 = vld [vmem:[%s4656_s1 + $0x4] ss:$12 sps:$4 sm:$0xff]   ;;  %296 = vmatprep.mubr.bf16.mxu1 %v4662_v1  ;;  %236 = vmatprep.mubr.bf16.mxu0 %v4662_v1  ;;  %v3015_v2 = vld [vmem:[%s4656_s1] ss:$12 sps:$4 sm:$0xff]   ;;  %v3016_v3 = vld [vmem:[%s4656_s1 + $0x1c] ss:$12 sps:$4 sm:$0xff]   ;;  %v60_v47 = vlaneseq }
   0x2   :  { %3001 = vmatprep.subr.bf16.mxu1 %v3013_v0  ;;  %204 = vmatprep.subr.bf16.mxu0 %v3013_v0  ;;  %v3018_v4 = vld [vmem:[%s4656_s1 + $0x18] ss:$12 sps:$4 sm:$0xff]   ;;  %v3019_v5 = vld [vmem:[%s4656_s1 + $0x34] ss:$12 sps:$4 sm:$0xff]   ;;  %v3021_v6 = vld [vmem:[%s4656_s1 + $0x30] ss:$12 sps:$4 sm:$0xff]  }
   0x3   :  { %3005 = vmatpush1.bf16.msra.mxu1 %v3015_v2  ;;  %205 = vmatpush1.bf16.msra.mxu0 %v3015_v2  ;;  %v3022_v7 = vld [vmem:[%s4656_s1 + $0x4c] ss:$12 sps:$4 sm:$0xff]   ;;  %v3024_v8 = vld [vmem:[%s4656_s1 + $0x48] ss:$12 sps:$4 sm:$0xff]   ;;  %v3031_v12 = vld [vmem:[%s4657_s0] sm:$0xff]   ;;  %v3280_v46 = vmov 0.0|0.0  }
   0x4   :  { %3002 = vmatprep.subr.bf16.mxu1 %v3016_v3  ;;  %206 = vmatprep.subr.bf16.mxu0 %v3016_v3  ;;  %v3026_v9 = vld [vmem:[%s4656_s1 + $0x8] ss:$12 sps:$4 sm:$0xff]   ;;  %v3027_v11 = vld [vmem:[%s4656_s1 + $0x20] ss:$12 sps:$4 sm:$0xff]   ;;  %v3029_v14 = vld [vmem:[%s4656_s1 + $0x38] ss:$12 sps:$4 sm:$0xff]  }
   0x5   :  { %v3343_v10 = vld [vmem:[%s4657_s0 + $0x30] sm:$0xff]   ;;  %v3368_v16 = vld [vmem:[%s4657_s0 + $0x38] sm:$0xff]   ;;  %v3032_v18 = vld [vmem:[%s4657_s0 + $0x8] sm:$0xff]   ;;  %v3595_v48 = vshrl.u32 %v60_v47, 7 }
   0x6   :  { %v3363_v15 = vld [vmem:[%s4658_s2 + $0x8] ss:$12 sps:$4 sm:$0xff]   ;;  %v3030_v17 = vld [vmem:[%s4656_s1 + $0x50] ss:$12 sps:$4 sm:$0xff]   ;;  %v3381_v19 = vld [vmem:[%s4658_s2 + $0x20] ss:$12 sps:$4 sm:$0xff]  }
   0x7   :  { %3006 = vmatpush1.bf16.msra.mxu1 %v3018_v4  ;;  %207 = vmatpush1.bf16.msra.mxu0 %v3018_v4  ;;  %v3390_v20 = vld [vmem:[%s4658_s2 + $0x4] ss:$12 sps:$4 sm:$0xff]   ;;  %v3403_v22 = vld [vmem:[%s4658_s2] ss:$12 sps:$4 sm:$0xff]   ;;  %v3408_v23 = vld [vmem:[%s4658_s2 + $0x1c] ss:$12 sps:$4 sm:$0xff]  }
   0x8   :  { %3003 = vmatprep.subr.bf16.mxu1 %v3019_v5  ;;  %208 = vmatprep.subr.bf16.mxu0 %v3019_v5  ;;  %v3398_v21 = vld [vmem:[%s4658_s2 + $0x38] ss:$12 sps:$4 sm:$0xff]   ;;  %v3039_v24 = vld [vmem:[%s4657_s0 + $0x10] sm:$0xff]   ;;  %v3467_v33 = vld [vmem:[%s4658_s2 + $0x80] ss:$12 sps:$4 sm:$0xff]   ;;  %v4668_v49 = vsub.s32 0, %v3595_v48 }
   0x9   :  { %v3418_v25 = vld [vmem:[%s4658_s2 + $0x50] ss:$12 sps:$4 sm:$0xff]   ;;  %v3427_v26 = vld [vmem:[%s4658_s2 + $0x18] ss:$12 sps:$4 sm:$0xff]   ;;  %v3434_v27 = vld [vmem:[%s4658_s2 + $0x34] ss:$12 sps:$4 sm:$0xff]  }
   0xa   :  { %v3440_v28 = vld [vmem:[%s4658_s2 + $0x68] ss:$12 sps:$4 sm:$0xff]   ;;  %v3040_v29 = vld [vmem:[%s4657_s0 + $0x18] sm:$0xff]   ;;  %v3048_v31 = vld [vmem:[%s4657_s0 + $0x20] sm:$0xff]   ;;  %v4667_v51 = vsub.s32 1, %v3595_v48 }
   0xb   :  { %3007 = vmatpush1.bf16.msra.mxu1 %v3021_v6  ;;  %209 = vmatpush1.bf16.msra.mxu0 %v3021_v6  ;;  %v3451_v30 = vld [vmem:[%s4658_s2 + $0x30] ss:$12 sps:$4 sm:$0xff]   ;;  %v3460_v32 = vld [vmem:[%s4658_s2 + $0x4c] ss:$12 sps:$4 sm:$0xff]   ;;  %v3475_v34 = vld [vmem:[%s4658_s2 + $0x48] ss:$12 sps:$4 sm:$0xff]  }
   0xc   :  { %3004 = vmatprep.subr.bf16.mxu1 %v3022_v7  ;;  %210 = vmatprep.subr.bf16.mxu0 %v3022_v7  ;;  %v3482_v35 = vld [vmem:[%s4658_s2 + $0x64] ss:$12 sps:$4 sm:$0xff]   ;;  %v3049_v37 = vld [vmem:[%s4657_s0 + $0x28] sm:$0xff]   ;;  %v3527_v42 = vld [vmem:[%s4658_s2 + $0x94] ss:$12 sps:$4 sm:$0xff]  }
   0xd   :  { %v3489_v36 = vld [vmem:[%s4658_s2 + $0x98] ss:$12 sps:$4 sm:$0xff]   ;;  %v3499_v38 = vld [vmem:[%s4658_s2 + $0x60] ss:$12 sps:$4 sm:$0xff]   ;;  %v3505_v39 = vld [vmem:[%s4658_s2 + $0x7c] ss:$12 sps:$4 sm:$0xff]  }
   0xe   :  { %v3513_v40 = vld [vmem:[%s4658_s2 + $0xb0] ss:$12 sps:$4 sm:$0xff]   ;;  %v3519_v41 = vld [vmem:[%s4658_s2 + $0x78] ss:$12 sps:$4 sm:$0xff]   ;;  %v3552_v45 = vld [vmem:[%s4658_s2 + $0xa8] ss:$12 sps:$4 sm:$0xff]  }
   0xf   :  { %3008 = vmatpush1.bf16.msra.mxu1 %v3024_v8  ;;  %211 = vmatpush1.bf16.msra.mxu0 %v3024_v8  ;;  %v3536_v43 = vld [vmem:[%s4658_s2 + $0x90] ss:$12 sps:$4 sm:$0xff]   ;;  %v3543_v44 = vld [vmem:[%s4658_s2 + $0xac] ss:$12 sps:$4 sm:$0xff]   ;;  %v58_v50 = vld [vmem:[%s4659_s3] sm:$0x7] }
  0x10   :  { %2657 = vmatprep.subr.bf16.mxu1 %v3026_v9  ;;  %2681 = vmatprep.subr.bf16.mxu0 %v4664_v13  ;;  %v3604_v52 = vrot.slane %v58_v50, %v4668_v49  ;;  %v3608_v53 = vrot.slane %v58_v50, %v4667_v51 }
  0x12   :  { %2435 = vmatmul.mubr.msk.bf16.vlgmr.msra.gmra.mrb[0].mxu1 %vm179_vm0, %v3343_v10  ;;  %2429 = vmatmul.mubr.msk.bf16.vlgmr.msra.gmra.mrb[0].mxu0 %vm179_vm0, %v3031_v12 }
  0x13   :  { %2658 = vmatpush3.bf16.msra.mxu1 %v3026_v9  ;;  %306 = vmatprep.mubr.bf16.mxu1 %v4662_v1  ;;  %v4666_v9 = vsub.s32 2, %v3595_v48 }
  0x14   :  { %2659 = vmatprep.subr.bf16.mxu1 %v3027_v11  ;;  %246 = vmatprep.mubr.bf16.mxu0 %v4662_v1 }
  0x15   :  { %2682 = vmatpush3.bf16.msra.mxu0 %v3363_v15  ;;  %v3659_v47 = vrot.slane %v58_v50, %v4666_v9 }
  0x16   :  { %2683 = vmatprep.subr.bf16.mxu0 %v4664_v13 }
  0x17   :  { %2660 = vmatpush3.bf16.msra.mxu1 %v3027_v11 }
  0x18   :  { %2661 = vmatprep.subr.bf16.mxu1 %v3029_v14 }
  0x19   :  { %2684 = vmatpush3.bf16.msra.mxu0 %v3381_v19 }
  0x1a   :  { %2436 = vmatmul.mubr.msk.bf16.gmra.mrb[4].mxu1 %vm179_vm0, %v3368_v16  ;;  %2430 = vmatmul.mubr.msk.bf16.gmra.mrb[4].mxu0 %vm179_vm0, %v3032_v18 }
  0x1b   :  { %2662 = vmatpush3.bf16.msra.mxu1 %v3029_v14  ;;  %2665 = vmatprep.mubr.msk.bf16.mxu1 %vm179_vm0, %v3031_v12 }
  0x1c   :  { %2663 = vmatprep.subr.bf16.mxu1 %v3030_v17  ;;  %2685 = vmatprep.subr.bf16.mxu0 %v4664_v13 }
  0x1d   :  { %256 = vmatprep.mubr.bf16.mxu0 %v4662_v1  ;;  %2686 = vmatpush3.bf16.msra.mxu0 %v3398_v21 }
  0x1e   :  { %2687 = vmatprep.subr.bf16.mxu0 %v4664_v13 }
  0x1f   :  { %2664 = vmatpush3.bf16.msra.mxu1 %v3030_v17 }
  0x20   :  { %647 = vmatprep.subr.bf16.mxu1 %v3390_v20 }
  0x21   :  { %2688 = vmatpush3.bf16.msra.mxu0 %v3418_v25 }
  0x22   :  { %2666 = vmatmul.mubr.msk.bf16.vlgmr.msra.gmra.mrb[8].mxu1 %vm179_vm0, %v3032_v18  ;;  %2431 = vmatmul.mubr.msk.bf16.gmra.mrb[8].mxu0 %vm179_vm0, %v3039_v24 }
  0x23   :  { %648 = vmatpush1.bf16.msra.mxu1 %v3403_v22  ;;  %2669 = vmatprep.mubr.msk.bf16.mxu1 %vm179_vm0, %v3039_v24 }
  0x24   :  { %649 = vmatprep.subr.bf16.mxu1 %v3408_v23  ;;  %266 = vmatprep.mubr.bf16.mxu0 %v4662_v1 }
  0x25   :  { %2689 = vmatprep.subr.bf16.mxu0 %v4664_v13 }
  0x26   :  { %2690 = vmatpush3.bf16.msra.mxu0 %v3440_v28 }
  0x27   :  { %650 = vmatpush1.bf16.msra.mxu1 %v3427_v26  ;;  %2691 = vmatprep.subr.bf16.mxu0 %v4664_v13 }
  0x28   :  { %651 = vmatprep.subr.bf16.mxu1 %v3434_v27 }
  0x2a   :  { %2670 = vmatmul.mubr.msk.bf16.gmra.mrb[12].mxu1 %vm179_vm0, %v3040_v29  ;;  %2432 = vmatmul.mubr.msk.bf16.gmra.mrb[12].mxu0 %vm179_vm0, %v3040_v29 }
  0x2b   :  { %652 = vmatpush1.bf16.msra.mxu1 %v3451_v30  ;;  %2673 = vmatprep.mubr.msk.bf16.mxu1 %vm179_vm0, %v3048_v31 }
  0x2c   :  { %653 = vmatprep.subr.bf16.mxu1 %v3460_v32  ;;  %276 = vmatprep.mubr.bf16.mxu0 %v4662_v1 }
  0x2d   :  { %2692 = vmatpush3.bf16.msra.mxu0 %v3467_v33 }
  0x2e   :  { %2693 = vmatprep.subr.bf16.mxu0 %v4664_v13 }
  0x2f   :  { %654 = vmatpush1.bf16.msra.mxu1 %v3475_v34 }
  0x30   :  { %655 = vmatprep.subr.bf16.mxu1 %v3482_v35 }
  0x31   :  { %2694 = vmatpush3.bf16.msra.mxu0 %v3489_v36 }
  0x32   :  { %2674 = vmatmul.mubr.msk.bf16.gmra.mrb[16].mxu1 %vm179_vm0, %v3049_v37  ;;  %2433 = vmatmul.mubr.msk.bf16.gmra.mrb[16].mxu0 %vm179_vm0, %v3048_v31 }
  0x33   :  { %656 = vmatpush1.bf16.msra.mxu1 %v3499_v38  ;;  %2677 = vmatprep.mubr.msk.bf16.mxu1 %vm179_vm0, %v3343_v10 }
  0x34   :  { %657 = vmatprep.subr.bf16.mxu1 %v3505_v39  ;;  %286 = vmatprep.mubr.bf16.mxu0 %v4662_v1 }
  0x35   :  { %2695 = vmatprep.subr.bf16.mxu0 %v4664_v13 }
  0x36   :  { %2696 = vmatpush3.bf16.msra.mxu0 %v3513_v40 }
  0x37   :  { %658 = vmatpush1.bf16.msra.mxu1 %v3519_v41  ;;  %2701 = vmatprep.subr.bf16.mxu0 %v4664_v13 }
  0x38   :  { %659 = vmatprep.subr.bf16.mxu1 %v3527_v42 }
  0x3a   :  { %2678 = vmatmul.mubr.msk.bf16.gmra.mrb[20].mxu1 %vm179_vm0, %v3368_v16  ;;  %2434 = vmatmul.mubr.msk.bf16.gmra.mrb[20].mxu0 %vm179_vm0, %v3049_v37 }
  0x3b   :  { %660 = vmatpush1.bf16.msra.mxu1 %v3536_v43  ;;  %679 = vmatprep.mubr.bf16.mxu1 %v4662_v1 }
  0x3c   :  { %661 = vmatprep.subr.bf16.mxu1 %v3543_v44  ;;  %2697 = vmatprep.mubr.msk.bf16.mxu0 %vm3279_vm1, %v4664_v13 }
  0x3f   :  { %662 = vmatpush1.bf16.msra.mxu1 %v3552_v45 }
  0x40   :  { %756 = vmatprep.subr.bf16.mxu1 %v3390_v20 }
  0x42   :  { %680 = vmatmul.mubr.bf16.vlgmr.msra.gmra.mrb[24].mxu1 %v3280_v46  ;;  %2698 = vmatmul.mubr.bf16.vlgmr.msra.gmra.mrb[24].mxu0 %v3280_v46 }
  0x43   :  { %757 = vmatpush1.bf16.msra.mxu1 %v3403_v22  ;;  %2702 = vmatpush3.bf16.msra.mxu0 %v3363_v15 }
  0x44   :  { %758 = vmatprep.subr.bf16.mxu1 %v3408_v23  ;;  %2703 = vmatprep.subr.bf16.mxu0 %v4664_v13 }
  0x45   :  { %788 = vmatprep.mubr.bf16.mxu1 %v4662_v1  ;;  %2717 = vmatprep.mubr.msk.bf16.mxu0 %vm3279_vm1, %v4664_v13 }
  0x47   :  { %759 = vmatpush1.bf16.msra.mxu1 %v3427_v26  ;;  %2704 = vmatpush3.bf16.msra.mxu0 %v3381_v19 }
  0x48   :  { %760 = vmatprep.subr.bf16.mxu1 %v3434_v27  ;;  %2705 = vmatprep.subr.bf16.mxu0 %v4664_v13 }
  0x4b   :  { %761 = vmatpush1.bf16.msra.mxu1 %v3451_v30  ;;  %2706 = vmatpush3.bf16.msra.mxu0 %v3398_v21 }
  0x4c   :  { %762 = vmatprep.subr.bf16.mxu1 %v3460_v32  ;;  %2707 = vmatprep.subr.bf16.mxu0 %v4664_v13 }
  0x4f   :  { %763 = vmatpush1.bf16.msra.mxu1 %v3475_v34  ;;  %2708 = vmatpush3.bf16.msra.mxu0 %v3418_v25 }
  0x50   :  { %764 = vmatprep.subr.bf16.mxu1 %v3482_v35  ;;  %2709 = vmatprep.subr.bf16.mxu0 %v4664_v13 }
  0x53   :  { %765 = vmatpush1.bf16.msra.mxu1 %v3499_v38  ;;  %2710 = vmatpush3.bf16.msra.mxu0 %v3440_v28 }
  0x54   :  { %766 = vmatprep.subr.bf16.mxu1 %v3505_v39  ;;  %2711 = vmatprep.subr.bf16.mxu0 %v4664_v13 }
  0x57   :  { %767 = vmatpush1.bf16.msra.mxu1 %v3519_v41  ;;  %2712 = vmatpush3.bf16.msra.mxu0 %v3467_v33 }
  0x58   :  { %768 = vmatprep.subr.bf16.mxu1 %v3527_v42  ;;  %2713 = vmatprep.subr.bf16.mxu0 %v4664_v13 }
  0x5b   :  { %769 = vmatpush1.bf16.msra.mxu1 %v3536_v43  ;;  %2714 = vmatpush3.bf16.msra.mxu0 %v3489_v36 }
  0x5c   :  { %770 = vmatprep.subr.bf16.mxu1 %v3543_v44  ;;  %2715 = vmatprep.subr.bf16.mxu0 %v4664_v13 }
  0x5f   :  { %771 = vmatpush1.bf16.msra.mxu1 %v3552_v45  ;;  %2716 = vmatpush3.bf16.msra.mxu0 %v3513_v40 }
  0x60   :  { %865 = vmatprep.subr.bf16.mxu1 %v3390_v20  ;;  %2721 = vmatprep.subr.bf16.mxu0 %v4664_v13 }
  0xe5   :  { %v298_v54 = vpop.f32.mrb[0].mxu1  ;;  %v3610_v55 = vpop.f32.mrb[0].mxu0 }
  0xe6   :  { %v3613_v56 = vadd.f32 %v298_v54, %v3604_v52  ;;  %v300_v57 = vpop.f32.mrb[1].mxu1  ;;  %v3615_v58 = vpop.f32.mrb[1].mxu0 }
  0xe7   :  { %v3618_v59 = vadd.f32 %v300_v57, %v3608_v53  ;;  %v302_v60 = vpop.f32.mrb[2].mxu1  ;;  %v242_v61 = vpop.f32.mrb[2].mxu0 }
  0xe8   :  { %4669 = vst [vmem:[#allocation4_spill] sm:$0xff] %v3613_v56  ;;  %v3621_v62 = vadd.f32 %v302_v60, %v3604_v52  ;;  %v304_v63 = vpop.f32.mrb[3].mxu1  ;;  %v3624_v0 = vadd.f32 %v242_v61, %v3604_v52  ;;  %v244_v2 = vpop.f32.mrb[3].mxu0 }
  0xe9   :  { %4670 = vst [vmem:[#allocation5_spill] sm:$0xff] %v3618_v59  ;;  %v3627_v3 = vadd.f32 %v304_v63, %v3608_v53  ;;  %v3630_v4 = vadd.f32 %v244_v2, %v3608_v53 }
  0xea   :  { %4671 = vst [vmem:[#allocation6_spill] sm:$0xff] %v3621_v62 }
  0xeb   :  { %4672 = vst [vmem:[#allocation7_spill] sm:$0xff] %v3627_v3 }
  0xed   :  { %v308_v5 = vpop.f32.mrb[4].mxu1  ;;  %v248_v6 = vpop.f32.mrb[4].mxu0 }
  0xee   :  { %v3633_v7 = vadd.f32 %v308_v5, %v3604_v52  ;;  %v310_v8 = vpop.f32.mrb[5].mxu1  ;;  %v3637_v10 = vadd.f32 %v248_v6, %v3604_v52  ;;  %v250_v11 = vpop.f32.mrb[5].mxu0 }
  0xef   :  { %v3640_v12 = vadd.f32 %v310_v8, %v3608_v53  ;;  %v312_v14 = vpop.f32.mrb[6].mxu1  ;;  %v3643_v16 = vadd.f32 %v250_v11, %v3608_v53  ;;  %v252_v17 = vpop.f32.mrb[6].mxu0 }
  0xf0   :  { %4673 = vst [vmem:[#allocation8_spill] sm:$0xff] %v3633_v7  ;;  %v3646_v18 = vadd.f32 %v312_v14, %v3604_v52  ;;  %v314_v24 = vpop.f32.mrb[7].mxu1  ;;  %v3649_v29 = vadd.f32 %v252_v17, %v3604_v52  ;;  %v254_v31 = vpop.f32.mrb[7].mxu0 }
  0xf1   :  { %4674 = vst [vmem:[#allocation9_spill] sm:$0xff] %v3640_v12  ;;  %v3652_v37 = vadd.f32 %v314_v24, %v3608_v53  ;;  %v3655_v46 = vadd.f32 %v254_v31, %v3608_v53 }
  0xf2   :  { %4675 = vst [vmem:[#allocation10_spill] sm:$0xff] %v3646_v18 }
  0xf3   :  { %4676 = vst [vmem:[#allocation11_spill] sm:$0xff] %v3652_v37 }
  0xf5   :  { %v2667_v54 = vpop.f32.mrb[8].mxu1  ;;  %v258_v57 = vpop.f32.mrb[8].mxu0 }
  0xf6   :  { %v3662_v60 = vadd.f32 %v2667_v54, %v3659_v47  ;;  %v3664_v61 = vpop.f32.mrb[9].mxu1  ;;  %v3667_v63 = vadd.f32 %v258_v57, %v3604_v52  ;;  %v260_v2 = vpop.f32.mrb[9].mxu0 }
  0xf7   :  { %v2668_v5 = vpop.f32.mrb[10].mxu1  ;;  %v3670_v6 = vadd.f32 %v260_v2, %v3608_v53  ;;  %v262_v8 = vpop.f32.mrb[10].mxu0 }
  0xf8   :  { %v3673_v11 = vadd.f32 %v2668_v5, %v3659_v47  ;;  %v354_v50 = vpop.f32.mrb[11].mxu1  ;;  %v3676_v14 = vadd.f32 %v262_v8, %v3604_v52  ;;  %v264_v17 = vpop.f32.mrb[11].mxu0 }
  0xf9   :  { %v3679_v24 = vadd.f32 %v354_v50, %v3659_v47  ;;  %v3682_v31 = vadd.f32 %v264_v17, %v3608_v53 }
  0xfd   :  { %v2671_v54 = vpop.f32.mrb[12].mxu1  ;;  %v268_v57 = vpop.f32.mrb[12].mxu0 }
  0xfe   :  { %v3685_v2 = vadd.f32 %v2671_v54, %v3659_v47  ;;  %v367_v1 = vpop.f32.mrb[13].mxu1  ;;  %v3688_v5 = vadd.f32 %v268_v57, %v3604_v52  ;;  %v270_v13 = vpop.f32.mrb[13].mxu0 }
  0xff   :  { %v3691_v8 = vadd.f32 %v367_v1, %v3659_v47  ;;  %v2672_v9 = vpop.f32.mrb[14].mxu1  ;;  %v3694_v50 = vadd.f32 %v270_v13, %v3608_v53  ;;  %v272_v51 = vpop.f32.mrb[14].mxu0 }
 0x100   :  { %4677 = vst [vmem:[#allocation12_spill] sm:$0xff] %v3685_v2  ;;  %4678 = vst [vmem:[#allocation13_spill] sm:$0xff] %v3688_v5  ;;  %v3697_v17 = vadd.f32 %v2672_v9, %v3659_v47  ;;  %v370_v49 = vpop.f32.mrb[15].mxu1  ;;  %v3700_v54 = vadd.f32 %v272_v51, %v3604_v52  ;;  %v274_v37 = vpop.f32.mrb[15].mxu0 }
 0x101   :  { %4679 = vst [vmem:[#allocation14_spill] sm:$0xff] %v3694_v50  ;;  %v3703_v57 = vadd.f32 %v370_v49, %v3659_v47  ;;  %v3706_v18 = vadd.f32 %v274_v37, %v3608_v53 }
 0x102   :  { %4680 = vst [vmem:[#allocation15_spill] sm:$0xff] %v3697_v17  ;;  %4681 = vst [vmem:[#allocation16_spill] sm:$0xff] %v3700_v54 }
 0x103   :  { %4682 = vst [vmem:[#allocation17_spill] sm:$0xff] %v3703_v57  ;;  %4683 = vst [vmem:[#allocation18_spill] sm:$0xff] %v3706_v18 }
 0x105   :  { %v2675_v1 = vpop.f32.mrb[16].mxu1  ;;  %v278_v12 = vpop.f32.mrb[16].mxu0 }
 0x106   :  { %v3709_v13 = vadd.f32 %v2675_v1, %v3659_v47  ;;  %v383_v7 = vpop.f32.mrb[17].mxu1  ;;  %v3712_v9 = vadd.f32 %v278_v12, %v3604_v52  ;;  %v280_v3 = vpop.f32.mrb[17].mxu0 }
 0x107   :  { %v3715_v51 = vadd.f32 %v383_v7, %v3659_v47  ;;  %v2676_v62 = vpop.f32.mrb[18].mxu1  ;;  %v3718_v49 = vadd.f32 %v280_v3, %v3608_v53  ;;  %v282_v59 = vpop.f32.mrb[18].mxu0 }
 0x108   :  { %4684 = vst [vmem:[#allocation19_spill] sm:$0xff] %v3709_v13  ;;  %4685 = vst [vmem:[#allocation20_spill] sm:$0xff] %v3712_v9  ;;  %v3721_v37 = vadd.f32 %v2676_v62, %v3659_v47  ;;  %v386_v56 = vpop.f32.mrb[19].mxu1  ;;  %v3724_v1 = vadd.f32 %v282_v59, %v3604_v52  ;;  %v284_v13 = vpop.f32.mrb[19].mxu0 }
 0x109   :  { %4686 = vst [vmem:[#allocation21_spill] sm:$0xff] %v3715_v51  ;;  %4687 = vst [vmem:[#allocation22_spill] sm:$0xff] %v3718_v49  ;;  %v3727_v12 = vadd.f32 %v386_v56, %v3659_v47  ;;  %v3730_v9 = vadd.f32 %v284_v13, %v3608_v53  ;;  %v494_v56 = vld [vmem:[%s4660_s4] sm:$0x7] }
 0x10a   :  { %4688 = vst [vmem:[#allocation23_spill] sm:$0xff] %v3721_v37  ;;  %4689 = vst [vmem:[#allocation24_spill] sm:$0xff] %v3724_v1 }
 0x10b   :  { %4690 = vst [vmem:[#allocation25_spill] sm:$0xff] %v3727_v12  ;;  %4691 = vst [vmem:[#allocation26_spill] sm:$0xff] %v3730_v9  ;;  %v4700_v9 = vsub.s32 0, %v3595_v48 }
 0x10d   :  { %v2679_v7 = vpop.f32.mrb[20].mxu1  ;;  %v288_v51 = vpop.f32.mrb[20].mxu0  ;;  %v3761_v17 = vrot.slane %v494_v56, %v4700_v9 }
 0x10e   :  { %v3733_v3 = vadd.f32 %v2679_v7, %v3659_v47  ;;  %v399_v49 = vpop.f32.mrb[21].mxu1  ;;  %v3736_v62 = vadd.f32 %v288_v51, %v3604_v52  ;;  %v290_v37 = vpop.f32.mrb[21].mxu0 }
 0x10f   :  { %v3739_v59 = vadd.f32 %v399_v49, %v3659_v47  ;;  %v2680_v1 = vpop.f32.mrb[22].mxu1  ;;  %v3745_v13 = vadd.f32 %v290_v37, %v3608_v53  ;;  %v292_v12 = vpop.f32.mrb[22].mxu0  ;;  %v4701_v37 = vsub.s32 1, %v3595_v48 }
 0x110   :  { %4692 = vst [vmem:[#allocation27_spill] sm:$0xff] %v3733_v3  ;;  %4693 = vst [vmem:[#allocation28_spill] sm:$0xff] %v3736_v62  ;;  %v3748_v7 = vadd.f32 %v2680_v1, %v3659_v47  ;;  %v402_v3 = vpop.f32.mrb[23].mxu1  ;;  %v3751_v51 = vadd.f32 %v292_v12, %v3604_v52  ;;  %v294_v62 = vpop.f32.mrb[23].mxu0  ;;  %v239_v12 = vadd.f32 %v3610_v55, %v3604_v52 }
 0x111   :  { %4694 = vst [vmem:[#allocation29_spill] sm:$0xff] %v3739_v59  ;;  %4695 = vst [vmem:[#allocation30_spill] sm:$0xff] %v3745_v13  ;;  %v3754_v49 = vadd.f32 %v402_v3, %v3659_v47  ;;  %v3757_v59 = vadd.f32 %v294_v62, %v3608_v53  ;;  %v3765_v13 = vrot.slane %v494_v56, %v4701_v37 }
 0x112   :  { %4696 = vst [vmem:[#allocation31_spill] sm:$0xff] %v3748_v7  ;;  %4697 = vst [vmem:[#allocation32_spill] sm:$0xff] %v3751_v51  ;;  %v241_v62 = vadd.f32 %v3615_v58, %v3608_v53 }
 0x113   :  { %4698 = vst [vmem:[#allocation33_spill] sm:$0xff] %v3754_v49  ;;  %4699 = vst [vmem:[#allocation34_spill] sm:$0xff] %v3757_v59 }
 0x115   :  { %v681_v1 = vpop.f32.mrb[24].mxu1  ;;  %v722_v7 = vpop.f32.mrb[24].mxu0 }
 0x116   :  { %v682_v51 = vadd.f32 %v681_v1, %v3761_v17  ;;  %v683_v3 = vpop.f32.mrb[25].mxu1  ;;  %v2699_v49 = vpop.f32.mrb[25].mxu0 }
 0x117   :  { %v684_v59 = vadd.f32 %v683_v3, %v3765_v13  ;;  %v685_v9 = vpop.f32.mrb[26].mxu1  ;;  %v725_v18 = vpop.f32.mrb[26].mxu0  ;;  %v4702_v49 = vsub.s32 2, %v3595_v48 }
 0x118   :  { %v728_v54 = vadd.f32 %v682_v51, %v239_v12  ;;  %v686_v2 = vpop.f32.mrb[27].mxu1  ;;  %v2700_v37 = vpop.f32.mrb[27].mxu0 }
 0x119   :  { %v735_v50 = vadd.f32 %v684_v59, %v241_v62  ;;  %v3775_v1 = vrot.slane %v494_v56, %v4702_v49  ;;  %v352_v2 = vadd.f32 %v3664_v61, %v3659_v47  ;;  %v4703_v47 = vmov 0.0  }
 0x11a   :  { %v2469_v5 = vmul.f32 -1.442695, %v728_v54  ;;  %v4704_v61 = vmov 0  }
 0x11b   :  { %v2470_v57 = vmul.f32 -1.442695, %v735_v50  ;;  %v723_v3 = vadd.f32 %v722_v7, %v3775_v1 }
 0x11c   :  { %3069 = vpow2.f32 %v2469_v5 }
 0x11d   :  { %3071 = vpow2.f32 %v2470_v57 }
 0x126   :  { %v3070_v52 = vpop.eup %3069 }
 0x127   :  { %v732_v55 = vadd.f32 1.0, %v3070_v52  ;;  %v3072_v53 = vpop.eup %3071 }
 0x128   :  { %v739_v58 = vadd.f32 1.0, %v3072_v53 }
 0x129   :  { %3073 = vrcp.f32 %v732_v55 }
 0x12a   :  { %3075 = vrcp.f32 %v739_v58 }
 0x133   :  { %v3074_v18 = vpop.eup %3073 }
 0x134   :  { %v742_v54 = vmul.f32 %v3074_v18, %v723_v3  ;;  %v3076_v50 = vpop.eup %3075 }
 0x135   :  { %v745_v57 = vsub.f32 1.0, %v3076_v50  ;;  %v747_v12 = vmul.f32 0.0, %v3076_v50 }
 0x136   :  { %v743_v5 = vadd.f32 %v742_v54, %v352_v2 }
 0x138   :  { %3077 = vtanh.f32 %v743_v5 }
 0x142   :  { %v3078_v59 = vpop.eup %3077 }
 0x143   :  { %v746_v51 = vmul.f32 %v3078_v59, %v745_v57 }
 0x145   :  { %v3780_v48 = vadd.f32 %v747_v12, %v746_v51 }
 0x147   :  { %v755_v56 = vpack.c.bf16 %v3780_v48, %v3780_v48 }
 0x149   :  { %789 = vmatmul.mubr.bf16.vlgmr.msra.gmra.mrb[28].mxu1 %v755_v56  ;;  %2718 = vmatmul.mubr.bf16.vlgmr.msra.gmra.mrb[28].mxu0 %v755_v56 }
 0x14a   :  { %866 = vmatpush1.bf16.msra.mxu1 %v3403_v22  ;;  %2722 = vmatpush3.bf16.msra.mxu0 %v3363_v15 }
 0x14b   :  { %867 = vmatprep.subr.bf16.mxu1 %v3408_v23  ;;  %2723 = vmatprep.subr.bf16.mxu0 %v4703_v47 }
 0x14c   :  { %897 = vmatprep.mubr.bf16.mxu1 %v4704_v61  ;;  %2737 = vmatprep.mubr.msk.bf16.mxu0 %vm3279_vm1, %v4703_v47 }
 0x14e   :  { %868 = vmatpush1.bf16.msra.mxu1 %v3427_v26  ;;  %2724 = vmatpush3.bf16.msra.mxu0 %v3381_v19 }
 0x14f   :  { %869 = vmatprep.subr.bf16.mxu1 %v3434_v27  ;;  %2725 = vmatprep.subr.bf16.mxu0 %v4703_v47 }
 0x152   :  { %870 = vmatpush1.bf16.msra.mxu1 %v3451_v30  ;;  %2726 = vmatpush3.bf16.msra.mxu0 %v3398_v21 }
 0x153   :  { %871 = vmatprep.subr.bf16.mxu1 %v3460_v32  ;;  %2727 = vmatprep.subr.bf16.mxu0 %v4703_v47 }
 0x156   :  { %872 = vmatpush1.bf16.msra.mxu1 %v3475_v34  ;;  %2728 = vmatpush3.bf16.msra.mxu0 %v3418_v25 }
 0x157   :  { %873 = vmatprep.subr.bf16.mxu1 %v3482_v35  ;;  %2729 = vmatprep.subr.bf16.mxu0 %v4703_v47 }
 0x15a   :  { %874 = vmatpush1.bf16.msra.mxu1 %v3499_v38  ;;  %2730 = vmatpush3.bf16.msra.mxu0 %v3440_v28 }
 0x15b   :  { %875 = vmatprep.subr.bf16.mxu1 %v3505_v39  ;;  %2731 = vmatprep.subr.bf16.mxu0 %v4703_v47 }
 0x15e   :  { %876 = vmatpush1.bf16.msra.mxu1 %v3519_v41  ;;  %2732 = vmatpush3.bf16.msra.mxu0 %v3467_v33 }
 0x15f   :  { %877 = vmatprep.subr.bf16.mxu1 %v3527_v42  ;;  %2733 = vmatprep.subr.bf16.mxu0 %v4703_v47 }
 0x162   :  { %878 = vmatpush1.bf16.msra.mxu1 %v3536_v43  ;;  %2734 = vmatpush3.bf16.msra.mxu0 %v3489_v36 }
 0x163   :  { %879 = vmatprep.subr.bf16.mxu1 %v3543_v44  ;;  %2735 = vmatprep.subr.bf16.mxu0 %v4703_v47 }
 0x166   :  { %880 = vmatpush1.bf16.msra.mxu1 %v3552_v45  ;;  %2736 = vmatpush3.bf16.msra.mxu0 %v3513_v40 }
 0x167   :  { %974 = vmatprep.subr.bf16.mxu1 %v3390_v20  ;;  %2741 = vmatprep.subr.bf16.mxu0 %v4703_v47 }
 0x21c   :  { %v790_v7 = vpop.f32.mrb[28].mxu1  ;;  %v831_v62 = vpop.f32.mrb[28].mxu0 }
 0x21d   :  { %v791_v9 = vadd.f32 %v790_v7, %v3761_v17  ;;  %v792_v37 = vpop.f32.mrb[29].mxu1  ;;  %v2719_v52 = vpop.f32.mrb[29].mxu0  ;;  %v832_v12 = vadd.f32 %v831_v62, %v3775_v1 }
 0x21e   :  { %v793_v55 = vadd.f32 %v792_v37, %v3765_v13  ;;  %v794_v49 = vpop.f32.mrb[30].mxu1  ;;  %v834_v53 = vpop.f32.mrb[30].mxu0 }
 0x21f   :  { %v837_v58 = vadd.f32 %v791_v9, %v3624_v0  ;;  %v795_v3 = vpop.f32.mrb[31].mxu1  ;;  %v2720_v18 = vpop.f32.mrb[31].mxu0 }
 0x220   :  { %v844_v2 = vadd.f32 %v793_v55, %v3630_v4 }
 0x221   :  { %v2471_v54 = vmul.f32 -1.442695, %v837_v58 }
 0x222   :  { %v2472_v5 = vmul.f32 -1.442695, %v844_v2 }
 0x223   :  { %3079 = vpow2.f32 %v2471_v54 }
 0x224   :  { %3081 = vpow2.f32 %v2472_v5 }
 0x22d   :  { %v3080_v50 = vpop.eup %3079 }
 0x22e   :  { %v841_v57 = vadd.f32 1.0, %v3080_v50  ;;  %v3082_v59 = vpop.eup %3081 }
 0x22f   :  { %v848_v51 = vadd.f32 1.0, %v3082_v59 }
 0x230   :  { %3083 = vrcp.f32 %v841_v57 }
 0x231   :  { %3085 = vrcp.f32 %v848_v51 }
 0x23a   :  { %v3084_v56 = vpop.eup %3083 }
 0x23b   :  { %v851_v7 = vmul.f32 %v3084_v56, %v832_v12  ;;  %v3086_v9 = vpop.eup %3085 }
 0x23c   :  { %v854_v37 = vsub.f32 1.0, %v3086_v9  ;;  %v856_v55 = vmul.f32 %v3086_v9, %v3780_v48 }
 0x23d   :  { %v852_v0 = vadd.f32 %v851_v7, %v3679_v24 }
 0x23f   :  { %3087 = vtanh.f32 %v852_v0 }
 0x249   :  { %v3088_v4 = vpop.eup %3087 }
 0x24a   :  { %v855_v52 = vmul.f32 %v3088_v4, %v854_v37 }
 0x24c   :  { %v3826_v49 = vadd.f32 %v856_v55, %v855_v52 }
 0x24e   :  { %v864_v53 = vpack.c.bf16 %v3826_v49, %v3826_v49 }
 0x250   :  { %898 = vmatmul.mubr.bf16.vlgmr.msra.gmra.mrb[32].mxu1 %v864_v53  ;;  %2738 = vmatmul.mubr.bf16.vlgmr.msra.gmra.mrb[32].mxu0 %v864_v53 }
 0x251   :  { %975 = vmatpush1.bf16.msra.mxu1 %v3403_v22  ;;  %2742 = vmatpush3.bf16.msra.mxu0 %v3363_v15 }
 0x252   :  { %976 = vmatprep.subr.bf16.mxu1 %v3408_v23  ;;  %2743 = vmatprep.subr.bf16.mxu0 %v4703_v47 }
 0x253   :  { %1006 = vmatprep.mubr.bf16.mxu1 %v4704_v61  ;;  %2757 = vmatprep.mubr.msk.bf16.mxu0 %vm3279_vm1, %v4703_v47 }
 0x255   :  { %977 = vmatpush1.bf16.msra.mxu1 %v3427_v26  ;;  %2744 = vmatpush3.bf16.msra.mxu0 %v3381_v19 }
 0x256   :  { %978 = vmatprep.subr.bf16.mxu1 %v3434_v27  ;;  %2745 = vmatprep.subr.bf16.mxu0 %v4703_v47 }
 0x259   :  { %979 = vmatpush1.bf16.msra.mxu1 %v3451_v30  ;;  %2746 = vmatpush3.bf16.msra.mxu0 %v3398_v21 }
 0x25a   :  { %980 = vmatprep.subr.bf16.mxu1 %v3460_v32  ;;  %2747 = vmatprep.subr.bf16.mxu0 %v4703_v47 }
 0x25d   :  { %981 = vmatpush1.bf16.msra.mxu1 %v3475_v34  ;;  %2748 = vmatpush3.bf16.msra.mxu0 %v3418_v25 }
 0x25e   :  { %982 = vmatprep.subr.bf16.mxu1 %v3482_v35  ;;  %2749 = vmatprep.subr.bf16.mxu0 %v4703_v47 }
 0x261   :  { %983 = vmatpush1.bf16.msra.mxu1 %v3499_v38  ;;  %2750 = vmatpush3.bf16.msra.mxu0 %v3440_v28 }
 0x262   :  { %984 = vmatprep.subr.bf16.mxu1 %v3505_v39  ;;  %2751 = vmatprep.subr.bf16.mxu0 %v4703_v47 }
 0x265   :  { %985 = vmatpush1.bf16.msra.mxu1 %v3519_v41  ;;  %2752 = vmatpush3.bf16.msra.mxu0 %v3467_v33 }
 0x266   :  { %986 = vmatprep.subr.bf16.mxu1 %v3527_v42  ;;  %2753 = vmatprep.subr.bf16.mxu0 %v4703_v47 }
 0x269   :  { %987 = vmatpush1.bf16.msra.mxu1 %v3536_v43  ;;  %2754 = vmatpush3.bf16.msra.mxu0 %v3489_v36 }
 0x26a   :  { %988 = vmatprep.subr.bf16.mxu1 %v3543_v44  ;;  %2755 = vmatprep.subr.bf16.mxu0 %v4703_v47 }
 0x26d   :  { %989 = vmatpush1.bf16.msra.mxu1 %v3552_v45  ;;  %2756 = vmatpush3.bf16.msra.mxu0 %v3513_v40 }
 0x26e   :  { %1083 = vmatprep.subr.bf16.mxu1 %v3390_v20  ;;  %2761 = vmatprep.subr.bf16.mxu0 %v4703_v47 }
 0x323   :  { %v899_v24 = vpop.f32.mrb[32].mxu1  ;;  %v940_v48 = vpop.f32.mrb[32].mxu0 }
 0x324   :  { %v900_v62 = vadd.f32 %v899_v24, %v3761_v17  ;;  %v901_v58 = vpop.f32.mrb[33].mxu1  ;;  %v2739_v3 = vpop.f32.mrb[33].mxu0  ;;  %v941_v37 = vadd.f32 %v940_v48, %v3775_v1 }
 0x325   :  { %v902_v18 = vadd.f32 %v901_v58, %v3765_v13  ;;  %v903_v2 = vpop.f32.mrb[34].mxu1  ;;  %v943_v54 = vpop.f32.mrb[34].mxu0 }
 0x326   :  { %v946_v5 = vadd.f32 %v900_v62, %v3637_v10  ;;  %v904_v50 = vpop.f32.mrb[35].mxu1  ;;  %v2740_v57 = vpop.f32.mrb[35].mxu0 }
 0x327   :  { %v953_v59 = vadd.f32 %v902_v18, %v3643_v16 }
 0x328   :  { %v2473_v51 = vmul.f32 -1.442695, %v946_v5 }
 0x329   :  { %v2474_v12 = vmul.f32 -1.442695, %v953_v59 }
 0x32a   :  { %3089 = vpow2.f32 %v2473_v51 }
 0x32b   :  { %3091 = vpow2.f32 %v2474_v12 }
 0x334   :  { %v3090_v56 = vpop.eup %3089 }
 0x335   :  { %v950_v7 = vadd.f32 1.0, %v3090_v56  ;;  %v3092_v0 = vpop.eup %3091 }
 0x336   :  { %v957_v9 = vadd.f32 1.0, %v3092_v0 }
 0x337   :  { %3093 = vrcp.f32 %v950_v7 }
 0x338   :  { %3095 = vrcp.f32 %v957_v9 }
 0x341   :  { %v3094_v4 = vpop.eup %3093 }
 0x342   :  { %v960_v52 = vmul.f32 %v3094_v4, %v941_v37  ;;  %v3096_v55 = vpop.eup %3095 }
 0x343   :  { %v963_v53 = vsub.f32 1.0, %v3096_v55  ;;  %v965_v62 = vmul.f32 %v3096_v55, %v3826_v49 }
 0x344   :  { %v961_v10 = vadd.f32 %v960_v52, %v3662_v60 }
 0x346   :  { %3097 = vtanh.f32 %v961_v10 }
 0x350   :  { %v3098_v16 = vpop.eup %3097 }
 0x351   :  { %v964_v24 = vmul.f32 %v3098_v16, %v963_v53 }
 0x353   :  { %v3872_v58 = vadd.f32 %v965_v62, %v964_v24 }
 0x355   :  { %v973_v3 = vpack.c.bf16 %v3872_v58, %v3872_v58 }
 0x357   :  { %1007 = vmatmul.mubr.bf16.vlgmr.msra.gmra.mrb[36].mxu1 %v973_v3  ;;  %2758 = vmatmul.mubr.bf16.vlgmr.msra.gmra.mrb[36].mxu0 %v973_v3 }
 0x358   :  { %1084 = vmatpush1.bf16.msra.mxu1 %v3403_v22  ;;  %2762 = vmatpush3.bf16.msra.mxu0 %v3363_v15 }
 0x359   :  { %1085 = vmatprep.subr.bf16.mxu1 %v3408_v23  ;;  %2763 = vmatprep.subr.bf16.mxu0 %v4703_v47 }
 0x35a   :  { %1115 = vmatprep.mubr.bf16.mxu1 %v4704_v61  ;;  %2777 = vmatprep.mubr.msk.bf16.mxu0 %vm3279_vm1, %v4703_v47 }
 0x35c   :  { %1086 = vmatpush1.bf16.msra.mxu1 %v3427_v26  ;;  %2764 = vmatpush3.bf16.msra.mxu0 %v3381_v19 }
 0x35d   :  { %1087 = vmatprep.subr.bf16.mxu1 %v3434_v27  ;;  %2765 = vmatprep.subr.bf16.mxu0 %v4703_v47 }
 0x360   :  { %1088 = vmatpush1.bf16.msra.mxu1 %v3451_v30  ;;  %2766 = vmatpush3.bf16.msra.mxu0 %v3398_v21 }
 0x361   :  { %1089 = vmatprep.subr.bf16.mxu1 %v3460_v32  ;;  %2767 = vmatprep.subr.bf16.mxu0 %v4703_v47 }
 0x364   :  { %1090 = vmatpush1.bf16.msra.mxu1 %v3475_v34  ;;  %2768 = vmatpush3.bf16.msra.mxu0 %v3418_v25 }
 0x365   :  { %1091 = vmatprep.subr.bf16.mxu1 %v3482_v35  ;;  %2769 = vmatprep.subr.bf16.mxu0 %v4703_v47 }
 0x368   :  { %1092 = vmatpush1.bf16.msra.mxu1 %v3499_v38  ;;  %2770 = vmatpush3.bf16.msra.mxu0 %v3440_v28 }
 0x369   :  { %1093 = vmatprep.subr.bf16.mxu1 %v3505_v39  ;;  %2771 = vmatprep.subr.bf16.mxu0 %v4703_v47 }
 0x36c   :  { %1094 = vmatpush1.bf16.msra.mxu1 %v3519_v41  ;;  %2772 = vmatpush3.bf16.msra.mxu0 %v3467_v33 }
 0x36d   :  { %1095 = vmatprep.subr.bf16.mxu1 %v3527_v42  ;;  %2773 = vmatprep.subr.bf16.mxu0 %v4703_v47 }
 0x370   :  { %1096 = vmatpush1.bf16.msra.mxu1 %v3536_v43  ;;  %2774 = vmatpush3.bf16.msra.mxu0 %v3489_v36 }
 0x371   :  { %1097 = vmatprep.subr.bf16.mxu1 %v3543_v44  ;;  %2775 = vmatprep.subr.bf16.mxu0 %v4703_v47 }
 0x374   :  { %1098 = vmatpush1.bf16.msra.mxu1 %v3552_v45  ;;  %2776 = vmatpush3.bf16.msra.mxu0 %v3513_v40 }
 0x375   :  { %1192 = vmatprep.subr.bf16.mxu1 %v3390_v20  ;;  %2781 = vmatprep.subr.bf16.mxu0 %v4703_v47 }
 0x42a   :  { %v1008_v60 = vpop.f32.mrb[36].mxu1  ;;  %v1049_v49 = vpop.f32.mrb[36].mxu0 }
 0x42b   :  { %v1009_v48 = vadd.f32 %v1008_v60, %v3761_v17  ;;  %v1010_v18 = vpop.f32.mrb[37].mxu1  ;;  %v2759_v2 = vpop.f32.mrb[37].mxu0  ;;  %v1050_v4 = vadd.f32 %v1049_v49, %v3775_v1 }
 0x42c   :  { %v1011_v54 = vadd.f32 %v1010_v18, %v3765_v13  ;;  %v1012_v5 = vpop.f32.mrb[38].mxu1  ;;  %v1052_v50 = vpop.f32.mrb[38].mxu0 }
 0x42d   :  { %v1055_v57 = vadd.f32 %v1009_v48, %v3649_v29  ;;  %v1013_v59 = vpop.f32.mrb[39].mxu1  ;;  %v2760_v51 = vpop.f32.mrb[39].mxu0 }
 0x42e   :  { %v1062_v12 = vadd.f32 %v1011_v54, %v3655_v46  ;;  %v3988_v59 = vld [vmem:[%s4658_s2 + $0x1c] ss:$12 sps:$4 sm:$0xff]   ;;  %v3998_v51 = vld [vmem:[%s4658_s2 + $0x18] ss:$12 sps:$4 sm:$0xff]  }
 0x42f   :  { %v2475_v56 = vmul.f32 -1.442695, %v1055_v57  ;;  %v3976_v57 = vld [vmem:[%s4658_s2] ss:$12 sps:$4 sm:$0xff]  }
 0x430   :  { %v2476_v20 = vmul.f32 -1.442695, %v1062_v12  ;;  %v4004_v12 = vld [vmem:[%s4658_s2 + $0x20] ss:$12 sps:$4 sm:$0xff]  }
 0x431   :  { %3099 = vpow2.f32 %v2475_v56  ;;  %v4010_v56 = vld [vmem:[%s4658_s2 + $0x34] ss:$12 sps:$4 sm:$0xff]  }
 0x432   :  { %3101 = vpow2.f32 %v2476_v20  ;;  %v4017_v20 = vld [vmem:[%s4658_s2 + $0x30] ss:$12 sps:$4 sm:$0xff]  }
 0x43b   :  { %v3100_v7 = vpop.eup %3099 }
 0x43c   :  { %v1059_v0 = vadd.f32 1.0, %v3100_v7  ;;  %v3102_v9 = vpop.eup %3101  ;;  %v4023_v7 = vld [vmem:[%s4658_s2 + $0x38] ss:$12 sps:$4 sm:$0xff]  }
 0x43d   :  { %v1066_v37 = vadd.f32 1.0, %v3102_v9  ;;  %v4036_v9 = vld [vmem:[%s4658_s2 + $0x48] ss:$12 sps:$4 sm:$0xff]  }
 0x43e   :  { %3103 = vrcp.f32 %v1059_v0  ;;  %v4029_v0 = vld [vmem:[%s4658_s2 + $0x4c] ss:$12 sps:$4 sm:$0xff]  }
 0x43f   :  { %3105 = vrcp.f32 %v1066_v37  ;;  %v4042_v37 = vld [vmem:[%s4658_s2 + $0x50] ss:$12 sps:$4 sm:$0xff]  }
 0x448   :  { %v3104_v52 = vpop.eup %3103 }
 0x449   :  { %v1069_v10 = vmul.f32 %v3104_v52, %v1050_v4  ;;  %v3106_v55 = vpop.eup %3105  ;;  %v4048_v4 = vld [vmem:[%s4658_s2 + $0x64] ss:$12 sps:$4 sm:$0xff]   ;;  %v4055_v52 = vld [vmem:[%s4658_s2 + $0x60] ss:$12 sps:$4 sm:$0xff]  }
 0x44a   :  { %v1072_v53 = vsub.f32 1.0, %v3106_v55  ;;  %v1074_v24 = vmul.f32 %v3106_v55, %v3872_v58  ;;  %v4075_v55 = vld [vmem:[%s4658_s2 + $0x80] ss:$12 sps:$4 sm:$0xff]  }
 0x44b   :  { %v1070_v29 = vadd.f32 %v1069_v10, %v3673_v11  ;;  %v4061_v10 = vld [vmem:[%s4658_s2 + $0x68] ss:$12 sps:$4 sm:$0xff]  }
 0x44d   :  { %3107 = vtanh.f32 %v1070_v29  ;;  %v4067_v29 = vld [vmem:[%s4658_s2 + $0x7c] ss:$12 sps:$4 sm:$0xff]  }
 0x457   :  { %v3108_v46 = vpop.eup %3107 }
 0x458   :  { %v1073_v16 = vmul.f32 %v3108_v46, %v1072_v53  ;;  %v4084_v53 = vld [vmem:[%s4658_s2 + $0x98] ss:$12 sps:$4 sm:$0xff]  }
 0x45a   :  { %v3918_v62 = vadd.f32 %v1074_v24, %v1073_v16 }
 0x45c   :  { %v1082_v3 = vpack.c.bf16 %v3918_v62, %v3918_v62 }
 0x45e   :  { %1116 = vmatmul.mubr.bf16.vlgmr.msra.gmra.mrb[40].mxu1 %v1082_v3  ;;  %2778 = vmatmul.mubr.bf16.vlgmr.msra.gmra.mrb[40].mxu0 %v1082_v3 }
 0x45f   :  { %1193 = vmatpush1.bf16.msra.mxu1 %v3403_v22  ;;  %2782 = vmatpush3.bf16.msra.mxu0 %v3363_v15  ;;  %v3958_v15 = vld [vmem:[%s4658_s2 + $0x4] ss:$12 sps:$4 sm:$0xff]  }
 0x460   :  { %1194 = vmatprep.subr.bf16.mxu1 %v3408_v23  ;;  %2783 = vmatprep.subr.bf16.mxu0 %v4703_v47 }
 0x461   :  { %1224 = vmatprep.mubr.bf16.mxu1 %v4704_v61  ;;  %2797 = vmatprep.mubr.msk.bf16.mxu0 %vm3279_vm1, %v4703_v47 }
 0x463   :  { %1195 = vmatpush1.bf16.msra.mxu1 %v3427_v26  ;;  %2784 = vmatpush3.bf16.msra.mxu0 %v3381_v19 }
 0x464   :  { %1196 = vmatprep.subr.bf16.mxu1 %v3434_v27  ;;  %2785 = vmatprep.subr.bf16.mxu0 %v4703_v47 }
 0x467   :  { %1197 = vmatpush1.bf16.msra.mxu1 %v3451_v30  ;;  %2786 = vmatpush3.bf16.msra.mxu0 %v3398_v21 }
 0x468   :  { %1198 = vmatprep.subr.bf16.mxu1 %v3460_v32  ;;  %2787 = vmatprep.subr.bf16.mxu0 %v4703_v47 }
 0x46b   :  { %1199 = vmatpush1.bf16.msra.mxu1 %v3475_v34  ;;  %2788 = vmatpush3.bf16.msra.mxu0 %v3418_v25 }
 0x46c   :  { %1200 = vmatprep.subr.bf16.mxu1 %v3482_v35  ;;  %2789 = vmatprep.subr.bf16.mxu0 %v4703_v47 }
 0x46f   :  { %1201 = vmatpush1.bf16.msra.mxu1 %v3499_v38  ;;  %2790 = vmatpush3.bf16.msra.mxu0 %v3440_v28 }
 0x470   :  { %1202 = vmatprep.subr.bf16.mxu1 %v3505_v39  ;;  %2791 = vmatprep.subr.bf16.mxu0 %v4703_v47 }
 0x473   :  { %1203 = vmatpush1.bf16.msra.mxu1 %v3519_v41  ;;  %2792 = vmatpush3.bf16.msra.mxu0 %v3467_v33 }
 0x474   :  { %1204 = vmatprep.subr.bf16.mxu1 %v3527_v42  ;;  %2793 = vmatprep.subr.bf16.mxu0 %v4703_v47 }
 0x477   :  { %1205 = vmatpush1.bf16.msra.mxu1 %v3536_v43  ;;  %2794 = vmatpush3.bf16.msra.mxu0 %v3489_v36 }
 0x478   :  { %1206 = vmatprep.subr.bf16.mxu1 %v3543_v44  ;;  %2795 = vmatprep.subr.bf16.mxu0 %v4703_v47 }
 0x47b   :  { %1207 = vmatpush1.bf16.msra.mxu1 %v3552_v45  ;;  %2796 = vmatpush3.bf16.msra.mxu0 %v3513_v40 }
 0x47c   :  { %1301 = vmatprep.subr.bf16.mxu1 %v3958_v15  ;;  %2801 = vmatprep.subr.bf16.mxu0 %v4703_v47 }
 0x531   :  { %v1117_v19 = vpop.f32.mrb[40].mxu1  ;;  %v1158_v21 = vpop.f32.mrb[40].mxu0 }
 0x532   :  { %v1118_v22 = vadd.f32 %v1117_v19, %v3761_v17  ;;  %v1119_v23 = vpop.f32.mrb[41].mxu1  ;;  %v2779_v25 = vpop.f32.mrb[41].mxu0  ;;  %v1159_v58 = vadd.f32 %v1158_v21, %v3775_v1 }
 0x533   :  { %v1120_v26 = vadd.f32 %v1119_v23, %v3765_v13  ;;  %v1121_v27 = vpop.f32.mrb[42].mxu1  ;;  %v1161_v28 = vpop.f32.mrb[42].mxu0 }
 0x534   :  { %v1164_v30 = vadd.f32 %v1118_v22, %v3667_v63  ;;  %v1122_v32 = vpop.f32.mrb[43].mxu1  ;;  %v2780_v33 = vpop.f32.mrb[43].mxu0 }
 0x535   :  { %v1171_v34 = vadd.f32 %v1120_v26, %v3670_v6 }
 0x536   :  { %v2477_v35 = vmul.f32 -1.442695, %v1164_v30 }
 0x537   :  { %v2478_v36 = vmul.f32 -1.442695, %v1171_v34 }
 0x538   :  { %3109 = vpow2.f32 %v2477_v35  ;;  %v4705_v35 = vld [vmem:[#allocation17_spill] sm:$0xff] }
 0x539   :  { %3111 = vpow2.f32 %v2478_v36 }
 0x542   :  { %v3110_v38 = vpop.eup %3109 }
 0x543   :  { %v1168_v39 = vadd.f32 1.0, %v3110_v38  ;;  %v3112_v40 = vpop.eup %3111 }
 0x544   :  { %v1175_v11 = vadd.f32 1.0, %v3112_v40 }
 0x545   :  { %3113 = vrcp.f32 %v1168_v39 }
 0x546   :  { %3115 = vrcp.f32 %v1175_v11 }
 0x54f   :  { %v3114_v60 = vpop.eup %3113 }
 0x550   :  { %v1178_v49 = vmul.f32 %v3114_v60, %v1159_v58  ;;  %v3116_v48 = vpop.eup %3115  ;;  %v4135_v60 = vld [vmem:[%s4658_s2 + $0x78] ss:$12 sps:$4 sm:$0xff]  }
 0x551   :  { %v1181_v18 = vsub.f32 1.0, %v3116_v48  ;;  %v1183_v54 = vmul.f32 %v3116_v48, %v3918_v62  ;;  %v4156_v48 = vld [vmem:[%s4658_s2 + $0xac] ss:$12 sps:$4 sm:$0xff]  }
 0x552   :  { %v1179_v63 = vadd.f32 %v1178_v49, %v3691_v8  ;;  %v3982_v8 = vld [vmem:[%s4658_s2 + $0x8] ss:$12 sps:$4 sm:$0xff]  }
 0x553   :  { %v4142_v49 = vld [vmem:[%s4658_s2 + $0x94] ss:$12 sps:$4 sm:$0xff]  }
 0x554   :  { %3117 = vtanh.f32 %v1179_v63  ;;  %v4149_v63 = vld [vmem:[%s4658_s2 + $0x90] ss:$12 sps:$4 sm:$0xff]  }
 0x55e   :  { %v3118_v6 = vpop.eup %3117 }
 0x55f   :  { %v1182_v2 = vmul.f32 %v3118_v6, %v1181_v18  ;;  %v4163_v18 = vld [vmem:[%s4658_s2 + $0xa8] ss:$12 sps:$4 sm:$0xff]  }
 0x561   :  { %v3969_v5 = vadd.f32 %v1183_v54, %v1182_v2 }
 0x563   :  { %v1191_v50 = vpack.c.bf16 %v3969_v5, %v3969_v5 }
 0x565   :  { %1225 = vmatmul.mubr.bf16.vlgmr.msra.gmra.mrb[44].mxu1 %v1191_v50  ;;  %2798 = vmatmul.mubr.bf16.vlgmr.msra.gmra.mrb[44].mxu0 %v1191_v50 }
 0x566   :  { %1302 = vmatpush1.bf16.msra.mxu1 %v3976_v57  ;;  %2802 = vmatpush3.bf16.msra.mxu0 %v3982_v8 }
 0x567   :  { %1303 = vmatprep.subr.bf16.mxu1 %v3988_v59  ;;  %2803 = vmatprep.subr.bf16.mxu0 %v4703_v47 }
 0x568   :  { %1333 = vmatprep.mubr.bf16.mxu1 %v4704_v61  ;;  %2817 = vmatprep.mubr.msk.bf16.mxu0 %vm3279_vm1, %v4703_v47 }
 0x56a   :  { %1304 = vmatpush1.bf16.msra.mxu1 %v3998_v51  ;;  %2804 = vmatpush3.bf16.msra.mxu0 %v4004_v12 }
 0x56b   :  { %1305 = vmatprep.subr.bf16.mxu1 %v4010_v56  ;;  %2805 = vmatprep.subr.bf16.mxu0 %v4703_v47 }
 0x56e   :  { %1306 = vmatpush1.bf16.msra.mxu1 %v4017_v20  ;;  %2806 = vmatpush3.bf16.msra.mxu0 %v4023_v7 }
 0x56f   :  { %1307 = vmatprep.subr.bf16.mxu1 %v4029_v0  ;;  %2807 = vmatprep.subr.bf16.mxu0 %v4703_v47 }
 0x572   :  { %1308 = vmatpush1.bf16.msra.mxu1 %v4036_v9  ;;  %2808 = vmatpush3.bf16.msra.mxu0 %v4042_v37 }
 0x573   :  { %1309 = vmatprep.subr.bf16.mxu1 %v4048_v4  ;;  %2809 = vmatprep.subr.bf16.mxu0 %v4703_v47 }
 0x576   :  { %1310 = vmatpush1.bf16.msra.mxu1 %v4055_v52  ;;  %2810 = vmatpush3.bf16.msra.mxu0 %v4061_v10 }
 0x577   :  { %1311 = vmatprep.subr.bf16.mxu1 %v4067_v29  ;;  %2811 = vmatprep.subr.bf16.mxu0 %v4703_v47 }
 0x57a   :  { %1312 = vmatpush1.bf16.msra.mxu1 %v3519_v41  ;;  %2812 = vmatpush3.bf16.msra.mxu0 %v4075_v55  ;;  %v4093_v41 = vld [vmem:[%s4658_s2 + $0xb0] ss:$12 sps:$4 sm:$0xff]  }
 0x57b   :  { %1313 = vmatprep.subr.bf16.mxu1 %v3527_v42  ;;  %2813 = vmatprep.subr.bf16.mxu0 %v4703_v47 }
 0x57e   :  { %1314 = vmatpush1.bf16.msra.mxu1 %v3536_v43  ;;  %2814 = vmatpush3.bf16.msra.mxu0 %v4084_v53 }
 0x57f   :  { %1315 = vmatprep.subr.bf16.mxu1 %v3543_v44  ;;  %2815 = vmatprep.subr.bf16.mxu0 %v4703_v47 }
 0x582   :  { %1316 = vmatpush1.bf16.msra.mxu1 %v3552_v45  ;;  %2816 = vmatpush3.bf16.msra.mxu0 %v4093_v41 }
 0x583   :  { %1410 = vmatprep.subr.bf16.mxu1 %v3958_v15  ;;  %2821 = vmatprep.subr.bf16.mxu0 %v4703_v47 }
 0x638   :  { %v1226_v42 = vpop.f32.mrb[44].mxu1  ;;  %v1267_v43 = vpop.f32.mrb[44].mxu0 }
 0x639   :  { %v1227_v46 = vadd.f32 %v1226_v42, %v3761_v17  ;;  %v1228_v44 = vpop.f32.mrb[45].mxu1  ;;  %v2799_v16 = vpop.f32.mrb[45].mxu0  ;;  %v1268_v32 = vadd.f32 %v1267_v43, %v3775_v1 }
 0x63a   :  { %v1229_v24 = vadd.f32 %v1228_v44, %v3765_v13  ;;  %v1230_v45 = vpop.f32.mrb[46].mxu1  ;;  %v1270_v62 = vpop.f32.mrb[46].mxu0  ;;  %v4706_v44 = vld [vmem:[#allocation13_spill] sm:$0xff] }
 0x63b   :  { %v1273_v3 = vadd.f32 %v1227_v46, %v3676_v14  ;;  %v1231_v19 = vpop.f32.mrb[47].mxu1  ;;  %v2800_v21 = vpop.f32.mrb[47].mxu0  ;;  %v4707_v62 = vld [vmem:[#allocation14_spill] sm:$0xff] }
 0x63c   :  { %v1280_v22 = vadd.f32 %v1229_v24, %v3682_v31 }
 0x63d   :  { %v2479_v23 = vmul.f32 -1.442695, %v1273_v3 }
 0x63e   :  { %v2480_v25 = vmul.f32 -1.442695, %v1280_v22 }
 0x63f   :  { %3119 = vpow2.f32 %v2479_v23 }
 0x640   :  { %3121 = vpow2.f32 %v2480_v25 }
 0x649   :  { %v3120_v26 = vpop.eup %3119 }
 0x64a   :  { %v1277_v27 = vadd.f32 1.0, %v3120_v26  ;;  %v3122_v28 = vpop.eup %3121 }
 0x64b   :  { %v1284_v30 = vadd.f32 1.0, %v3122_v28 }
 0x64c   :  { %3123 = vrcp.f32 %v1277_v27 }
 0x64d   :  { %3125 = vrcp.f32 %v1284_v30 }
 0x656   :  { %v3124_v33 = vpop.eup %3123 }
 0x657   :  { %v1287_v34 = vmul.f32 %v3124_v33, %v1268_v32  ;;  %v3126_v36 = vpop.eup %3125  ;;  %v4708_v32 = vld [vmem:[#allocation12_spill] sm:$0xff] }
 0x658   :  { %v1290_v38 = vsub.f32 1.0, %v3126_v36  ;;  %v1292_v40 = vmul.f32 %v3126_v36, %v3969_v5 }
 0x659   :  { %v1288_v14 = vadd.f32 %v1287_v34, %v4705_v35 }
 0x65b   :  { %3127 = vtanh.f32 %v1288_v14 }
 0x665   :  { %v3128_v31 = vpop.eup %3127 }
 0x666   :  { %v1291_v39 = vmul.f32 %v3128_v31, %v1290_v38 }
 0x668   :  { %v4105_v11 = vadd.f32 %v1292_v40, %v1291_v39 }
 0x66a   :  { %v1300_v58 = vpack.c.bf16 %v4105_v11, %v4105_v11 }
 0x66c   :  { %1334 = vmatmul.mubr.bf16.vlgmr.msra.gmra.mrb[48].mxu1 %v1300_v58  ;;  %2818 = vmatmul.mubr.bf16.vlgmr.msra.gmra.mrb[48].mxu0 %v1300_v58 }
 0x66d   :  { %1411 = vmatpush1.bf16.msra.mxu1 %v3976_v57  ;;  %2822 = vmatpush3.bf16.msra.mxu0 %v3982_v8 }
 0x66e   :  { %1412 = vmatprep.subr.bf16.mxu1 %v3988_v59  ;;  %2823 = vmatprep.subr.bf16.mxu0 %v4703_v47 }
 0x66f   :  { %1442 = vmatprep.mubr.bf16.mxu1 %v4704_v61  ;;  %2837 = vmatprep.mubr.msk.bf16.mxu0 %vm3279_vm1, %v4703_v47 }
 0x671   :  { %1413 = vmatpush1.bf16.msra.mxu1 %v3998_v51  ;;  %2824 = vmatpush3.bf16.msra.mxu0 %v4004_v12 }
 0x672   :  { %1414 = vmatprep.subr.bf16.mxu1 %v4010_v56  ;;  %2825 = vmatprep.subr.bf16.mxu0 %v4703_v47 }
 0x675   :  { %1415 = vmatpush1.bf16.msra.mxu1 %v4017_v20  ;;  %2826 = vmatpush3.bf16.msra.mxu0 %v4023_v7 }
 0x676   :  { %1416 = vmatprep.subr.bf16.mxu1 %v4029_v0  ;;  %2827 = vmatprep.subr.bf16.mxu0 %v4703_v47 }
 0x679   :  { %1417 = vmatpush1.bf16.msra.mxu1 %v4036_v9  ;;  %2828 = vmatpush3.bf16.msra.mxu0 %v4042_v37 }
 0x67a   :  { %1418 = vmatprep.subr.bf16.mxu1 %v4048_v4  ;;  %2829 = vmatprep.subr.bf16.mxu0 %v4703_v47 }
 0x67d   :  { %1419 = vmatpush1.bf16.msra.mxu1 %v4055_v52  ;;  %2830 = vmatpush3.bf16.msra.mxu0 %v4061_v10 }
 0x67e   :  { %1420 = vmatprep.subr.bf16.mxu1 %v4067_v29  ;;  %2831 = vmatprep.subr.bf16.mxu0 %v4703_v47 }
 0x681   :  { %1421 = vmatpush1.bf16.msra.mxu1 %v4135_v60  ;;  %2832 = vmatpush3.bf16.msra.mxu0 %v4075_v55 }
 0x682   :  { %1422 = vmatprep.subr.bf16.mxu1 %v4142_v49  ;;  %2833 = vmatprep.subr.bf16.mxu0 %v4703_v47 }
 0x685   :  { %1423 = vmatpush1.bf16.msra.mxu1 %v4149_v63  ;;  %2834 = vmatpush3.bf16.msra.mxu0 %v4084_v53 }
 0x686   :  { %1424 = vmatprep.subr.bf16.mxu1 %v4156_v48  ;;  %2835 = vmatprep.subr.bf16.mxu0 %v4703_v47 }
 0x689   :  { %1425 = vmatpush1.bf16.msra.mxu1 %v4163_v18  ;;  %2836 = vmatpush3.bf16.msra.mxu0 %v4093_v41 }
 0x68a   :  { %1519 = vmatprep.subr.bf16.mxu1 %v3958_v15  ;;  %2841 = vmatprep.subr.bf16.mxu0 %v4703_v47 }
 0x73f   :  { %v1335_v6 = vpop.f32.mrb[48].mxu1  ;;  %v1376_v2 = vpop.f32.mrb[48].mxu0 }
 0x740   :  { %v1336_v54 = vadd.f32 %v1335_v6, %v3761_v17  ;;  %v1337_v5 = vpop.f32.mrb[49].mxu1  ;;  %v2819_v50 = vpop.f32.mrb[49].mxu0  ;;  %v1377_v27 = vadd.f32 %v1376_v2, %v3775_v1 }
 0x741   :  { %v1338_v42 = vadd.f32 %v1337_v5, %v3765_v13  ;;  %v1339_v43 = vpop.f32.mrb[50].mxu1  ;;  %v1379_v46 = vpop.f32.mrb[50].mxu0 }
 0x742   :  { %v1382_v16 = vadd.f32 %v1336_v54, %v4706_v44  ;;  %v1340_v24 = vpop.f32.mrb[51].mxu1  ;;  %v2820_v45 = vpop.f32.mrb[51].mxu0 }
 0x743   :  { %v1389_v3 = vadd.f32 %v1338_v42, %v4707_v62  ;;  %v4709_v42 = vld [vmem:[#allocation16_spill] sm:$0xff] }
 0x744   :  { %v2481_v19 = vmul.f32 -1.442695, %v1382_v16  ;;  %v4710_v16 = vld [vmem:[#allocation18_spill] sm:$0xff] }
 0x745   :  { %v2482_v21 = vmul.f32 -1.442695, %v1389_v3 }
 0x746   :  { %3129 = vpow2.f32 %v2481_v19 }
 0x747   :  { %3131 = vpow2.f32 %v2482_v21 }
 0x750   :  { %v3130_v22 = vpop.eup %3129 }
 0x751   :  { %v1386_v23 = vadd.f32 1.0, %v3130_v22  ;;  %v3132_v25 = vpop.eup %3131 }
 0x752   :  { %v1393_v26 = vadd.f32 1.0, %v3132_v25 }
 0x753   :  { %3133 = vrcp.f32 %v1386_v23 }
 0x754   :  { %3135 = vrcp.f32 %v1393_v26 }
 0x75d   :  { %v3134_v28 = vpop.eup %3133 }
 0x75e   :  { %v1396_v30 = vmul.f32 %v3134_v28, %v1377_v27  ;;  %v3136_v34 = vpop.eup %3135  ;;  %v4711_v27 = vld [vmem:[#allocation15_spill] sm:$0xff] }
 0x75f   :  { %v1399_v35 = vsub.f32 1.0, %v3136_v34  ;;  %v1401_v38 = vmul.f32 %v3136_v34, %v4105_v11 }
 0x760   :  { %v1397_v33 = vadd.f32 %v1396_v30, %v4708_v32 }
 0x762   :  { %3137 = vtanh.f32 %v1397_v33 }
 0x76c   :  { %v3138_v14 = vpop.eup %3137 }
 0x76d   :  { %v1400_v36 = vmul.f32 %v3138_v14, %v1399_v35 }
 0x76f   :  { %v4176_v31 = vadd.f32 %v1401_v38, %v1400_v36 }
 0x771   :  { %v1409_v39 = vpack.c.bf16 %v4176_v31, %v4176_v31 }
 0x773   :  { %1443 = vmatmul.mubr.bf16.vlgmr.msra.gmra.mrb[52].mxu1 %v1409_v39  ;;  %2838 = vmatmul.mubr.bf16.vlgmr.msra.gmra.mrb[52].mxu0 %v1409_v39 }
 0x774   :  { %1520 = vmatpush1.bf16.msra.mxu1 %v3976_v57  ;;  %2842 = vmatpush3.bf16.msra.mxu0 %v3982_v8 }
 0x775   :  { %1521 = vmatprep.subr.bf16.mxu1 %v3988_v59  ;;  %2843 = vmatprep.subr.bf16.mxu0 %v4703_v47 }
 0x776   :  { %1551 = vmatprep.mubr.bf16.mxu1 %v4704_v61  ;;  %2857 = vmatprep.mubr.msk.bf16.mxu0 %vm3279_vm1, %v4703_v47 }
 0x778   :  { %1522 = vmatpush1.bf16.msra.mxu1 %v3998_v51  ;;  %2844 = vmatpush3.bf16.msra.mxu0 %v4004_v12 }
 0x779   :  { %1523 = vmatprep.subr.bf16.mxu1 %v4010_v56  ;;  %2845 = vmatprep.subr.bf16.mxu0 %v4703_v47 }
 0x77c   :  { %1524 = vmatpush1.bf16.msra.mxu1 %v4017_v20  ;;  %2846 = vmatpush3.bf16.msra.mxu0 %v4023_v7 }
 0x77d   :  { %1525 = vmatprep.subr.bf16.mxu1 %v4029_v0  ;;  %2847 = vmatprep.subr.bf16.mxu0 %v4703_v47 }
 0x780   :  { %1526 = vmatpush1.bf16.msra.mxu1 %v4036_v9  ;;  %2848 = vmatpush3.bf16.msra.mxu0 %v4042_v37 }
 0x781   :  { %1527 = vmatprep.subr.bf16.mxu1 %v4048_v4  ;;  %2849 = vmatprep.subr.bf16.mxu0 %v4703_v47 }
 0x784   :  { %1528 = vmatpush1.bf16.msra.mxu1 %v4055_v52  ;;  %2850 = vmatpush3.bf16.msra.mxu0 %v4061_v10 }
 0x785   :  { %1529 = vmatprep.subr.bf16.mxu1 %v4067_v29  ;;  %2851 = vmatprep.subr.bf16.mxu0 %v4703_v47 }
 0x788   :  { %1530 = vmatpush1.bf16.msra.mxu1 %v4135_v60  ;;  %2852 = vmatpush3.bf16.msra.mxu0 %v4075_v55 }
 0x789   :  { %1531 = vmatprep.subr.bf16.mxu1 %v4142_v49  ;;  %2853 = vmatprep.subr.bf16.mxu0 %v4703_v47 }
 0x78c   :  { %1532 = vmatpush1.bf16.msra.mxu1 %v4149_v63  ;;  %2854 = vmatpush3.bf16.msra.mxu0 %v4084_v53 }
 0x78d   :  { %1533 = vmatprep.subr.bf16.mxu1 %v4156_v48  ;;  %2855 = vmatprep.subr.bf16.mxu0 %v4703_v47 }
 0x790   :  { %1534 = vmatpush1.bf16.msra.mxu1 %v4163_v18  ;;  %2856 = vmatpush3.bf16.msra.mxu0 %v4093_v41 }
 0x791   :  { %1628 = vmatprep.subr.bf16.mxu1 %v3958_v15  ;;  %2861 = vmatprep.subr.bf16.mxu0 %v4703_v47 }
 0x846   :  { %v1444_v40 = vpop.f32.mrb[52].mxu1  ;;  %v1485_v11 = vpop.f32.mrb[52].mxu0 }
 0x847   :  { %v1445_v58 = vadd.f32 %v1444_v40, %v3761_v17  ;;  %v1446_v6 = vpop.f32.mrb[53].mxu1  ;;  %v2839_v2 = vpop.f32.mrb[53].mxu0  ;;  %v1486_v23 = vadd.f32 %v1485_v11, %v3775_v1 }
 0x848   :  { %v1447_v54 = vadd.f32 %v1446_v6, %v3765_v13  ;;  %v1448_v5 = vpop.f32.mrb[54].mxu1  ;;  %v1488_v50 = vpop.f32.mrb[54].mxu0 }
 0x849   :  { %v1491_v43 = vadd.f32 %v1445_v58, %v4709_v42  ;;  %v1449_v46 = vpop.f32.mrb[55].mxu1  ;;  %v2840_v44 = vpop.f32.mrb[55].mxu0 }
 0x84a   :  { %v1498_v24 = vadd.f32 %v1447_v54, %v4710_v16  ;;  %v4712_v54 = vld [vmem:[#allocation20_spill] sm:$0xff] }
 0x84b   :  { %v2483_v45 = vmul.f32 -1.442695, %v1491_v43  ;;  %v4713_v43 = vld [vmem:[#allocation22_spill] sm:$0xff] }
 0x84c   :  { %v2484_v62 = vmul.f32 -1.442695, %v1498_v24 }
 0x84d   :  { %3139 = vpow2.f32 %v2483_v45 }
 0x84e   :  { %3141 = vpow2.f32 %v2484_v62 }
 0x857   :  { %v3140_v3 = vpop.eup %3139 }
 0x858   :  { %v1495_v19 = vadd.f32 1.0, %v3140_v3  ;;  %v3142_v21 = vpop.eup %3141 }
 0x859   :  { %v1502_v22 = vadd.f32 1.0, %v3142_v21 }
 0x85a   :  { %3143 = vrcp.f32 %v1495_v19 }
 0x85b   :  { %3145 = vrcp.f32 %v1502_v22 }
 0x864   :  { %v3144_v25 = vpop.eup %3143 }
 0x865   :  { %v1505_v26 = vmul.f32 %v3144_v25, %v1486_v23  ;;  %v3146_v30 = vpop.eup %3145  ;;  %v4714_v23 = vld [vmem:[#allocation21_spill] sm:$0xff] }
 0x866   :  { %v1508_v32 = vsub.f32 1.0, %v3146_v30  ;;  %v1510_v35 = vmul.f32 %v3146_v30, %v4176_v31 }
 0x867   :  { %v1506_v28 = vadd.f32 %v1505_v26, %v4711_v27 }
 0x869   :  { %3147 = vtanh.f32 %v1506_v28 }
 0x873   :  { %v3148_v33 = vpop.eup %3147 }
 0x874   :  { %v1509_v34 = vmul.f32 %v3148_v33, %v1508_v32 }
 0x876   :  { %v4222_v14 = vadd.f32 %v1510_v35, %v1509_v34 }
 0x878   :  { %v1518_v36 = vpack.c.bf16 %v4222_v14, %v4222_v14 }
 0x87a   :  { %1552 = vmatmul.mubr.bf16.vlgmr.msra.gmra.mrb[56].mxu1 %v1518_v36  ;;  %2858 = vmatmul.mubr.bf16.vlgmr.msra.gmra.mrb[56].mxu0 %v1518_v36 }
 0x87b   :  { %1629 = vmatpush1.bf16.msra.mxu1 %v3976_v57  ;;  %2862 = vmatpush3.bf16.msra.mxu0 %v3982_v8 }
 0x87c   :  { %1630 = vmatprep.subr.bf16.mxu1 %v3988_v59  ;;  %2863 = vmatprep.subr.bf16.mxu0 %v4703_v47 }
 0x87d   :  { %1660 = vmatprep.mubr.bf16.mxu1 %v4704_v61  ;;  %2877 = vmatprep.mubr.msk.bf16.mxu0 %vm3279_vm1, %v4703_v47 }
 0x87f   :  { %1631 = vmatpush1.bf16.msra.mxu1 %v3998_v51  ;;  %2864 = vmatpush3.bf16.msra.mxu0 %v4004_v12 }
 0x880   :  { %1632 = vmatprep.subr.bf16.mxu1 %v4010_v56  ;;  %2865 = vmatprep.subr.bf16.mxu0 %v4703_v47 }
 0x883   :  { %1633 = vmatpush1.bf16.msra.mxu1 %v4017_v20  ;;  %2866 = vmatpush3.bf16.msra.mxu0 %v4023_v7 }
 0x884   :  { %1634 = vmatprep.subr.bf16.mxu1 %v4029_v0  ;;  %2867 = vmatprep.subr.bf16.mxu0 %v4703_v47 }
 0x887   :  { %1635 = vmatpush1.bf16.msra.mxu1 %v4036_v9  ;;  %2868 = vmatpush3.bf16.msra.mxu0 %v4042_v37 }
 0x888   :  { %1636 = vmatprep.subr.bf16.mxu1 %v4048_v4  ;;  %2869 = vmatprep.subr.bf16.mxu0 %v4703_v47 }
 0x88b   :  { %1637 = vmatpush1.bf16.msra.mxu1 %v4055_v52  ;;  %2870 = vmatpush3.bf16.msra.mxu0 %v4061_v10 }
 0x88c   :  { %1638 = vmatprep.subr.bf16.mxu1 %v4067_v29  ;;  %2871 = vmatprep.subr.bf16.mxu0 %v4703_v47 }
 0x88f   :  { %1639 = vmatpush1.bf16.msra.mxu1 %v4135_v60  ;;  %2872 = vmatpush3.bf16.msra.mxu0 %v4075_v55 }
 0x890   :  { %1640 = vmatprep.subr.bf16.mxu1 %v4142_v49  ;;  %2873 = vmatprep.subr.bf16.mxu0 %v4703_v47 }
 0x893   :  { %1641 = vmatpush1.bf16.msra.mxu1 %v4149_v63  ;;  %2874 = vmatpush3.bf16.msra.mxu0 %v4084_v53 }
 0x894   :  { %1642 = vmatprep.subr.bf16.mxu1 %v4156_v48  ;;  %2875 = vmatprep.subr.bf16.mxu0 %v4703_v47 }
 0x897   :  { %1643 = vmatpush1.bf16.msra.mxu1 %v4163_v18  ;;  %2876 = vmatpush3.bf16.msra.mxu0 %v4093_v41 }
 0x898   :  { %1737 = vmatprep.subr.bf16.mxu1 %v3958_v15  ;;  %2881 = vmatprep.subr.bf16.mxu0 %v4703_v47 }
 0x94d   :  { %v1553_v38 = vpop.f32.mrb[56].mxu1  ;;  %v1594_v31 = vpop.f32.mrb[56].mxu0 }
 0x94e   :  { %v1554_v39 = vadd.f32 %v1553_v38, %v3761_v17  ;;  %v1555_v40 = vpop.f32.mrb[57].mxu1  ;;  %v2859_v11 = vpop.f32.mrb[57].mxu0  ;;  %v1595_v19 = vadd.f32 %v1594_v31, %v3775_v1 }
 0x94f   :  { %v1556_v58 = vadd.f32 %v1555_v40, %v3765_v13  ;;  %v1557_v6 = vpop.f32.mrb[58].mxu1  ;;  %v1597_v2 = vpop.f32.mrb[58].mxu0 }
 0x950   :  { %v1600_v5 = vadd.f32 %v1554_v39, %v4712_v54  ;;  %v1558_v50 = vpop.f32.mrb[59].mxu1  ;;  %v2860_v42 = vpop.f32.mrb[59].mxu0 }
 0x951   :  { %v1607_v46 = vadd.f32 %v1556_v58, %v4713_v43  ;;  %v4715_v58 = vld [vmem:[#allocation24_spill] sm:$0xff] }
 0x952   :  { %v2485_v44 = vmul.f32 -1.442695, %v1600_v5  ;;  %v4716_v5 = vld [vmem:[#allocation26_spill] sm:$0xff] }
 0x953   :  { %v2486_v16 = vmul.f32 -1.442695, %v1607_v46 }
 0x954   :  { %3149 = vpow2.f32 %v2485_v44 }
 0x955   :  { %3151 = vpow2.f32 %v2486_v16 }
 0x95e   :  { %v3150_v24 = vpop.eup %3149 }
 0x95f   :  { %v1604_v45 = vadd.f32 1.0, %v3150_v24  ;;  %v3152_v62 = vpop.eup %3151 }
 0x960   :  { %v1611_v3 = vadd.f32 1.0, %v3152_v62 }
 0x961   :  { %3153 = vrcp.f32 %v1604_v45 }
 0x962   :  { %3155 = vrcp.f32 %v1611_v3 }
 0x96b   :  { %v3154_v21 = vpop.eup %3153 }
 0x96c   :  { %v1614_v22 = vmul.f32 %v3154_v21, %v1595_v19  ;;  %v3156_v26 = vpop.eup %3155  ;;  %v4717_v19 = vld [vmem:[#allocation25_spill] sm:$0xff] }
 0x96d   :  { %v1617_v27 = vsub.f32 1.0, %v3156_v26  ;;  %v1619_v32 = vmul.f32 %v3156_v26, %v4222_v14 }
 0x96e   :  { %v1615_v25 = vadd.f32 %v1614_v22, %v4714_v23 }
 0x970   :  { %3157 = vtanh.f32 %v1615_v25 }
 0x97a   :  { %v3158_v28 = vpop.eup %3157 }
 0x97b   :  { %v1618_v30 = vmul.f32 %v3158_v28, %v1617_v27 }
 0x97d   :  { %v4268_v33 = vadd.f32 %v1619_v32, %v1618_v30 }
 0x97f   :  { %v1627_v34 = vpack.c.bf16 %v4268_v33, %v4268_v33 }
 0x981   :  { %1661 = vmatmul.mubr.bf16.vlgmr.msra.gmra.mrb[60].mxu1 %v1627_v34  ;;  %2878 = vmatmul.mubr.bf16.vlgmr.msra.gmra.mrb[60].mxu0 %v1627_v34 }
 0x982   :  { %1738 = vmatpush1.bf16.msra.mxu1 %v3976_v57  ;;  %2882 = vmatpush3.bf16.msra.mxu0 %v3982_v8 }
 0x983   :  { %1739 = vmatprep.subr.bf16.mxu1 %v3988_v59  ;;  %2883 = vmatprep.subr.bf16.mxu0 %v4703_v47 }
 0x984   :  { %1769 = vmatprep.mubr.bf16.mxu1 %v4704_v61  ;;  %2897 = vmatprep.mubr.msk.bf16.mxu0 %vm3279_vm1, %v4703_v47 }
 0x986   :  { %1740 = vmatpush1.bf16.msra.mxu1 %v3998_v51  ;;  %2884 = vmatpush3.bf16.msra.mxu0 %v4004_v12 }
 0x987   :  { %1741 = vmatprep.subr.bf16.mxu1 %v4010_v56  ;;  %2885 = vmatprep.subr.bf16.mxu0 %v4703_v47 }
 0x98a   :  { %1742 = vmatpush1.bf16.msra.mxu1 %v4017_v20  ;;  %2886 = vmatpush3.bf16.msra.mxu0 %v4023_v7 }
 0x98b   :  { %1743 = vmatprep.subr.bf16.mxu1 %v4029_v0  ;;  %2887 = vmatprep.subr.bf16.mxu0 %v4703_v47 }
 0x98e   :  { %1744 = vmatpush1.bf16.msra.mxu1 %v4036_v9  ;;  %2888 = vmatpush3.bf16.msra.mxu0 %v4042_v37 }
 0x98f   :  { %1745 = vmatprep.subr.bf16.mxu1 %v4048_v4  ;;  %2889 = vmatprep.subr.bf16.mxu0 %v4703_v47 }
 0x992   :  { %1746 = vmatpush1.bf16.msra.mxu1 %v4055_v52  ;;  %2890 = vmatpush3.bf16.msra.mxu0 %v4061_v10 }
 0x993   :  { %1747 = vmatprep.subr.bf16.mxu1 %v4067_v29  ;;  %2891 = vmatprep.subr.bf16.mxu0 %v4703_v47 }
 0x996   :  { %1748 = vmatpush1.bf16.msra.mxu1 %v4135_v60  ;;  %2892 = vmatpush3.bf16.msra.mxu0 %v4075_v55 }
 0x997   :  { %1749 = vmatprep.subr.bf16.mxu1 %v4142_v49  ;;  %2893 = vmatprep.subr.bf16.mxu0 %v4703_v47 }
 0x99a   :  { %1750 = vmatpush1.bf16.msra.mxu1 %v4149_v63  ;;  %2894 = vmatpush3.bf16.msra.mxu0 %v4084_v53 }
 0x99b   :  { %1751 = vmatprep.subr.bf16.mxu1 %v4156_v48  ;;  %2895 = vmatprep.subr.bf16.mxu0 %v4703_v47 }
 0x99e   :  { %1752 = vmatpush1.bf16.msra.mxu1 %v4163_v18  ;;  %2896 = vmatpush3.bf16.msra.mxu0 %v4093_v41 }
 0x99f   :  { %1846 = vmatprep.subr.bf16.mxu1 %v3958_v15  ;;  %2901 = vmatprep.subr.bf16.mxu0 %v4703_v47 }
 0xa54   :  { %v1662_v35 = vpop.f32.mrb[60].mxu1  ;;  %v1703_v14 = vpop.f32.mrb[60].mxu0 }
 0xa55   :  { %v1663_v36 = vadd.f32 %v1662_v35, %v3761_v17  ;;  %v1664_v38 = vpop.f32.mrb[61].mxu1  ;;  %v2879_v31 = vpop.f32.mrb[61].mxu0  ;;  %v1704_v45 = vadd.f32 %v1703_v14, %v3775_v1 }
 0xa56   :  { %v1665_v39 = vadd.f32 %v1664_v38, %v3765_v13  ;;  %v1666_v40 = vpop.f32.mrb[62].mxu1  ;;  %v1706_v11 = vpop.f32.mrb[62].mxu0 }
 0xa57   :  { %v1709_v6 = vadd.f32 %v1663_v36, %v4715_v58  ;;  %v1667_v2 = vpop.f32.mrb[63].mxu1  ;;  %v2880_v54 = vpop.f32.mrb[63].mxu0 }
 0xa58   :  { %v1716_v50 = vadd.f32 %v1665_v39, %v4716_v5  ;;  %v4718_v39 = vld [vmem:[#allocation28_spill] sm:$0xff] }
 0xa59   :  { %v2487_v42 = vmul.f32 -1.442695, %v1709_v6  ;;  %v4719_v6 = vld [vmem:[#allocation30_spill] sm:$0xff] }
 0xa5a   :  { %v2488_v43 = vmul.f32 -1.442695, %v1716_v50 }
 0xa5b   :  { %3159 = vpow2.f32 %v2487_v42 }
 0xa5c   :  { %3161 = vpow2.f32 %v2488_v43 }
 0xa65   :  { %v3160_v46 = vpop.eup %3159 }
 0xa66   :  { %v1713_v44 = vadd.f32 1.0, %v3160_v46  ;;  %v3162_v16 = vpop.eup %3161 }
 0xa67   :  { %v1720_v24 = vadd.f32 1.0, %v3162_v16 }
 0xa68   :  { %3163 = vrcp.f32 %v1713_v44 }
 0xa69   :  { %3165 = vrcp.f32 %v1720_v24 }
 0xa72   :  { %v3164_v62 = vpop.eup %3163 }
 0xa73   :  { %v1723_v3 = vmul.f32 %v3164_v62, %v1704_v45  ;;  %v3166_v22 = vpop.eup %3165  ;;  %v4720_v45 = vld [vmem:[#allocation19_spill] sm:$0xff] }
 0xa74   :  { %v1726_v23 = vsub.f32 1.0, %v3166_v22  ;;  %v1728_v27 = vmul.f32 %v3166_v22, %v4268_v33 }
 0xa75   :  { %v1724_v21 = vadd.f32 %v1723_v3, %v4717_v19 }
 0xa77   :  { %3167 = vtanh.f32 %v1724_v21 }
 0xa81   :  { %v3168_v25 = vpop.eup %3167 }
 0xa82   :  { %v1727_v26 = vmul.f32 %v3168_v25, %v1726_v23 }
 0xa84   :  { %v4314_v28 = vadd.f32 %v1728_v27, %v1727_v26 }
 0xa86   :  { %v1736_v30 = vpack.c.bf16 %v4314_v28, %v4314_v28 }
 0xa88   :  { %1770 = vmatmul.mubr.bf16.vlgmr.msra.gmra.mrb[64].mxu1 %v1736_v30  ;;  %2898 = vmatmul.mubr.bf16.vlgmr.msra.gmra.mrb[64].mxu0 %v1736_v30 }
 0xa89   :  { %1847 = vmatpush1.bf16.msra.mxu1 %v3976_v57  ;;  %2902 = vmatpush3.bf16.msra.mxu0 %v3982_v8 }
 0xa8a   :  { %1848 = vmatprep.subr.bf16.mxu1 %v3988_v59  ;;  %2903 = vmatprep.subr.bf16.mxu0 %v4703_v47 }
 0xa8b   :  { %1878 = vmatprep.mubr.bf16.mxu1 %v4704_v61  ;;  %2917 = vmatprep.mubr.msk.bf16.mxu0 %vm3279_vm1, %v4703_v47 }
 0xa8d   :  { %1849 = vmatpush1.bf16.msra.mxu1 %v3998_v51  ;;  %2904 = vmatpush3.bf16.msra.mxu0 %v4004_v12 }
 0xa8e   :  { %1850 = vmatprep.subr.bf16.mxu1 %v4010_v56  ;;  %2905 = vmatprep.subr.bf16.mxu0 %v4703_v47 }
 0xa91   :  { %1851 = vmatpush1.bf16.msra.mxu1 %v4017_v20  ;;  %2906 = vmatpush3.bf16.msra.mxu0 %v4023_v7 }
 0xa92   :  { %1852 = vmatprep.subr.bf16.mxu1 %v4029_v0  ;;  %2907 = vmatprep.subr.bf16.mxu0 %v4703_v47 }
 0xa95   :  { %1853 = vmatpush1.bf16.msra.mxu1 %v4036_v9  ;;  %2908 = vmatpush3.bf16.msra.mxu0 %v4042_v37 }
 0xa96   :  { %1854 = vmatprep.subr.bf16.mxu1 %v4048_v4  ;;  %2909 = vmatprep.subr.bf16.mxu0 %v4703_v47 }
 0xa99   :  { %1855 = vmatpush1.bf16.msra.mxu1 %v4055_v52  ;;  %2910 = vmatpush3.bf16.msra.mxu0 %v4061_v10 }
 0xa9a   :  { %1856 = vmatprep.subr.bf16.mxu1 %v4067_v29  ;;  %2911 = vmatprep.subr.bf16.mxu0 %v4703_v47 }
 0xa9d   :  { %1857 = vmatpush1.bf16.msra.mxu1 %v4135_v60  ;;  %2912 = vmatpush3.bf16.msra.mxu0 %v4075_v55 }
 0xa9e   :  { %1858 = vmatprep.subr.bf16.mxu1 %v4142_v49  ;;  %2913 = vmatprep.subr.bf16.mxu0 %v4703_v47 }
 0xaa1   :  { %1859 = vmatpush1.bf16.msra.mxu1 %v4149_v63  ;;  %2914 = vmatpush3.bf16.msra.mxu0 %v4084_v53 }
 0xaa2   :  { %1860 = vmatprep.subr.bf16.mxu1 %v4156_v48  ;;  %2915 = vmatprep.subr.bf16.mxu0 %v4703_v47 }
 0xaa5   :  { %1861 = vmatpush1.bf16.msra.mxu1 %v4163_v18  ;;  %2916 = vmatpush3.bf16.msra.mxu0 %v4093_v41 }
 0xaa6   :  { %1955 = vmatprep.subr.bf16.mxu1 %v3958_v15  ;;  %2921 = vmatprep.subr.bf16.mxu0 %v4703_v47 }
 0xb5b   :  { %v1771_v32 = vpop.f32.mrb[64].mxu1  ;;  %v1812_v33 = vpop.f32.mrb[64].mxu0 }
 0xb5c   :  { %v1772_v34 = vadd.f32 %v1771_v32, %v3761_v17  ;;  %v1773_v35 = vpop.f32.mrb[65].mxu1  ;;  %v2899_v14 = vpop.f32.mrb[65].mxu0  ;;  %v1813_v44 = vadd.f32 %v1812_v33, %v3775_v1 }
 0xb5d   :  { %v1774_v36 = vadd.f32 %v1773_v35, %v3765_v13  ;;  %v1775_v38 = vpop.f32.mrb[66].mxu1  ;;  %v1815_v31 = vpop.f32.mrb[66].mxu0 }
 0xb5e   :  { %v1818_v40 = vadd.f32 %v1772_v34, %v4718_v39  ;;  %v1776_v11 = vpop.f32.mrb[67].mxu1  ;;  %v2900_v58 = vpop.f32.mrb[67].mxu0 }
 0xb5f   :  { %v1825_v2 = vadd.f32 %v1774_v36, %v4719_v6  ;;  %v4721_v36 = vld [vmem:[#allocation32_spill] sm:$0xff] }
 0xb60   :  { %v2489_v54 = vmul.f32 -1.442695, %v1818_v40  ;;  %v4722_v40 = vld [vmem:[#allocation34_spill] sm:$0xff] }
 0xb61   :  { %v2490_v5 = vmul.f32 -1.442695, %v1825_v2 }
 0xb62   :  { %3169 = vpow2.f32 %v2489_v54 }
 0xb63   :  { %3171 = vpow2.f32 %v2490_v5 }
 0xb6c   :  { %v3170_v50 = vpop.eup %3169 }
 0xb6d   :  { %v1822_v42 = vadd.f32 1.0, %v3170_v50  ;;  %v3172_v43 = vpop.eup %3171 }
 0xb6e   :  { %v1829_v46 = vadd.f32 1.0, %v3172_v43 }
 0xb6f   :  { %3173 = vrcp.f32 %v1822_v42 }
 0xb70   :  { %3175 = vrcp.f32 %v1829_v46  ;;  %v4723_v46 = vld [vmem:[#allocation23_spill] sm:$0xff] }
 0xb79   :  { %v3174_v16 = vpop.eup %3173 }
 0xb7a   :  { %v1832_v24 = vmul.f32 %v3174_v16, %v1813_v44  ;;  %v3176_v3 = vpop.eup %3175 }
 0xb7b   :  { %v1835_v19 = vsub.f32 1.0, %v3176_v3  ;;  %v1837_v23 = vmul.f32 %v3176_v3, %v4314_v28 }
 0xb7c   :  { %v1833_v62 = vadd.f32 %v1832_v24, %v4720_v45 }
 0xb7e   :  { %3177 = vtanh.f32 %v1833_v62 }
 0xb88   :  { %v3178_v21 = vpop.eup %3177 }
 0xb89   :  { %v1836_v22 = vmul.f32 %v3178_v21, %v1835_v19 }
 0xb8b   :  { %v4360_v25 = vadd.f32 %v1837_v23, %v1836_v22 }
 0xb8d   :  { %v1845_v26 = vpack.c.bf16 %v4360_v25, %v4360_v25 }
 0xb8f   :  { %1879 = vmatmul.mubr.bf16.vlgmr.msra.gmra.mrb[68].mxu1 %v1845_v26  ;;  %2918 = vmatmul.mubr.bf16.vlgmr.msra.gmra.mrb[68].mxu0 %v1845_v26 }
 0xb90   :  { %1956 = vmatpush1.bf16.msra.mxu1 %v3976_v57  ;;  %2922 = vmatpush3.bf16.msra.mxu0 %v3982_v8 }
 0xb91   :  { %1957 = vmatprep.subr.bf16.mxu1 %v3988_v59  ;;  %2923 = vmatprep.subr.bf16.mxu0 %v4703_v47 }
 0xb92   :  { %1987 = vmatprep.mubr.bf16.mxu1 %v4704_v61  ;;  %2937 = vmatprep.mubr.msk.bf16.mxu0 %vm3279_vm1, %v4703_v47 }
 0xb94   :  { %1958 = vmatpush1.bf16.msra.mxu1 %v3998_v51  ;;  %2924 = vmatpush3.bf16.msra.mxu0 %v4004_v12 }
 0xb95   :  { %1959 = vmatprep.subr.bf16.mxu1 %v4010_v56  ;;  %2925 = vmatprep.subr.bf16.mxu0 %v4703_v47 }
 0xb98   :  { %1960 = vmatpush1.bf16.msra.mxu1 %v4017_v20  ;;  %2926 = vmatpush3.bf16.msra.mxu0 %v4023_v7 }
 0xb99   :  { %1961 = vmatprep.subr.bf16.mxu1 %v4029_v0  ;;  %2927 = vmatprep.subr.bf16.mxu0 %v4703_v47 }
 0xb9c   :  { %1962 = vmatpush1.bf16.msra.mxu1 %v4036_v9  ;;  %2928 = vmatpush3.bf16.msra.mxu0 %v4042_v37 }
 0xb9d   :  { %1963 = vmatprep.subr.bf16.mxu1 %v4048_v4  ;;  %2929 = vmatprep.subr.bf16.mxu0 %v4703_v47 }
 0xba0   :  { %1964 = vmatpush1.bf16.msra.mxu1 %v4055_v52  ;;  %2930 = vmatpush3.bf16.msra.mxu0 %v4061_v10 }
 0xba1   :  { %1965 = vmatprep.subr.bf16.mxu1 %v4067_v29  ;;  %2931 = vmatprep.subr.bf16.mxu0 %v4703_v47 }
 0xba4   :  { %1966 = vmatpush1.bf16.msra.mxu1 %v4135_v60  ;;  %2932 = vmatpush3.bf16.msra.mxu0 %v4075_v55 }
 0xba5   :  { %1967 = vmatprep.subr.bf16.mxu1 %v4142_v49  ;;  %2933 = vmatprep.subr.bf16.mxu0 %v4703_v47 }
 0xba8   :  { %1968 = vmatpush1.bf16.msra.mxu1 %v4149_v63  ;;  %2934 = vmatpush3.bf16.msra.mxu0 %v4084_v53 }
 0xba9   :  { %1969 = vmatprep.subr.bf16.mxu1 %v4156_v48  ;;  %2935 = vmatprep.subr.bf16.mxu0 %v4703_v47 }
 0xbac   :  { %1970 = vmatpush1.bf16.msra.mxu1 %v4163_v18  ;;  %2936 = vmatpush3.bf16.msra.mxu0 %v4093_v41 }
 0xbad   :  { %2064 = vmatprep.subr.bf16.mxu1 %v3958_v15  ;;  %2941 = vmatprep.subr.bf16.mxu0 %v4703_v47 }
 0xc62   :  { %v1880_v27 = vpop.f32.mrb[68].mxu1  ;;  %v1921_v28 = vpop.f32.mrb[68].mxu0 }
 0xc63   :  { %v1881_v30 = vadd.f32 %v1880_v27, %v3761_v17  ;;  %v1882_v32 = vpop.f32.mrb[69].mxu1  ;;  %v2919_v33 = vpop.f32.mrb[69].mxu0  ;;  %v1922_v50 = vadd.f32 %v1921_v28, %v3775_v1 }
 0xc64   :  { %v1883_v34 = vadd.f32 %v1882_v32, %v3765_v13  ;;  %v1884_v35 = vpop.f32.mrb[70].mxu1  ;;  %v1924_v14 = vpop.f32.mrb[70].mxu0 }
 0xc65   :  { %v1927_v38 = vadd.f32 %v1881_v30, %v4721_v36  ;;  %v1885_v31 = vpop.f32.mrb[71].mxu1  ;;  %v2920_v39 = vpop.f32.mrb[71].mxu0  ;;  %v4726_v30 = vld [vmem:[#allocation29_spill] sm:$0xff] }
 0xc66   :  { %v1934_v11 = vadd.f32 %v1883_v34, %v4722_v40  ;;  %v4464_v39 = vld [vmem:[%s4658_s2] ss:$12 sps:$4 sm:$0xff]   ;;  %v4470_v40 = vld [vmem:[%s4658_s2 + $0x8] ss:$12 sps:$4 sm:$0xff]  }
 0xc67   :  { %v2491_v58 = vmul.f32 -1.442695, %v1927_v38 }
 0xc68   :  { %v2492_v15 = vmul.f32 -1.442695, %v1934_v11  ;;  %v4476_v11 = vld [vmem:[%s4658_s2 + $0x1c] ss:$12 sps:$4 sm:$0xff]  }
 0xc69   :  { %3179 = vpow2.f32 %v2491_v58  ;;  %v4486_v58 = vld [vmem:[%s4658_s2 + $0x18] ss:$12 sps:$4 sm:$0xff]  }
 0xc6a   :  { %3181 = vpow2.f32 %v2492_v15  ;;  %v4492_v15 = vld [vmem:[%s4658_s2 + $0x20] ss:$12 sps:$4 sm:$0xff]  }
 0xc73   :  { %v3180_v6 = vpop.eup %3179 }
 0xc74   :  { %v1931_v2 = vadd.f32 1.0, %v3180_v6  ;;  %v3182_v54 = vpop.eup %3181  ;;  %v4498_v6 = vld [vmem:[%s4658_s2 + $0x34] ss:$12 sps:$4 sm:$0xff]  }
 0xc75   :  { %v1938_v5 = vadd.f32 1.0, %v3182_v54  ;;  %v4511_v54 = vld [vmem:[%s4658_s2 + $0x38] ss:$12 sps:$4 sm:$0xff]  }
 0xc76   :  { %3183 = vrcp.f32 %v1931_v2  ;;  %v4505_v2 = vld [vmem:[%s4658_s2 + $0x30] ss:$12 sps:$4 sm:$0xff]  }
 0xc77   :  { %3185 = vrcp.f32 %v1938_v5  ;;  %v4517_v5 = vld [vmem:[%s4658_s2 + $0x4c] ss:$12 sps:$4 sm:$0xff]  }
 0xc80   :  { %v3184_v42 = vpop.eup %3183 }
 0xc81   :  { %v1941_v43 = vmul.f32 %v3184_v42, %v1922_v50  ;;  %v3186_v16 = vpop.eup %3185  ;;  %v4524_v50 = vld [vmem:[%s4658_s2 + $0x48] ss:$12 sps:$4 sm:$0xff]   ;;  %v4530_v42 = vld [vmem:[%s4658_s2 + $0x50] ss:$12 sps:$4 sm:$0xff]  }
 0xc82   :  { %v1944_v24 = vsub.f32 1.0, %v3186_v16  ;;  %v1946_v3 = vmul.f32 %v3186_v16, %v4360_v25  ;;  %v4555_v16 = vld [vmem:[%s4658_s2 + $0x7c] ss:$12 sps:$4 sm:$0xff]  }
 0xc83   :  { %v1942_v44 = vadd.f32 %v1941_v43, %v4723_v46  ;;  %v4536_v43 = vld [vmem:[%s4658_s2 + $0x64] ss:$12 sps:$4 sm:$0xff]   ;;  %v4543_v46 = vld [vmem:[%s4658_s2 + $0x60] ss:$12 sps:$4 sm:$0xff]  }
 0xc85   :  { %3187 = vtanh.f32 %v1942_v44  ;;  %v4549_v44 = vld [vmem:[%s4658_s2 + $0x68] ss:$12 sps:$4 sm:$0xff]  }
 0xc8f   :  { %v3188_v45 = vpop.eup %3187 }
 0xc90   :  { %v1945_v62 = vmul.f32 %v3188_v45, %v1944_v24  ;;  %v4563_v24 = vld [vmem:[%s4658_s2 + $0x80] ss:$12 sps:$4 sm:$0xff]   ;;  %v4572_v45 = vld [vmem:[%s4658_s2 + $0x98] ss:$12 sps:$4 sm:$0xff]  }
 0xc92   :  { %v4406_v19 = vadd.f32 %v1946_v3, %v1945_v62 }
 0xc94   :  { %v1954_v21 = vpack.c.bf16 %v4406_v19, %v4406_v19 }
 0xc96   :  { %1988 = vmatmul.mubr.bf16.vlgmr.msra.gmra.mrb[72].mxu1 %v1954_v21  ;;  %2938 = vmatmul.mubr.bf16.vlgmr.msra.gmra.mrb[72].mxu0 %v1954_v21 }
 0xc97   :  { %2065 = vmatpush1.bf16.msra.mxu1 %v3976_v57  ;;  %2942 = vmatpush3.bf16.msra.mxu0 %v3982_v8  ;;  %v4446_v57 = vld [vmem:[%s4658_s2 + $0x4] ss:$12 sps:$4 sm:$0xff]  }
 0xc98   :  { %2066 = vmatprep.subr.bf16.mxu1 %v3988_v59  ;;  %2943 = vmatprep.subr.bf16.mxu0 %v4703_v47 }
 0xc99   :  { %2096 = vmatprep.mubr.bf16.mxu1 %v4704_v61  ;;  %2957 = vmatprep.mubr.msk.bf16.mxu0 %vm3279_vm1, %v4703_v47 }
 0xc9b   :  { %2067 = vmatpush1.bf16.msra.mxu1 %v3998_v51  ;;  %2944 = vmatpush3.bf16.msra.mxu0 %v4004_v12 }
 0xc9c   :  { %2068 = vmatprep.subr.bf16.mxu1 %v4010_v56  ;;  %2945 = vmatprep.subr.bf16.mxu0 %v4703_v47 }
 0xc9f   :  { %2069 = vmatpush1.bf16.msra.mxu1 %v4017_v20  ;;  %2946 = vmatpush3.bf16.msra.mxu0 %v4023_v7 }
 0xca0   :  { %2070 = vmatprep.subr.bf16.mxu1 %v4029_v0  ;;  %2947 = vmatprep.subr.bf16.mxu0 %v4703_v47 }
 0xca3   :  { %2071 = vmatpush1.bf16.msra.mxu1 %v4036_v9  ;;  %2948 = vmatpush3.bf16.msra.mxu0 %v4042_v37  ;;  %v4724_v9 = vld [vmem:[#allocation4_spill] sm:$0xff] }
 0xca4   :  { %2072 = vmatprep.subr.bf16.mxu1 %v4048_v4  ;;  %2949 = vmatprep.subr.bf16.mxu0 %v4703_v47 }
 0xca7   :  { %2073 = vmatpush1.bf16.msra.mxu1 %v4055_v52  ;;  %2950 = vmatpush3.bf16.msra.mxu0 %v4061_v10  ;;  %v4725_v10 = vld [vmem:[#allocation5_spill] sm:$0xff] }
 0xca8   :  { %2074 = vmatprep.subr.bf16.mxu1 %v4067_v29  ;;  %2951 = vmatprep.subr.bf16.mxu0 %v4703_v47 }
 0xcab   :  { %2075 = vmatpush1.bf16.msra.mxu1 %v4135_v60  ;;  %2952 = vmatpush3.bf16.msra.mxu0 %v4075_v55 }
 0xcac   :  { %2076 = vmatprep.subr.bf16.mxu1 %v4142_v49  ;;  %2953 = vmatprep.subr.bf16.mxu0 %v4703_v47 }
 0xcaf   :  { %2077 = vmatpush1.bf16.msra.mxu1 %v4149_v63  ;;  %2954 = vmatpush3.bf16.msra.mxu0 %v4084_v53 }
 0xcb0   :  { %2078 = vmatprep.subr.bf16.mxu1 %v4156_v48  ;;  %2955 = vmatprep.subr.bf16.mxu0 %v4703_v47 }
 0xcb3   :  { %2079 = vmatpush1.bf16.msra.mxu1 %v4163_v18  ;;  %2956 = vmatpush3.bf16.msra.mxu0 %v4093_v41 }
 0xcb4   :  { %2173 = vmatprep.subr.bf16.mxu1 %v4446_v57  ;;  %2961 = vmatprep.subr.bf16.mxu0 %v4703_v47 }
 0xd69   :  { %v1989_v8 = vpop.f32.mrb[72].mxu1  ;;  %v2030_v59 = vpop.f32.mrb[72].mxu0 }
 0xd6a   :  { %v1990_v51 = vadd.f32 %v1989_v8, %v3761_v17  ;;  %v1991_v12 = vpop.f32.mrb[73].mxu1  ;;  %v2939_v56 = vpop.f32.mrb[73].mxu0  ;;  %v2031_v26 = vadd.f32 %v2030_v59, %v3775_v1  ;;  %v4727_v8 = vld [vmem:[#allocation6_spill] sm:$0xff] }
 0xd6b   :  { %v1992_v20 = vadd.f32 %v1991_v12, %v3765_v13  ;;  %v1993_v7 = vpop.f32.mrb[74].mxu1  ;;  %v2033_v0 = vpop.f32.mrb[74].mxu0  ;;  %v4728_v56 = vld [vmem:[#allocation7_spill] sm:$0xff] }
 0xd6c   :  { %v2036_v37 = vadd.f32 %v1990_v51, %v4724_v9  ;;  %v1994_v4 = vpop.f32.mrb[75].mxu1  ;;  %v2940_v52 = vpop.f32.mrb[75].mxu0 }
 0xd6d   :  { %v2043_v29 = vadd.f32 %v1992_v20, %v4725_v10 }
 0xd6e   :  { %v2493_v55 = vmul.f32 -1.442695, %v2036_v37 }
 0xd6f   :  { %v2494_v53 = vmul.f32 -1.442695, %v2043_v29 }
 0xd70   :  { %3189 = vpow2.f32 %v2493_v55  ;;  %v4729_v55 = vld [vmem:[#allocation33_spill] sm:$0xff] }
 0xd71   :  { %3191 = vpow2.f32 %v2494_v53 }
 0xd7a   :  { %v3190_v41 = vpop.eup %3189 }
 0xd7b   :  { %v2040_v22 = vadd.f32 1.0, %v3190_v41  ;;  %v3192_v23 = vpop.eup %3191 }
 0xd7c   :  { %v2047_v25 = vadd.f32 1.0, %v3192_v23 }
 0xd7d   :  { %3193 = vrcp.f32 %v2040_v22 }
 0xd7e   :  { %3195 = vrcp.f32 %v2047_v25 }
 0xd87   :  { %v3194_v27 = vpop.eup %3193 }
 0xd88   :  { %v2050_v28 = vmul.f32 %v3194_v27, %v2031_v26  ;;  %v3196_v33 = vpop.eup %3195 }
 0xd89   :  { %v2053_v34 = vsub.f32 1.0, %v3196_v33  ;;  %v2055_v36 = vmul.f32 %v3196_v33, %v4406_v19  ;;  %v3275_v33 = vld [vmem:[%s4658_s2 + $0xac] ss:$12 sps:$4 sm:$0xff]  }
 0xd8a   :  { %v2051_v32 = vadd.f32 %v2050_v28, %v4726_v30  ;;  %v3273_v30 = vld [vmem:[%s4658_s2 + $0x94] ss:$12 sps:$4 sm:$0xff]  }
 0xd8c   :  { %3197 = vtanh.f32 %v2051_v32  ;;  %v3274_v32 = vld [vmem:[%s4658_s2 + $0x90] ss:$12 sps:$4 sm:$0xff]  }
 0xd96   :  { %v3198_v35 = vpop.eup %3197 }
 0xd97   :  { %v2054_v14 = vmul.f32 %v3198_v35, %v2053_v34  ;;  %v3276_v34 = vld [vmem:[%s4658_s2 + $0xa8] ss:$12 sps:$4 sm:$0xff]  }
 0xd99   :  { %v4457_v38 = vadd.f32 %v2055_v36, %v2054_v14 }
 0xd9b   :  { %v2063_v31 = vpack.c.bf16 %v4457_v38, %v4457_v38 }
 0xd9d   :  { %2097 = vmatmul.mubr.bf16.vlgmr.msra.gmra.mrb[76].mxu1 %v2063_v31  ;;  %2958 = vmatmul.mubr.bf16.vlgmr.msra.gmra.mrb[76].mxu0 %v2063_v31 }
 0xd9e   :  { %2174 = vmatpush1.bf16.msra.mxu1 %v4464_v39  ;;  %2962 = vmatpush3.bf16.msra.mxu0 %v4470_v40 }
 0xd9f   :  { %2175 = vmatprep.subr.bf16.mxu1 %v4476_v11  ;;  %2963 = vmatprep.subr.bf16.mxu0 %v4703_v47 }
 0xda0   :  { %2205 = vmatprep.mubr.bf16.mxu1 %v4704_v61  ;;  %2977 = vmatprep.mubr.msk.bf16.mxu0 %vm3279_vm1, %v4703_v47 }
 0xda2   :  { %2176 = vmatpush1.bf16.msra.mxu1 %v4486_v58  ;;  %2964 = vmatpush3.bf16.msra.mxu0 %v4492_v15 }
 0xda3   :  { %2177 = vmatprep.subr.bf16.mxu1 %v4498_v6  ;;  %2965 = vmatprep.subr.bf16.mxu0 %v4703_v47 }
 0xda6   :  { %2178 = vmatpush1.bf16.msra.mxu1 %v4505_v2  ;;  %2966 = vmatpush3.bf16.msra.mxu0 %v4511_v54 }
 0xda7   :  { %2179 = vmatprep.subr.bf16.mxu1 %v4517_v5  ;;  %2967 = vmatprep.subr.bf16.mxu0 %v4703_v47 }
 0xdaa   :  { %2180 = vmatpush1.bf16.msra.mxu1 %v4524_v50  ;;  %2968 = vmatpush3.bf16.msra.mxu0 %v4530_v42 }
 0xdab   :  { %2181 = vmatprep.subr.bf16.mxu1 %v4536_v43  ;;  %2969 = vmatprep.subr.bf16.mxu0 %v4703_v47 }
 0xdae   :  { %2182 = vmatpush1.bf16.msra.mxu1 %v4543_v46  ;;  %2970 = vmatpush3.bf16.msra.mxu0 %v4549_v44 }
 0xdaf   :  { %2183 = vmatprep.subr.bf16.mxu1 %v4555_v16  ;;  %2971 = vmatprep.subr.bf16.mxu0 %v4703_v47 }
 0xdb2   :  { %2184 = vmatpush1.bf16.msra.mxu1 %v4135_v60  ;;  %2972 = vmatpush3.bf16.msra.mxu0 %v4563_v24  ;;  %v4581_v60 = vld [vmem:[%s4658_s2 + $0xb0] ss:$12 sps:$4 sm:$0xff]  }
 0xdb3   :  { %2185 = vmatprep.subr.bf16.mxu1 %v4142_v49  ;;  %2973 = vmatprep.subr.bf16.mxu0 %v4703_v47 }
 0xdb6   :  { %2186 = vmatpush1.bf16.msra.mxu1 %v4149_v63  ;;  %2974 = vmatpush3.bf16.msra.mxu0 %v4572_v45 }
 0xdb7   :  { %2187 = vmatprep.subr.bf16.mxu1 %v4156_v48  ;;  %2975 = vmatprep.subr.bf16.mxu0 %v4703_v47 }
 0xdba   :  { %2188 = vmatpush1.bf16.msra.mxu1 %v4163_v18  ;;  %2976 = vmatpush3.bf16.msra.mxu0 %v4581_v60 }
 0xdbb   :  { %2282 = vmatprep.subr.bf16.mxu1 %v4446_v57  ;;  %2981 = vmatprep.subr.bf16.mxu0 %v4703_v47 }
 0xe70   :  { %v2098_v49 = vpop.f32.mrb[76].mxu1  ;;  %v2139_v63 = vpop.f32.mrb[76].mxu0 }
 0xe71   :  { %v2099_v62 = vadd.f32 %v2098_v49, %v3761_v17  ;;  %v2100_v48 = vpop.f32.mrb[77].mxu1  ;;  %v2959_v3 = vpop.f32.mrb[77].mxu0  ;;  %v2140_v52 = vadd.f32 %v2139_v63, %v3775_v1 }
 0xe72   :  { %v2101_v19 = vadd.f32 %v2100_v48, %v3765_v13  ;;  %v2102_v18 = vpop.f32.mrb[78].mxu1  ;;  %v2142_v21 = vpop.f32.mrb[78].mxu0 }
 0xe73   :  { %v2145_v59 = vadd.f32 %v2099_v62, %v4727_v8  ;;  %v2103_v51 = vpop.f32.mrb[79].mxu1  ;;  %v2960_v12 = vpop.f32.mrb[79].mxu0 }
 0xe74   :  { %v2152_v20 = vadd.f32 %v2101_v19, %v4728_v56 }
 0xe75   :  { %v2495_v7 = vmul.f32 -1.442695, %v2145_v59 }
 0xe76   :  { %v2496_v57 = vmul.f32 -1.442695, %v2152_v20 }
 0xe77   :  { %3199 = vpow2.f32 %v2495_v7 }
 0xe78   :  { %3201 = vpow2.f32 %v2496_v57 }
 0xe81   :  { %v3200_v0 = vpop.eup %3199 }
 0xe82   :  { %v2149_v9 = vadd.f32 1.0, %v3200_v0  ;;  %v3202_v37 = vpop.eup %3201  ;;  %v4733_v0 = vld [vmem:[#allocation10_spill] sm:$0xff] }
 0xe83   :  { %v2156_v4 = vadd.f32 1.0, %v3202_v37 }
 0xe84   :  { %3203 = vrcp.f32 %v2149_v9 }
 0xe85   :  { %3205 = vrcp.f32 %v2156_v4 }
 0xe8e   :  { %v3204_v10 = vpop.eup %3203 }
 0xe8f   :  { %v2159_v29 = vmul.f32 %v3204_v10, %v2140_v52  ;;  %v3206_v41 = vpop.eup %3205  ;;  %v4734_v52 = vld [vmem:[#allocation11_spill] sm:$0xff] }
 0xe90   :  { %v2162_v22 = vsub.f32 1.0, %v3206_v41  ;;  %v2164_v26 = vmul.f32 %v3206_v41, %v4457_v38 }
 0xe91   :  { %v2160_v53 = vadd.f32 %v2159_v29, %v4729_v55 }
 0xe93   :  { %3207 = vtanh.f32 %v2160_v53 }
 0xe9d   :  { %v3208_v23 = vpop.eup %3207 }
 0xe9e   :  { %v2163_v25 = vmul.f32 %v3208_v23, %v2162_v22 }
 0xea0   :  { %v4593_v27 = vadd.f32 %v2164_v26, %v2163_v25  ;;  %v4735_v26 = vld [vmem:[#allocation31_spill] sm:$0xff] }
 0xea2   :  { %v2172_v28 = vpack.c.bf16 %v4593_v27, %v4593_v27 }
 0xea4   :  { %2206 = vmatmul.mubr.bf16.vlgmr.msra.gmra.mrb[80].mxu1 %v2172_v28  ;;  %2978 = vmatmul.mubr.bf16.vlgmr.msra.gmra.mrb[80].mxu0 %v2172_v28 }
 0xea5   :  { %2283 = vmatpush1.bf16.msra.mxu1 %v4464_v39  ;;  %2982 = vmatpush3.bf16.msra.mxu0 %v4470_v40 }
 0xea6   :  { %2284 = vmatprep.subr.bf16.mxu1 %v4476_v11  ;;  %2983 = vmatprep.subr.bf16.mxu0 %v4703_v47 }
 0xea7   :  { %2314 = vmatprep.mubr.bf16.mxu1 %v4704_v61  ;;  %2997 = vmatprep.mubr.msk.bf16.mxu0 %vm3279_vm1, %v4703_v47  ;;  %v3272_v61 = vld [vmem:[%s4658_s2 + $0x78] ss:$12 sps:$4 sm:$0xff]  }
 0xea9   :  { %2285 = vmatpush1.bf16.msra.mxu1 %v4486_v58  ;;  %2984 = vmatpush3.bf16.msra.mxu0 %v4492_v15  ;;  %v4730_v58 = vld [vmem:[#allocation8_spill] sm:$0xff] }
 0xeaa   :  { %2286 = vmatprep.subr.bf16.mxu1 %v4498_v6  ;;  %2985 = vmatprep.subr.bf16.mxu0 %v4703_v47 }
 0xead   :  { %2287 = vmatpush1.bf16.msra.mxu1 %v4505_v2  ;;  %2986 = vmatpush3.bf16.msra.mxu0 %v4511_v54  ;;  %v4731_v2 = vld [vmem:[#allocation9_spill] sm:$0xff] }
 0xeae   :  { %2288 = vmatprep.subr.bf16.mxu1 %v4517_v5  ;;  %2987 = vmatprep.subr.bf16.mxu0 %v4703_v47 }
 0xeb1   :  { %2289 = vmatpush1.bf16.msra.mxu1 %v4524_v50  ;;  %2988 = vmatpush3.bf16.msra.mxu0 %v4530_v42 }
 0xeb2   :  { %2290 = vmatprep.subr.bf16.mxu1 %v4536_v43  ;;  %2989 = vmatprep.subr.bf16.mxu0 %v4703_v47 }
 0xeb5   :  { %2291 = vmatpush1.bf16.msra.mxu1 %v4543_v46  ;;  %2990 = vmatpush3.bf16.msra.mxu0 %v4549_v44 }
 0xeb6   :  { %2292 = vmatprep.subr.bf16.mxu1 %v4555_v16  ;;  %2991 = vmatprep.subr.bf16.mxu0 %v4703_v47 }
 0xeb9   :  { %2293 = vmatpush1.bf16.msra.mxu1 %v3272_v61  ;;  %2992 = vmatpush3.bf16.msra.mxu0 %v4563_v24 }
 0xeba   :  { %2294 = vmatprep.subr.bf16.mxu1 %v3273_v30  ;;  %2993 = vmatprep.subr.bf16.mxu0 %v4703_v47 }
 0xebd   :  { %2295 = vmatpush1.bf16.msra.mxu1 %v3274_v32  ;;  %2994 = vmatpush3.bf16.msra.mxu0 %v4572_v45 }
 0xebe   :  { %2296 = vmatprep.subr.bf16.mxu1 %v3275_v33  ;;  %2995 = vmatprep.subr.bf16.mxu0 %v4703_v47 }
 0xec1   :  { %2297 = vmatpush1.bf16.msra.mxu1 %v3276_v34  ;;  %2996 = vmatpush3.bf16.msra.mxu0 %v4581_v60  ;;  %v4732_v60 = vld [vmem:[#allocation27_spill] sm:$0xff] }
 0xf77   :  { %v2207_v35 = vpop.f32.mrb[80].mxu1  ;;  %v2248_v14 = vpop.f32.mrb[80].mxu0 }
 0xf78   :  { %v2208_v36 = vadd.f32 %v2207_v35, %v3761_v17  ;;  %v2209_v38 = vpop.f32.mrb[81].mxu1  ;;  %v2979_v31 = vpop.f32.mrb[81].mxu0  ;;  %v2249_v16 = vadd.f32 %v2248_v14, %v3775_v1 }
 0xf79   :  { %v2210_v39 = vadd.f32 %v2209_v38, %v3765_v13  ;;  %v2211_v40 = vpop.f32.mrb[82].mxu1  ;;  %v2251_v11 = vpop.f32.mrb[82].mxu0 }
 0xf7a   :  { %v2254_v15 = vadd.f32 %v2208_v36, %v4730_v58  ;;  %v2212_v47 = vpop.f32.mrb[83].mxu1  ;;  %v2980_v6 = vpop.f32.mrb[83].mxu0 }
 0xf7b   :  { %v2261_v54 = vadd.f32 %v2210_v39, %v4731_v2 }
 0xf7c   :  { %v2497_v5 = vmul.f32 -1.442695, %v2254_v15 }
 0xf7d   :  { %v2498_v50 = vmul.f32 -1.442695, %v2261_v54 }
 0xf7e   :  { %3209 = vpow2.f32 %v2497_v5 }
 0xf7f   :  { %3211 = vpow2.f32 %v2498_v50 }
 0xf88   :  { %v3210_v42 = vpop.eup %3209 }
 0xf89   :  { %v2258_v43 = vadd.f32 1.0, %v3210_v42  ;;  %v3212_v46 = vpop.eup %3211 }
 0xf8a   :  { %v2265_v44 = vadd.f32 1.0, %v3212_v46 }
 0xf8b   :  { %3213 = vrcp.f32 %v2258_v43 }
 0xf8c   :  { %3215 = vrcp.f32 %v2265_v44 }
 0xf95   :  { %v3214_v24 = vpop.eup %3213 }
 0xf96   :  { %v2268_v45 = vmul.f32 %v3214_v24, %v2249_v16  ;;  %v3216_v63 = vpop.eup %3215 }
 0xf97   :  { %v2271_v62 = vsub.f32 1.0, %v3216_v63  ;;  %v2273_v19 = vmul.f32 %v3216_v63, %v4593_v27 }
 0xf98   :  { %v2269_v49 = vadd.f32 %v2268_v45, %v4732_v60 }
 0xf9a   :  { %3217 = vtanh.f32 %v2269_v49 }
 0xfa4   :  { %v3218_v48 = vpop.eup %3217 }
 0xfa5   :  { %v2272_v3 = vmul.f32 %v3218_v48, %v2271_v62 }
 0xfa7   :  { %v2274_v18 = vadd.f32 %v2273_v19, %v2272_v3 }
 0xfa9   :  { %v2281_v21 = vpack.c.bf16 %v2274_v18, %v2274_v18 }
 0xfab   :  { %2315 = vmatmul.mubr.bf16.vlgmr.msra.gmra.mrb[84].mxu1 %v2281_v21  ;;  %2998 = vmatmul.mubr.bf16.vlgmr.msra.gmra.mrb[84].mxu0 %v2281_v21 }
0x107e   :  { %v2316_v8 = vpop.f32.mrb[84].mxu1  ;;  %v2357_v59 = vpop.f32.mrb[84].mxu0 }
0x107f   :  { %v2317_v51 = vadd.f32 %v2316_v8, %v3761_v17  ;;  %v2318_v12 = vpop.f32.mrb[85].mxu1  ;;  %v2999_v56 = vpop.f32.mrb[85].mxu0  ;;  %v2358_v23 = vadd.f32 %v2357_v59, %v3775_v1 }
0x1080   :  { %v2319_v20 = vadd.f32 %v2318_v12, %v3765_v13  ;;  %v2320_v7 = vpop.f32.mrb[86].mxu1  ;;  %v2360_v57 = vpop.f32.mrb[86].mxu0 }
0x1081   :  { %v2363_v9 = vadd.f32 %v2317_v51, %v4733_v0  ;;  %v2321_v37 = vpop.f32.mrb[87].mxu1  ;;  %v3000_v4 = vpop.f32.mrb[87].mxu0 }
0x1082   :  { %v2370_v10 = vadd.f32 %v2319_v20, %v4734_v52 }
0x1083   :  { %v2499_v29 = vmul.f32 -1.442695, %v2363_v9 }
0x1084   :  { %v2500_v55 = vmul.f32 -1.442695, %v2370_v10 }
0x1085   :  { %3219 = vpow2.f32 %v2499_v29 }
0x1086   :  { %3221 = vpow2.f32 %v2500_v55 }
0x108f   :  { %v3220_v53 = vpop.eup %3219 }
0x1090   :  { %v2367_v41 = vadd.f32 1.0, %v3220_v53  ;;  %v3222_v17 = vpop.eup %3221 }
0x1091   :  { %v2374_v22 = vadd.f32 1.0, %v3222_v17 }
0x1092   :  { %3223 = vrcp.f32 %v2367_v41 }
0x1093   :  { %3225 = vrcp.f32 %v2374_v22 }
0x109c   :  { %v3224_v13 = vpop.eup %3223 }
0x109d   :  { %v2377_v25 = vmul.f32 %v3224_v13, %v2358_v23  ;;  %v3226_v28 = vpop.eup %3225 }
0x109e   :  { %v2380_v61 = vsub.f32 1.0, %v3226_v28  ;;  %v2382_v33 = vmul.f32 %v3226_v28, %v2274_v18 }
0x109f   :  { %v2378_v27 = vadd.f32 %v2377_v25, %v4735_v26 }
0x10a1   :  { %3227 = vtanh.f32 %v2378_v27 }
0x10ab   :  { %v3228_v30 = vpop.eup %3227 }
0x10ac   :  { %v2381_v32 = vmul.f32 %v3228_v30, %v2380_v61 }
0x10ae   :  { %v2383_v34 = vadd.f32 %v2382_v33, %v2381_v32 }
0x10b0   :  { %2389 = vst [vmem:[%s4661_s5] sm:$0xff] %v2383_v34 }

</bundles_post_ra>
